<compile_context>
chip_gen: v5e
topology: v5e:2x2
jax: 0.10.0
libtpu: 0.0.40
codegen_flags: <defaults>
</compile_context>

<pallas_src>
import functools
import math

import numpy as np
import jax
import jax.numpy as jnp
from jax import lax
from jax.experimental import pallas as pl
from jax.experimental.pallas import tpu as pltpu

KS = 5  # conv kernel extent (5x5x5)


# ---------------------------------------------------------------------------
# Fused Pallas kernel: whole forward pass for one batch element per grid step.
# ---------------------------------------------------------------------------
def _fused_forward_kernel(x_ref, wc_ref, bias_ref, ws_last_ref, bs_last_ref,
                          y_ref, xpad_ref, *,
                          layers, conv_dilations, num_filter, classnum, pad):
    """Lane-packed layout: activation lane index = c*W + w (c-major).

    x_ref      : (1, D, H, Cmax*W)                 lane-packed, channel-padded input
    wc_ref     : ((layers-1)*25, Cmax*W, (F+CL)*W) banded conv(+skip) weights per tap
    bias_ref   : (layers-1, 1, (F+CL)*W)           conv + skip biases, lane-expanded
    ws_last_ref: (Cmax*W, CL*W)                    banded skip weight of the last block
    bs_last_ref: (1, CL*W)
    y_ref      : (1, D*H, CL*W)                    output (col = k*W + w)
    xpad_ref   : (1, D+2P, H+2P, Cmax*W)           VMEM scratch (D/H-padded activation)
    """
    _, D, H, CWL = x_ref.shape
    F, CL = num_filter, classnum
    W = CWL // (2 * F)
    OWL = (F + CL) * W
    P = pad
    Hp = H + 2 * P
    M2 = D * H
    f32 = jnp.float32

    # --- zero only the halo frame (central region is rewritten every layer) --
    xpad_ref[:, :P, :, :] = jnp.zeros((1, P, Hp, CWL), f32)
    xpad_ref[:, P + D:, :, :] = jnp.zeros((1, P, Hp, CWL), f32)
    xpad_ref[:, P:P + D, :P, :] = jnp.zeros((1, D, P, CWL), f32)
    xpad_ref[:, P:P + D, P + H:, :] = jnp.zeros((1, D, P, CWL), f32)

    # --- place the lane-packed input in the central region --------------------
    xpad_ref[:, P:P + D, P:P + H, :] = x_ref[...]

    y = None
    folded = None
    for i in range(layers - 1):
        dil = conv_dilations[i]

        def kd_body(kd, acc, _i=i, _dil=dil):
            z0 = P - 2 * _dil + kd * _dil              # dynamic, major axis only
            for kh in range(KS):                       # static sublane offsets
                h0 = P + (kh - 2) * _dil
                slab = xpad_ref[:, pl.ds(z0, D), h0:h0 + H, :]       # (1,D,H,CWL)
                wt = wc_ref[_i * KS * KS + kd * KS + kh]             # (CWL, OWL)
                acc = acc + jnp.dot(slab.reshape(M2, CWL), wt,
                                    preferred_element_type=f32)
            return acc

        acc = lax.fori_loop(0, KS, kd_body, jnp.zeros((M2, OWL), f32))
        acc = acc + bias_ref[i]                         # conv + skip biases at once
        conv_out = acc[:, :F * W]                       # dilated conv, col = f*W + w
        t_skip = acc[:, F * W:]                         # fused 1x1x1 skip, col = k*W + w
        y = 0.5 * t_skip if y is None else 0.5 * y + 0.5 * t_skip

        # Fold == CReLU (assumed): channels become [relu(x), relu(-x)], c-major lanes.
        folded = jnp.concatenate([jnp.maximum(conv_out, 0.0),
                                  jnp.maximum(-conv_out, 0.0)], axis=-1)  # (M2, CWL)
        if i < layers - 2:                              # last conv's output is only
            xpad_ref[:, P:P + D, P:P + H, :] = folded.reshape(1, D, H, CWL)

    # --- last block: main conv is Identity; only its skip conv remains -------
    t_skip = jnp.dot(folded, ws_last_ref[...],
                     preferred_element_type=f32) + bs_last_ref[...]
    y = 0.5 * y + 0.5 * t_skip
    y_ref[...] = y.reshape(1, M2, CL * W)


# ---------------------------------------------------------------------------
# Weight packing: build banded (w-fused) matmul weights on the host.
# ---------------------------------------------------------------------------
def _pack_params(conv_params, skip_params, conv_dilations, num_filter, classnum, W):
    layers = len(skip_params)
    F, CL = num_filter, classnum
    cmax = 2 * F
    owl = (F + CL) * W

    wc_all = np.zeros((layers - 1, KS * KS, cmax, W, F + CL, W), np.float32)
    bias_all = np.zeros((layers - 1, 1, owl), np.float32)
    for i in range(layers - 1):
        w_c, b_c = conv_params[i]                       # (5,5,5,Cin,F), (F,)
        w_s, b_s = skip_params[i]                       # (Cin,CL), (CL,)
        w_c = np.asarray(w_c, np.float32)
        w_s = np.asarray(w_s, np.float32)
        cin = w_c.shape[3]
        dil = int(conv_dilations[i])
        for kd in range(KS):
            for kh in range(KS):
                tap = kd * KS + kh
                for kw in range(KS):
                    off = (kw - 2) * dil
                    for w in range(W):
                        w_in = w + off
                        if 0 <= w_in < W:               # implicit 'same' W-padding
                            wc_all[i, tap, :cin, w_in, :F, w] += w_c[kd, kh, kw]
        # fold the 1x1x1 skip conv into the centre tap (kd=kh=kw=2 reads x[d,h,w])
        center = 2 * KS + 2
        for w in range(W):
            wc_all[i, center, :cin, w, F:, w] += w_s
        bias_all[i, 0, :F * W] = np.repeat(np.asarray(b_c, np.float32), W)
        bias_all[i, 0, F * W:] = np.repeat(np.asarray(b_s, np.float32), W)

    # last block: skip conv only (main conv is Identity)
    w_s, b_s = skip_params[layers - 1]
    w_s = np.asarray(w_s, np.float32)                   # (Cmax, CL)
    cin = w_s.shape[0]
    ws_last = np.zeros((cmax, W, CL, W), np.float32)
    for w in range(W):
        ws_last[:cin, w, :, w] = w_s
    bs_last = np.repeat(np.asarray(b_s, np.float32), W).reshape(1, CL * W)

    wc_flat = wc_all.reshape((layers - 1) * KS * KS, cmax * W, owl)
    return (jnp.asarray(wc_flat), jnp.asarray(bias_all),
            jnp.asarray(ws_last.reshape(cmax * W, CL * W)), jnp.asarray(bs_last))


# ---------------------------------------------------------------------------
# Wrapper: layout conversion + pallas_call.
# ---------------------------------------------------------------------------
def panc_seg_forward(x_ncdhw, conv_params, skip_params, dilations, *,
                     num_filter, classnum):
    """Pallas forward. Input (N, 1, D, H, W) -> output (N, classnum, D, H, W)."""
    layers = len(skip_params)
    assert layers >= 2, "fused kernel assumes at least one real conv block"
    N, c_in, D, H, W = (int(s) for s in x_ncdhw.shape)
    F, CL = num_filter, classnum
    cmax = 2 * F
    conv_dils = tuple(int(d) for d in dilations[:layers - 1])
    P = 2 * max(conv_dils)                              # largest 'same' padding
    CWL = cmax * W
    OWL = (F + CL) * W

    # NCDHW -> (N, D, H, C, W) -> zero-pad channels to Cmax -> lanes = c*W + w
    x = jnp.transpose(x_ncdhw, (0, 2, 3, 1, 4)).astype(jnp.float32)
    x = jnp.pad(x, ((0, 0), (0, 0), (0, 0), (0, cmax - c_in), (0, 0)))
    x = x.reshape(N, D, H, CWL)

    wc, bias, ws_last, bs_last = _pack_params(conv_params, skip_params, conv_dils,
                                              F, CL, W)

    kernel = functools.partial(
        _fused_forward_kernel, layers=layers, conv_dilations=conv_dils,
        num_filter=F, classnum=CL, pad=P)

    y = pl.pallas_call(
        kernel,
        out_shape=jax.ShapeDtypeStruct((N, D * H, CL * W), jnp.float32),
        grid=(N,),
        in_specs=[
            pl.BlockSpec((1, D, H, CWL), lambda n: (n, 0, 0, 0)),
            pl.BlockSpec(((layers - 1) * KS * KS, CWL, OWL), lambda n: (0, 0, 0)),
            pl.BlockSpec((layers - 1, 1, OWL), lambda n: (0, 0, 0)),
            pl.BlockSpec((CWL, CL * W), lambda n: (0, 0)),
            pl.BlockSpec((1, CL * W), lambda n: (0, 0)),
        ],
        out_specs=pl.BlockSpec((1, D * H, CL * W), lambda n: (n, 0, 0)),
        scratch_shapes=[pltpu.VMEM((1, D + 2 * P, H + 2 * P, CWL), jnp.float32)],
        compiler_params=pltpu.CompilerParams(
            dimension_semantics=("parallel",),          # shards batch over v7x's 2 TCs
            vmem_limit_bytes=32 * 1024 * 1024),
    )(x, wc, bias, ws_last, bs_last)

    y = y.reshape(N, D, H, CL, W)                       # col = k*W + w
    return jnp.transpose(y, (0, 3, 1, 2, 4))            # -> (N, classnum, D, H, W)


# ---------------------------------------------------------------------------
# Model construction (mirrors Panc_Seg_Bottled_Sum.__init__) + JAX reference.
# ---------------------------------------------------------------------------
def make_dilations(layers):
    return tuple([x + 1 for x in range(layers // 2)]
                 + [(layers + 1) // 2 - x for x in range((layers + 1) // 2)])


def init_params(key, layers, classnum, num_filter, filter_scale=1, init_coef=1.0):
    num_filter = math.ceil(num_filter * filter_scale)
    conv_params, skip_params = [], []
    in_ch = 1
    for i in range(layers):
        key, k1, k2 = jax.random.split(key, 3)
        s = 1.0 / math.sqrt(in_ch)
        w_s = jax.random.uniform(k1, (in_ch, classnum), jnp.float32, -s, s) * init_coef
        b_s = jax.random.uniform(k2, (classnum,), jnp.float32, -s, s)
        skip_params.append((w_s, b_s))
        if i < layers - 1:                              # last block's conv is Identity
            key, k3, k4 = jax.random.split(key, 3)
            s = 1.0 / math.sqrt(in_ch * 5 * 5 * 5)
            w_c = jax.random.uniform(k3, (5, 5, 5, in_ch, num_filter),
                                     jnp.float32, -s, s) * init_coef
            b_c = jax.random.uniform(k4, (num_filter,), jnp.float32, -s, s)
            conv_params.append((w_c, b_c))
            in_ch = num_filter * 2                      # Fold doubles channels
    return conv_params, skip_params


def reference_forward(x_ncdhw, conv_params, skip_params, dilations):
    """Plain-JAX reference (lax.conv_general_dilated) for correctness checking."""
    x = jnp.transpose(x_ncdhw, (0, 2, 3, 4, 1)).astype(jnp.float32)   # NDHWC
    layers = len(skip_params)
    y = jnp.zeros((1,), jnp.float32)
    for i in range(layers):
        w_s, b_s = skip_params[i]
        t = jnp.einsum('ndhwc,cf->ndhwf', x, w_s) + b_s
        y = y / 2 + t / 2
        if i < layers - 1:
            w_c, b_c = conv_params[i]
            d = int(dilations[i])
            p = 2 * d
            out = lax.conv_general_dilated(
                x, w_c, window_strides=(1, 1, 1), padding=[(p, p)] * 3,
                rhs_dilation=(d, d, d),
                dimension_numbers=('NDHWC', 'DHWIO', 'NDHWC')) + b_c
            # TODO(synk): Fold() assumed to be CReLU.
            x = jnp.concatenate([jnp.maximum(out, 0.0), jnp.maximum(-out, 0.0)],
                                axis=-1)
    return jnp.transpose(y, (0, 4, 1, 2, 3))


if __name__ == "__main__":
    # Small shapes: layers=4, classnum=2, num_filter=8, batch=2, 8^3 volume.
    LAYERS, CLASSNUM, NUM_FILTER = 4, 2, 8
    N, D, H, W = 2, 8, 8, 8

    key = jax.random.PRNGKey(0)
    key, kx = jax.random.split(key)
    x = jax.random.normal(kx, (N, 1, D, H, W), jnp.float32)   # NCDHW like PyTorch

    conv_params, skip_params = init_params(key, LAYERS, CLASSNUM, NUM_FILTER)
    dilations = make_dilations(LAYERS)                        # (1, 2, 2, 1)

    out = panc_seg_forward(x, conv_params, skip_params, dilations,
                           num_filter=NUM_FILTER, classnum=CLASSNUM)
    out = jax.block_until_ready(out)
    assert out.shape == (N, CLASSNUM, D, H, W), out.shape

    ref = jax.block_until_ready(
        reference_forward(x, conv_params, skip_params, dilations))
    max_err = float(jnp.max(jnp.abs(out - ref)))
    assert jnp.allclose(out, ref, rtol=2e-3, atol=2e-3), ("mismatch", max_err)

    print("KERNEL_OK")
</pallas_src>

<mosaic_0001>
module attributes {stable_mosaic.version = 11 : i64} {
  func.func @_fused_forward_kernel(%arg0: i32, %arg1: memref<1x8x8x128xf32, #tpu.memory_space<vmem>>, %arg2: memref<75x128x80xf32, #tpu.memory_space<vmem>>, %arg3: memref<3x1x80xf32, #tpu.memory_space<vmem>>, %arg4: memref<128x16xf32, #tpu.memory_space<vmem>>, %arg5: memref<1x16xf32, #tpu.memory_space<vmem>>, %arg6: memref<1x64x16xf32, #tpu.memory_space<vmem>>, %arg7: memref<1x16x16x128xf32, #tpu.memory_space<vmem>>) attributes {dimension_semantics = [#tpu.dimension_semantics<parallel>], iteration_bounds = array<i64: 2>, scalar_prefetch = 0 : i64, scratch_operands = 1 : i64, tpu.core_type = #tpu.core_type<tc>, window_params = [{transform_indices = @transform_0, window_bounds = array<i64: 1, 8, 8, 128>}, {pipeline_mode = #tpu.pipeline_mode<synchronous>, transform_indices = @transform_1, window_bounds = array<i64: 75, 128, 80>}, {pipeline_mode = #tpu.pipeline_mode<synchronous>, transform_indices = @transform_2, window_bounds = array<i64: 3, 1, 80>}, {pipeline_mode = #tpu.pipeline_mode<synchronous>, transform_indices = @transform_3, window_bounds = array<i64: 128, 16>}, {pipeline_mode = #tpu.pipeline_mode<synchronous>, transform_indices = @transform_4, window_bounds = array<i64: 1, 16>}, {transform_indices = @transform_5, window_bounds = array<i64: 1, 64, 16>}]} {
    %cst = arith.constant 0.000000e+00 : f32
    %0 = vector.broadcast %cst : f32 to vector<1x4x16x128xf32>
    %c0 = arith.constant 0 : index
    %c0_0 = arith.constant 0 : index
    %c0_1 = arith.constant 0 : index
    %c0_2 = arith.constant 0 : index
    %1 = vector.load %arg7[%c0, %c0_0, %c0_1, %c0_2] : memref<1x16x16x128xf32, #tpu.memory_space<vmem>>, vector<1x4x16x128xf32>
    tpu.vector_store %arg7[%c0, %c0_0, %c0_1, %c0_2], %0 {strides = array<i32>} : memref<1x16x16x128xf32, #tpu.memory_space<vmem>>, vector<1x4x16x128xf32>,
    %cst_3 = arith.constant 0.000000e+00 : f32
    %2 = vector.broadcast %cst_3 : f32 to vector<1x4x16x128xf32>
    %c0_4 = arith.constant 0 : index
    %c12 = arith.constant 12 : index
    %c0_5 = arith.constant 0 : index
    %c0_6 = arith.constant 0 : index
    %3 = vector.load %arg7[%c0_4, %c12, %c0_5, %c0_6] : memref<1x16x16x128xf32, #tpu.memory_space<vmem>>, vector<1x4x16x128xf32>
    tpu.vector_store %arg7[%c0_4, %c12, %c0_5, %c0_6], %2 {strides = array<i32>} : memref<1x16x16x128xf32, #tpu.memory_space<vmem>>, vector<1x4x16x128xf32>,
    %cst_7 = arith.constant 0.000000e+00 : f32
    %4 = vector.broadcast %cst_7 : f32 to vector<1x8x4x128xf32>
    %c0_8 = arith.constant 0 : index
    %c4 = arith.constant 4 : index
    %c0_9 = arith.constant 0 : index
    %c0_10 = arith.constant 0 : index
    %5 = vector.load %arg7[%c0_8, %c4, %c0_9, %c0_10] : memref<1x16x16x128xf32, #tpu.memory_space<vmem>>, vector<1x8x4x128xf32>
    tpu.vector_store %arg7[%c0_8, %c4, %c0_9, %c0_10], %4 {strides = array<i32>} : memref<1x16x16x128xf32, #tpu.memory_space<vmem>>, vector<1x8x4x128xf32>,
    %cst_11 = arith.constant 0.000000e+00 : f32
    %6 = vector.broadcast %cst_11 : f32 to vector<1x8x4x128xf32>
    %c0_12 = arith.constant 0 : index
    %c4_13 = arith.constant 4 : index
    %c12_14 = arith.constant 12 : index
    %c0_15 = arith.constant 0 : index
    %7 = vector.load %arg7[%c0_12, %c4_13, %c12_14, %c0_15] : memref<1x16x16x128xf32, #tpu.memory_space<vmem>>, vector<1x8x4x128xf32>
    tpu.vector_store %arg7[%c0_12, %c4_13, %c12_14, %c0_15], %6 {strides = array<i32>} : memref<1x16x16x128xf32, #tpu.memory_space<vmem>>, vector<1x8x4x128xf32>,
    %c0_16 = arith.constant 0 : index
    %c0_17 = arith.constant 0 : index
    %c0_18 = arith.constant 0 : index
    %c0_19 = arith.constant 0 : index
    %8 = vector.load %arg1[%c0_16, %c0_17, %c0_18, %c0_19] : memref<1x8x8x128xf32, #tpu.memory_space<vmem>>, vector<1x8x8x128xf32>
    %c0_20 = arith.constant 0 : index
    %c4_21 = arith.constant 4 : index
    %c4_22 = arith.constant 4 : index
    %c0_23 = arith.constant 0 : index
    %9 = vector.load %arg7[%c0_20, %c4_21, %c4_22, %c0_23] : memref<1x16x16x128xf32, #tpu.memory_space<vmem>>, vector<1x8x8x128xf32>
    tpu.vector_store %arg7[%c0_20, %c4_21, %c4_22, %c0_23], %8 {strides = array<i32>} : memref<1x16x16x128xf32, #tpu.memory_space<vmem>>, vector<1x8x8x128xf32>,
    %cst_24 = arith.constant 0.000000e+00 : f32
    %10 = vector.broadcast %cst_24 : f32 to vector<64x80xf32>
    %c0_i32 = arith.constant 0 : i32
    %c5_i32 = arith.constant 5 : i32
    %11 = arith.addi %c0_i32, %c5_i32 : i32
    %c1_i32 = arith.constant 1 : i32
    %12 = scf.for %arg8 = %c0_i32 to %11 step %c1_i32 iter_args(%arg9 = %10) -> (vector<64x80xf32>)  : i32 {
      %c1_i32_75 = arith.constant 1 : i32
      %86 = arith.muli %arg8, %c1_i32_75 : i32
      %c2_i32 = arith.constant 2 : i32
      %87 = arith.addi %c2_i32, %86 : i32
      %c0_76 = arith.constant 0 : index
      %88 = arith.index_cast %87 : i32 to index
      %c2_77 = arith.constant 2 : index
      %c0_78 = arith.constant 0 : index
      %89 = vector.load %arg7[%c0_76, %88, %c2_77, %c0_78] : memref<1x16x16x128xf32, #tpu.memory_space<vmem>>, vector<1x8x8x128xf32>
      %c5_i32_79 = arith.constant 5 : i32
      %90 = arith.muli %arg8, %c5_i32_79 : i32
      %c0_i32_80 = arith.constant 0 : i32
      %91 = arith.addi %c0_i32_80, %90 : i32
      %c0_i32_81 = arith.constant 0 : i32
      %92 = arith.addi %91, %c0_i32_81 : i32
      %93 = arith.index_cast %92 : i32 to index
      %c0_82 = arith.constant 0 : index
      %c0_83 = arith.constant 0 : index
      %94 = vector.load %arg2[%93, %c0_82, %c0_83] : memref<75x128x80xf32, #tpu.memory_space<vmem>>, vector<1x128x80xf32>
      %95 = vector.shape_cast %94 : vector<1x128x80xf32> to vector<128x80xf32>
      %96 = vector.shape_cast %89 : vector<1x8x8x128xf32> to vector<64x128xf32>
      %cst_84 = arith.constant dense<0.000000e+00> : vector<64x80xf32>
      %97 = tpu.matmul %96, %95, %cst_84 {dimension_numbers = #tpu.dot_dimension_numbers<[1], [0], [0], [1], [0, 0, 1, 1], [], []>} : vector<64x128xf32>, vector<128x80xf32>, vector<64x80xf32> -> vector<64x80xf32>
      %98 = arith.addf %arg9, %97 : vector<64x80xf32>
      %c0_85 = arith.constant 0 : index
      %99 = arith.index_cast %87 : i32 to index
      %c3 = arith.constant 3 : index
      %c0_86 = arith.constant 0 : index
      %100 = vector.load %arg7[%c0_85, %99, %c3, %c0_86] : memref<1x16x16x128xf32, #tpu.memory_space<vmem>>, vector<1x8x8x128xf32>
      %c5_i32_87 = arith.constant 5 : i32
      %101 = arith.muli %arg8, %c5_i32_87 : i32
      %c0_i32_88 = arith.constant 0 : i32
      %102 = arith.addi %c0_i32_88, %101 : i32
      %c1_i32_89 = arith.constant 1 : i32
      %103 = arith.addi %102, %c1_i32_89 : i32
      %104 = arith.index_cast %103 : i32 to index
      %c0_90 = arith.constant 0 : index
      %c0_91 = arith.constant 0 : index
      %105 = vector.load %arg2[%104, %c0_90, %c0_91] : memref<75x128x80xf32, #tpu.memory_space<vmem>>, vector<1x128x80xf32>
      %106 = vector.shape_cast %105 : vector<1x128x80xf32> to vector<128x80xf32>
      %107 = vector.shape_cast %100 : vector<1x8x8x128xf32> to vector<64x128xf32>
      %cst_92 = arith.constant dense<0.000000e+00> : vector<64x80xf32>
      %108 = tpu.matmul %107, %106, %cst_92 {dimension_numbers = #tpu.dot_dimension_numbers<[1], [0], [0], [1], [0, 0, 1, 1], [], []>} : vector<64x128xf32>, vector<128x80xf32>, vector<64x80xf32> -> vector<64x80xf32>
      %109 = arith.addf %98, %108 : vector<64x80xf32>
      %c0_93 = arith.constant 0 : index
      %110 = arith.index_cast %87 : i32 to index
      %c4_94 = arith.constant 4 : index
      %c0_95 = arith.constant 0 : index
      %111 = vector.load %arg7[%c0_93, %110, %c4_94, %c0_95] : memref<1x16x16x128xf32, #tpu.memory_space<vmem>>, vector<1x8x8x128xf32>
      %c5_i32_96 = arith.constant 5 : i32
      %112 = arith.muli %arg8, %c5_i32_96 : i32
      %c0_i32_97 = arith.constant 0 : i32
      %113 = arith.addi %c0_i32_97, %112 : i32
      %c2_i32_98 = arith.constant 2 : i32
      %114 = arith.addi %113, %c2_i32_98 : i32
      %115 = arith.index_cast %114 : i32 to index
      %c0_99 = arith.constant 0 : index
      %c0_100 = arith.constant 0 : index
      %116 = vector.load %arg2[%115, %c0_99, %c0_100] : memref<75x128x80xf32, #tpu.memory_space<vmem>>, vector<1x128x80xf32>
      %117 = vector.shape_cast %116 : vector<1x128x80xf32> to vector<128x80xf32>
      %118 = vector.shape_cast %111 : vector<1x8x8x128xf32> to vector<64x128xf32>
      %cst_101 = arith.constant dense<0.000000e+00> : vector<64x80xf32>
      %119 = tpu.matmul %118, %117, %cst_101 {dimension_numbers = #tpu.dot_dimension_numbers<[1], [0], [0], [1], [0, 0, 1, 1], [], []>} : vector<64x128xf32>, vector<128x80xf32>, vector<64x80xf32> -> vector<64x80xf32>
      %120 = arith.addf %109, %119 : vector<64x80xf32>
      %c0_102 = arith.constant 0 : index
      %121 = arith.index_cast %87 : i32 to index
      %c5 = arith.constant 5 : index
      %c0_103 = arith.constant 0 : index
      %122 = vector.load %arg7[%c0_102, %121, %c5, %c0_103] : memref<1x16x16x128xf32, #tpu.memory_space<vmem>>, vector<1x8x8x128xf32>
      %c5_i32_104 = arith.constant 5 : i32
      %123 = arith.muli %arg8, %c5_i32_104 : i32
      %c0_i32_105 = arith.constant 0 : i32
      %124 = arith.addi %c0_i32_105, %123 : i32
      %c3_i32 = arith.constant 3 : i32
      %125 = arith.addi %124, %c3_i32 : i32
      %126 = arith.index_cast %125 : i32 to index
      %c0_106 = arith.constant 0 : index
      %c0_107 = arith.constant 0 : index
      %127 = vector.load %arg2[%126, %c0_106, %c0_107] : memref<75x128x80xf32, #tpu.memory_space<vmem>>, vector<1x128x80xf32>
      %128 = vector.shape_cast %127 : vector<1x128x80xf32> to vector<128x80xf32>
      %129 = vector.shape_cast %122 : vector<1x8x8x128xf32> to vector<64x128xf32>
      %cst_108 = arith.constant dense<0.000000e+00> : vector<64x80xf32>
      %130 = tpu.matmul %129, %128, %cst_108 {dimension_numbers = #tpu.dot_dimension_numbers<[1], [0], [0], [1], [0, 0, 1, 1], [], []>} : vector<64x128xf32>, vector<128x80xf32>, vector<64x80xf32> -> vector<64x80xf32>
      %131 = arith.addf %120, %130 : vector<64x80xf32>
      %c0_109 = arith.constant 0 : index
      %132 = arith.index_cast %87 : i32 to index
      %c6 = arith.constant 6 : index
      %c0_110 = arith.constant 0 : index
      %133 = vector.load %arg7[%c0_109, %132, %c6, %c0_110] : memref<1x16x16x128xf32, #tpu.memory_space<vmem>>, vector<1x8x8x128xf32>
      %c5_i32_111 = arith.constant 5 : i32
      %134 = arith.muli %arg8, %c5_i32_111 : i32
      %c0_i32_112 = arith.constant 0 : i32
      %135 = arith.addi %c0_i32_112, %134 : i32
      %c4_i32 = arith.constant 4 : i32
      %136 = arith.addi %135, %c4_i32 : i32
      %137 = arith.index_cast %136 : i32 to index
      %c0_113 = arith.constant 0 : index
      %c0_114 = arith.constant 0 : index
      %138 = vector.load %arg2[%137, %c0_113, %c0_114] : memref<75x128x80xf32, #tpu.memory_space<vmem>>, vector<1x128x80xf32>
      %139 = vector.shape_cast %138 : vector<1x128x80xf32> to vector<128x80xf32>
      %140 = vector.shape_cast %133 : vector<1x8x8x128xf32> to vector<64x128xf32>
      %cst_115 = arith.constant dense<0.000000e+00> : vector<64x80xf32>
      %141 = tpu.matmul %140, %139, %cst_115 {dimension_numbers = #tpu.dot_dimension_numbers<[1], [0], [0], [1], [0, 0, 1, 1], [], []>} : vector<64x128xf32>, vector<128x80xf32>, vector<64x80xf32> -> vector<64x80xf32>
      %142 = arith.addf %131, %141 : vector<64x80xf32>
      scf.yield %142 : vector<64x80xf32>
    }
    %c5_i32_25 = arith.constant 5 : i32
    %c0_26 = arith.constant 0 : index
    %c0_27 = arith.constant 0 : index
    %c0_28 = arith.constant 0 : index
    %13 = vector.load %arg3[%c0_26, %c0_27, %c0_28] : memref<3x1x80xf32, #tpu.memory_space<vmem>>, vector<1x1x80xf32>
    %14 = vector.shape_cast %13 : vector<1x1x80xf32> to vector<1x80xf32>
    %15 = vector.broadcast %14 : vector<1x80xf32> to vector<64x80xf32>
    %16 = arith.addf %12, %15 : vector<64x80xf32>
    %17 = vector.extract_strided_slice %16 {offsets = [0, 0], sizes = [64, 64], strides = [1, 1]} : vector<64x80xf32> to vector<64x64xf32>
    %18 = vector.extract_strided_slice %16 {offsets = [0, 64], sizes = [64, 16], strides = [1, 1]} : vector<64x80xf32> to vector<64x16xf32>
    %cst_29 = arith.constant 5.000000e-01 : f32
    %19 = vector.broadcast %cst_29 : f32 to vector<64x16xf32>
    %20 = arith.mulf %19, %18 : vector<64x16xf32>
    %cst_30 = arith.constant 0.000000e+00 : f32
    %21 = vector.broadcast %cst_30 : f32 to vector<64x64xf32>
    %22 = arith.maximumf %17, %21 : vector<64x64xf32>
    %cst_31 = arith.constant 0.000000e+00 : f32
    %23 = vector.broadcast %cst_31 : f32 to vector<64x64xf32>
    %24 = arith.subf %23, %17 : vector<64x64xf32>
    %cst_32 = arith.constant 0.000000e+00 : f32
    %25 = vector.broadcast %cst_32 : f32 to vector<64x64xf32>
    %26 = arith.maximumf %24, %25 : vector<64x64xf32>
    %27 = tpu.concatenate %22, %26 in 1 : vector<64x64xf32>, vector<64x64xf32> -> vector<64x128xf32>
    %28 = vector.shape_cast %27 : vector<64x128xf32> to vector<1x8x8x128xf32>
    %c0_33 = arith.constant 0 : index
    %c4_34 = arith.constant 4 : index
    %c4_35 = arith.constant 4 : index
    %c0_36 = arith.constant 0 : index
    %29 = vector.load %arg7[%c0_33, %c4_34, %c4_35, %c0_36] : memref<1x16x16x128xf32, #tpu.memory_space<vmem>>, vector<1x8x8x128xf32>
    tpu.vector_store %arg7[%c0_33, %c4_34, %c4_35, %c0_36], %28 {strides = array<i32>} : memref<1x16x16x128xf32, #tpu.memory_space<vmem>>, vector<1x8x8x128xf32>,
    %cst_37 = arith.constant 0.000000e+00 : f32
    %30 = vector.broadcast %cst_37 : f32 to vector<64x80xf32>
    %c0_i32_38 = arith.constant 0 : i32
    %c5_i32_39 = arith.constant 5 : i32
    %31 = arith.addi %c0_i32_38, %c5_i32_39 : i32
    %c1_i32_40 = arith.constant 1 : i32
    %32 = scf.for %arg8 = %c0_i32_38 to %31 step %c1_i32_40 iter_args(%arg9 = %30) -> (vector<64x80xf32>)  : i32 {
      %c2_i32 = arith.constant 2 : i32
      %86 = arith.muli %arg8, %c2_i32 : i32
      %c0_i32_75 = arith.constant 0 : i32
      %87 = arith.addi %c0_i32_75, %86 : i32
      %c0_76 = arith.constant 0 : index
      %88 = arith.index_cast %87 : i32 to index
      %c0_77 = arith.constant 0 : index
      %c0_78 = arith.constant 0 : index
      %89 = vector.load %arg7[%c0_76, %88, %c0_77, %c0_78] : memref<1x16x16x128xf32, #tpu.memory_space<vmem>>, vector<1x8x8x128xf32>
      %c5_i32_79 = arith.constant 5 : i32
      %90 = arith.muli %arg8, %c5_i32_79 : i32
      %c25_i32 = arith.constant 25 : i32
      %91 = arith.addi %c25_i32, %90 : i32
      %c0_i32_80 = arith.constant 0 : i32
      %92 = arith.addi %91, %c0_i32_80 : i32
      %93 = arith.index_cast %92 : i32 to index
      %c0_81 = arith.constant 0 : index
      %c0_82 = arith.constant 0 : index
      %94 = vector.load %arg2[%93, %c0_81, %c0_82] : memref<75x128x80xf32, #tpu.memory_space<vmem>>, vector<1x128x80xf32>
      %95 = vector.shape_cast %94 : vector<1x128x80xf32> to vector<128x80xf32>
      %96 = vector.shape_cast %89 : vector<1x8x8x128xf32> to vector<64x128xf32>
      %cst_83 = arith.constant dense<0.000000e+00> : vector<64x80xf32>
      %97 = tpu.matmul %96, %95, %cst_83 {dimension_numbers = #tpu.dot_dimension_numbers<[1], [0], [0], [1], [0, 0, 1, 1], [], []>} : vector<64x128xf32>, vector<128x80xf32>, vector<64x80xf32> -> vector<64x80xf32>
      %98 = arith.addf %arg9, %97 : vector<64x80xf32>
      %c0_84 = arith.constant 0 : index
      %99 = arith.index_cast %87 : i32 to index
      %c2_85 = arith.constant 2 : index
      %c0_86 = arith.constant 0 : index
      %100 = vector.load %arg7[%c0_84, %99, %c2_85, %c0_86] : memref<1x16x16x128xf32, #tpu.memory_space<vmem>>, vector<1x8x8x128xf32>
      %c5_i32_87 = arith.constant 5 : i32
      %101 = arith.muli %arg8, %c5_i32_87 : i32
      %c25_i32_88 = arith.constant 25 : i32
      %102 = arith.addi %c25_i32_88, %101 : i32
      %c1_i32_89 = arith.constant 1 : i32
      %103 = arith.addi %102, %c1_i32_89 : i32
      %104 = arith.index_cast %103 : i32 to index
      %c0_90 = arith.constant 0 : index
      %c0_91 = arith.constant 0 : index
      %105 = vector.load %arg2[%104, %c0_90, %c0_91] : memref<75x128x80xf32, #tpu.memory_space<vmem>>, vector<1x128x80xf32>
      %106 = vector.shape_cast %105 : vector<1x128x80xf32> to vector<128x80xf32>
      %107 = vector.shape_cast %100 : vector<1x8x8x128xf32> to vector<64x128xf32>
      %cst_92 = arith.constant dense<0.000000e+00> : vector<64x80xf32>
      %108 = tpu.matmul %107, %106, %cst_92 {dimension_numbers = #tpu.dot_dimension_numbers<[1], [0], [0], [1], [0, 0, 1, 1], [], []>} : vector<64x128xf32>, vector<128x80xf32>, vector<64x80xf32> -> vector<64x80xf32>
      %109 = arith.addf %98, %108 : vector<64x80xf32>
      %c0_93 = arith.constant 0 : index
      %110 = arith.index_cast %87 : i32 to index
      %c4_94 = arith.constant 4 : index
      %c0_95 = arith.constant 0 : index
      %111 = vector.load %arg7[%c0_93, %110, %c4_94, %c0_95] : memref<1x16x16x128xf32, #tpu.memory_space<vmem>>, vector<1x8x8x128xf32>
      %c5_i32_96 = arith.constant 5 : i32
      %112 = arith.muli %arg8, %c5_i32_96 : i32
      %c25_i32_97 = arith.constant 25 : i32
      %113 = arith.addi %c25_i32_97, %112 : i32
      %c2_i32_98 = arith.constant 2 : i32
      %114 = arith.addi %113, %c2_i32_98 : i32
      %115 = arith.index_cast %114 : i32 to index
      %c0_99 = arith.constant 0 : index
      %c0_100 = arith.constant 0 : index
      %116 = vector.load %arg2[%115, %c0_99, %c0_100] : memref<75x128x80xf32, #tpu.memory_space<vmem>>, vector<1x128x80xf32>
      %117 = vector.shape_cast %116 : vector<1x128x80xf32> to vector<128x80xf32>
      %118 = vector.shape_cast %111 : vector<1x8x8x128xf32> to vector<64x128xf32>
      %cst_101 = arith.constant dense<0.000000e+00> : vector<64x80xf32>
      %119 = tpu.matmul %118, %117, %cst_101 {dimension_numbers = #tpu.dot_dimension_numbers<[1], [0], [0], [1], [0, 0, 1, 1], [], []>} : vector<64x128xf32>, vector<128x80xf32>, vector<64x80xf32> -> vector<64x80xf32>
      %120 = arith.addf %109, %119 : vector<64x80xf32>
      %c0_102 = arith.constant 0 : index
      %121 = arith.index_cast %87 : i32 to index
      %c6 = arith.constant 6 : index
      %c0_103 = arith.constant 0 : index
      %122 = vector.load %arg7[%c0_102, %121, %c6, %c0_103] : memref<1x16x16x128xf32, #tpu.memory_space<vmem>>, vector<1x8x8x128xf32>
      %c5_i32_104 = arith.constant 5 : i32
      %123 = arith.muli %arg8, %c5_i32_104 : i32
      %c25_i32_105 = arith.constant 25 : i32
      %124 = arith.addi %c25_i32_105, %123 : i32
      %c3_i32 = arith.constant 3 : i32
      %125 = arith.addi %124, %c3_i32 : i32
      %126 = arith.index_cast %125 : i32 to index
      %c0_106 = arith.constant 0 : index
      %c0_107 = arith.constant 0 : index
      %127 = vector.load %arg2[%126, %c0_106, %c0_107] : memref<75x128x80xf32, #tpu.memory_space<vmem>>, vector<1x128x80xf32>
      %128 = vector.shape_cast %127 : vector<1x128x80xf32> to vector<128x80xf32>
      %129 = vector.shape_cast %122 : vector<1x8x8x128xf32> to vector<64x128xf32>
      %cst_108 = arith.constant dense<0.000000e+00> : vector<64x80xf32>
      %130 = tpu.matmul %129, %128, %cst_108 {dimension_numbers = #tpu.dot_dimension_numbers<[1], [0], [0], [1], [0, 0, 1, 1], [], []>} : vector<64x128xf32>, vector<128x80xf32>, vector<64x80xf32> -> vector<64x80xf32>
      %131 = arith.addf %120, %130 : vector<64x80xf32>
      %c0_109 = arith.constant 0 : index
      %132 = arith.index_cast %87 : i32 to index
      %c8 = arith.constant 8 : index
      %c0_110 = arith.constant 0 : index
      %133 = vector.load %arg7[%c0_109, %132, %c8, %c0_110] : memref<1x16x16x128xf32, #tpu.memory_space<vmem>>, vector<1x8x8x128xf32>
      %c5_i32_111 = arith.constant 5 : i32
      %134 = arith.muli %arg8, %c5_i32_111 : i32
      %c25_i32_112 = arith.constant 25 : i32
      %135 = arith.addi %c25_i32_112, %134 : i32
      %c4_i32 = arith.constant 4 : i32
      %136 = arith.addi %135, %c4_i32 : i32
      %137 = arith.index_cast %136 : i32 to index
      %c0_113 = arith.constant 0 : index
      %c0_114 = arith.constant 0 : index
      %138 = vector.load %arg2[%137, %c0_113, %c0_114] : memref<75x128x80xf32, #tpu.memory_space<vmem>>, vector<1x128x80xf32>
      %139 = vector.shape_cast %138 : vector<1x128x80xf32> to vector<128x80xf32>
      %140 = vector.shape_cast %133 : vector<1x8x8x128xf32> to vector<64x128xf32>
      %cst_115 = arith.constant dense<0.000000e+00> : vector<64x80xf32>
      %141 = tpu.matmul %140, %139, %cst_115 {dimension_numbers = #tpu.dot_dimension_numbers<[1], [0], [0], [1], [0, 0, 1, 1], [], []>} : vector<64x128xf32>, vector<128x80xf32>, vector<64x80xf32> -> vector<64x80xf32>
      %142 = arith.addf %131, %141 : vector<64x80xf32>
      scf.yield %142 : vector<64x80xf32>
    }
    %c5_i32_41 = arith.constant 5 : i32
    %c1 = arith.constant 1 : index
    %c0_42 = arith.constant 0 : index
    %c0_43 = arith.constant 0 : index
    %33 = vector.load %arg3[%c1, %c0_42, %c0_43] : memref<3x1x80xf32, #tpu.memory_space<vmem>>, vector<1x1x80xf32>
    %34 = vector.shape_cast %33 : vector<1x1x80xf32> to vector<1x80xf32>
    %35 = vector.broadcast %34 : vector<1x80xf32> to vector<64x80xf32>
    %36 = arith.addf %32, %35 : vector<64x80xf32>
    %37 = vector.extract_strided_slice %36 {offsets = [0, 0], sizes = [64, 64], strides = [1, 1]} : vector<64x80xf32> to vector<64x64xf32>
    %38 = vector.extract_strided_slice %36 {offsets = [0, 64], sizes = [64, 16], strides = [1, 1]} : vector<64x80xf32> to vector<64x16xf32>
    %cst_44 = arith.constant 5.000000e-01 : f32
    %39 = vector.broadcast %cst_44 : f32 to vector<64x16xf32>
    %40 = arith.mulf %39, %20 : vector<64x16xf32>
    %cst_45 = arith.constant 5.000000e-01 : f32
    %41 = vector.broadcast %cst_45 : f32 to vector<64x16xf32>
    %42 = arith.mulf %41, %38 : vector<64x16xf32>
    %43 = arith.addf %40, %42 : vector<64x16xf32>
    %cst_46 = arith.constant 0.000000e+00 : f32
    %44 = vector.broadcast %cst_46 : f32 to vector<64x64xf32>
    %45 = arith.maximumf %37, %44 : vector<64x64xf32>
    %cst_47 = arith.constant 0.000000e+00 : f32
    %46 = vector.broadcast %cst_47 : f32 to vector<64x64xf32>
    %47 = arith.subf %46, %37 : vector<64x64xf32>
    %cst_48 = arith.constant 0.000000e+00 : f32
    %48 = vector.broadcast %cst_48 : f32 to vector<64x64xf32>
    %49 = arith.maximumf %47, %48 : vector<64x64xf32>
    %50 = tpu.concatenate %45, %49 in 1 : vector<64x64xf32>, vector<64x64xf32> -> vector<64x128xf32>
    %51 = vector.shape_cast %50 : vector<64x128xf32> to vector<1x8x8x128xf32>
    %c0_49 = arith.constant 0 : index
    %c4_50 = arith.constant 4 : index
    %c4_51 = arith.constant 4 : index
    %c0_52 = arith.constant 0 : index
    %52 = vector.load %arg7[%c0_49, %c4_50, %c4_51, %c0_52] : memref<1x16x16x128xf32, #tpu.memory_space<vmem>>, vector<1x8x8x128xf32>
    tpu.vector_store %arg7[%c0_49, %c4_50, %c4_51, %c0_52], %51 {strides = array<i32>} : memref<1x16x16x128xf32, #tpu.memory_space<vmem>>, vector<1x8x8x128xf32>,
    %cst_53 = arith.constant 0.000000e+00 : f32
    %53 = vector.broadcast %cst_53 : f32 to vector<64x80xf32>
    %c0_i32_54 = arith.constant 0 : i32
    %c5_i32_55 = arith.constant 5 : i32
    %54 = arith.addi %c0_i32_54, %c5_i32_55 : i32
    %c1_i32_56 = arith.constant 1 : i32
    %55 = scf.for %arg8 = %c0_i32_54 to %54 step %c1_i32_56 iter_args(%arg9 = %53) -> (vector<64x80xf32>)  : i32 {
      %c2_i32 = arith.constant 2 : i32
      %86 = arith.muli %arg8, %c2_i32 : i32
      %c0_i32_75 = arith.constant 0 : i32
      %87 = arith.addi %c0_i32_75, %86 : i32
      %c0_76 = arith.constant 0 : index
      %88 = arith.index_cast %87 : i32 to index
      %c0_77 = arith.constant 0 : index
      %c0_78 = arith.constant 0 : index
      %89 = vector.load %arg7[%c0_76, %88, %c0_77, %c0_78] : memref<1x16x16x128xf32, #tpu.memory_space<vmem>>, vector<1x8x8x128xf32>
      %c5_i32_79 = arith.constant 5 : i32
      %90 = arith.muli %arg8, %c5_i32_79 : i32
      %c50_i32 = arith.constant 50 : i32
      %91 = arith.addi %c50_i32, %90 : i32
      %c0_i32_80 = arith.constant 0 : i32
      %92 = arith.addi %91, %c0_i32_80 : i32
      %93 = arith.index_cast %92 : i32 to index
      %c0_81 = arith.constant 0 : index
      %c0_82 = arith.constant 0 : index
      %94 = vector.load %arg2[%93, %c0_81, %c0_82] : memref<75x128x80xf32, #tpu.memory_space<vmem>>, vector<1x128x80xf32>
      %95 = vector.shape_cast %94 : vector<1x128x80xf32> to vector<128x80xf32>
      %96 = vector.shape_cast %89 : vector<1x8x8x128xf32> to vector<64x128xf32>
      %cst_83 = arith.constant dense<0.000000e+00> : vector<64x80xf32>
      %97 = tpu.matmul %96, %95, %cst_83 {dimension_numbers = #tpu.dot_dimension_numbers<[1], [0], [0], [1], [0, 0, 1, 1], [], []>} : vector<64x128xf32>, vector<128x80xf32>, vector<64x80xf32> -> vector<64x80xf32>
      %98 = arith.addf %arg9, %97 : vector<64x80xf32>
      %c0_84 = arith.constant 0 : index
      %99 = arith.index_cast %87 : i32 to index
      %c2_85 = arith.constant 2 : index
      %c0_86 = arith.constant 0 : index
      %100 = vector.load %arg7[%c0_84, %99, %c2_85, %c0_86] : memref<1x16x16x128xf32, #tpu.memory_space<vmem>>, vector<1x8x8x128xf32>
      %c5_i32_87 = arith.constant 5 : i32
      %101 = arith.muli %arg8, %c5_i32_87 : i32
      %c50_i32_88 = arith.constant 50 : i32
      %102 = arith.addi %c50_i32_88, %101 : i32
      %c1_i32_89 = arith.constant 1 : i32
      %103 = arith.addi %102, %c1_i32_89 : i32
      %104 = arith.index_cast %103 : i32 to index
      %c0_90 = arith.constant 0 : index
      %c0_91 = arith.constant 0 : index
      %105 = vector.load %arg2[%104, %c0_90, %c0_91] : memref<75x128x80xf32, #tpu.memory_space<vmem>>, vector<1x128x80xf32>
      %106 = vector.shape_cast %105 : vector<1x128x80xf32> to vector<128x80xf32>
      %107 = vector.shape_cast %100 : vector<1x8x8x128xf32> to vector<64x128xf32>
      %cst_92 = arith.constant dense<0.000000e+00> : vector<64x80xf32>
      %108 = tpu.matmul %107, %106, %cst_92 {dimension_numbers = #tpu.dot_dimension_numbers<[1], [0], [0], [1], [0, 0, 1, 1], [], []>} : vector<64x128xf32>, vector<128x80xf32>, vector<64x80xf32> -> vector<64x80xf32>
      %109 = arith.addf %98, %108 : vector<64x80xf32>
      %c0_93 = arith.constant 0 : index
      %110 = arith.index_cast %87 : i32 to index
      %c4_94 = arith.constant 4 : index
      %c0_95 = arith.constant 0 : index
      %111 = vector.load %arg7[%c0_93, %110, %c4_94, %c0_95] : memref<1x16x16x128xf32, #tpu.memory_space<vmem>>, vector<1x8x8x128xf32>
      %c5_i32_96 = arith.constant 5 : i32
      %112 = arith.muli %arg8, %c5_i32_96 : i32
      %c50_i32_97 = arith.constant 50 : i32
      %113 = arith.addi %c50_i32_97, %112 : i32
      %c2_i32_98 = arith.constant 2 : i32
      %114 = arith.addi %113, %c2_i32_98 : i32
      %115 = arith.index_cast %114 : i32 to index
      %c0_99 = arith.constant 0 : index
      %c0_100 = arith.constant 0 : index
      %116 = vector.load %arg2[%115, %c0_99, %c0_100] : memref<75x128x80xf32, #tpu.memory_space<vmem>>, vector<1x128x80xf32>
      %117 = vector.shape_cast %116 : vector<1x128x80xf32> to vector<128x80xf32>
      %118 = vector.shape_cast %111 : vector<1x8x8x128xf32> to vector<64x128xf32>
      %cst_101 = arith.constant dense<0.000000e+00> : vector<64x80xf32>
      %119 = tpu.matmul %118, %117, %cst_101 {dimension_numbers = #tpu.dot_dimension_numbers<[1], [0], [0], [1], [0, 0, 1, 1], [], []>} : vector<64x128xf32>, vector<128x80xf32>, vector<64x80xf32> -> vector<64x80xf32>
      %120 = arith.addf %109, %119 : vector<64x80xf32>
      %c0_102 = arith.constant 0 : index
      %121 = arith.index_cast %87 : i32 to index
      %c6 = arith.constant 6 : index
      %c0_103 = arith.constant 0 : index
      %122 = vector.load %arg7[%c0_102, %121, %c6, %c0_103] : memref<1x16x16x128xf32, #tpu.memory_space<vmem>>, vector<1x8x8x128xf32>
      %c5_i32_104 = arith.constant 5 : i32
      %123 = arith.muli %arg8, %c5_i32_104 : i32
      %c50_i32_105 = arith.constant 50 : i32
      %124 = arith.addi %c50_i32_105, %123 : i32
      %c3_i32 = arith.constant 3 : i32
      %125 = arith.addi %124, %c3_i32 : i32
      %126 = arith.index_cast %125 : i32 to index
      %c0_106 = arith.constant 0 : index
      %c0_107 = arith.constant 0 : index
      %127 = vector.load %arg2[%126, %c0_106, %c0_107] : memref<75x128x80xf32, #tpu.memory_space<vmem>>, vector<1x128x80xf32>
      %128 = vector.shape_cast %127 : vector<1x128x80xf32> to vector<128x80xf32>
      %129 = vector.shape_cast %122 : vector<1x8x8x128xf32> to vector<64x128xf32>
      %cst_108 = arith.constant dense<0.000000e+00> : vector<64x80xf32>
      %130 = tpu.matmul %129, %128, %cst_108 {dimension_numbers = #tpu.dot_dimension_numbers<[1], [0], [0], [1], [0, 0, 1, 1], [], []>} : vector<64x128xf32>, vector<128x80xf32>, vector<64x80xf32> -> vector<64x80xf32>
      %131 = arith.addf %120, %130 : vector<64x80xf32>
      %c0_109 = arith.constant 0 : index
      %132 = arith.index_cast %87 : i32 to index
      %c8 = arith.constant 8 : index
      %c0_110 = arith.constant 0 : index
      %133 = vector.load %arg7[%c0_109, %132, %c8, %c0_110] : memref<1x16x16x128xf32, #tpu.memory_space<vmem>>, vector<1x8x8x128xf32>
      %c5_i32_111 = arith.constant 5 : i32
      %134 = arith.muli %arg8, %c5_i32_111 : i32
      %c50_i32_112 = arith.constant 50 : i32
      %135 = arith.addi %c50_i32_112, %134 : i32
      %c4_i32 = arith.constant 4 : i32
      %136 = arith.addi %135, %c4_i32 : i32
      %137 = arith.index_cast %136 : i32 to index
      %c0_113 = arith.constant 0 : index
      %c0_114 = arith.constant 0 : index
      %138 = vector.load %arg2[%137, %c0_113, %c0_114] : memref<75x128x80xf32, #tpu.memory_space<vmem>>, vector<1x128x80xf32>
      %139 = vector.shape_cast %138 : vector<1x128x80xf32> to vector<128x80xf32>
      %140 = vector.shape_cast %133 : vector<1x8x8x128xf32> to vector<64x128xf32>
      %cst_115 = arith.constant dense<0.000000e+00> : vector<64x80xf32>
      %141 = tpu.matmul %140, %139, %cst_115 {dimension_numbers = #tpu.dot_dimension_numbers<[1], [0], [0], [1], [0, 0, 1, 1], [], []>} : vector<64x128xf32>, vector<128x80xf32>, vector<64x80xf32> -> vector<64x80xf32>
      %142 = arith.addf %131, %141 : vector<64x80xf32>
      scf.yield %142 : vector<64x80xf32>
    }
    %c5_i32_57 = arith.constant 5 : i32
    %c2 = arith.constant 2 : index
    %c0_58 = arith.constant 0 : index
    %c0_59 = arith.constant 0 : index
    %56 = vector.load %arg3[%c2, %c0_58, %c0_59] : memref<3x1x80xf32, #tpu.memory_space<vmem>>, vector<1x1x80xf32>
    %57 = vector.shape_cast %56 : vector<1x1x80xf32> to vector<1x80xf32>
    %58 = vector.broadcast %57 : vector<1x80xf32> to vector<64x80xf32>
    %59 = arith.addf %55, %58 : vector<64x80xf32>
    %60 = vector.extract_strided_slice %59 {offsets = [0, 0], sizes = [64, 64], strides = [1, 1]} : vector<64x80xf32> to vector<64x64xf32>
    %61 = vector.extract_strided_slice %59 {offsets = [0, 64], sizes = [64, 16], strides = [1, 1]} : vector<64x80xf32> to vector<64x16xf32>
    %cst_60 = arith.constant 5.000000e-01 : f32
    %62 = vector.broadcast %cst_60 : f32 to vector<64x16xf32>
    %63 = arith.mulf %62, %43 : vector<64x16xf32>
    %cst_61 = arith.constant 5.000000e-01 : f32
    %64 = vector.broadcast %cst_61 : f32 to vector<64x16xf32>
    %65 = arith.mulf %64, %61 : vector<64x16xf32>
    %66 = arith.addf %63, %65 : vector<64x16xf32>
    %cst_62 = arith.constant 0.000000e+00 : f32
    %67 = vector.broadcast %cst_62 : f32 to vector<64x64xf32>
    %68 = arith.maximumf %60, %67 : vector<64x64xf32>
    %cst_63 = arith.constant 0.000000e+00 : f32
    %69 = vector.broadcast %cst_63 : f32 to vector<64x64xf32>
    %70 = arith.subf %69, %60 : vector<64x64xf32>
    %cst_64 = arith.constant 0.000000e+00 : f32
    %71 = vector.broadcast %cst_64 : f32 to vector<64x64xf32>
    %72 = arith.maximumf %70, %71 : vector<64x64xf32>
    %73 = tpu.concatenate %68, %72 in 1 : vector<64x64xf32>, vector<64x64xf32> -> vector<64x128xf32>
    %c0_65 = arith.constant 0 : index
    %c0_66 = arith.constant 0 : index
    %74 = vector.load %arg4[%c0_65, %c0_66] : memref<128x16xf32, #tpu.memory_space<vmem>>, vector<128x16xf32>
    %cst_67 = arith.constant dense<0.000000e+00> : vector<64x16xf32>
    %75 = tpu.matmul %73, %74, %cst_67 {dimension_numbers = #tpu.dot_dimension_numbers<[1], [0], [0], [1], [0, 0, 1, 1], [], []>} : vector<64x128xf32>, vector<128x16xf32>, vector<64x16xf32> -> vector<64x16xf32>
    %c0_68 = arith.constant 0 : index
    %c0_69 = arith.constant 0 : index
    %76 = vector.load %arg5[%c0_68, %c0_69] : memref<1x16xf32, #tpu.memory_space<vmem>>, vector<1x16xf32>
    %77 = vector.broadcast %76 : vector<1x16xf32> to vector<64x16xf32>
    %78 = arith.addf %75, %77 : vector<64x16xf32>
    %cst_70 = arith.constant 5.000000e-01 : f32
    %79 = vector.broadcast %cst_70 : f32 to vector<64x16xf32>
    %80 = arith.mulf %79, %66 : vector<64x16xf32>
    %cst_71 = arith.constant 5.000000e-01 : f32
    %81 = vector.broadcast %cst_71 : f32 to vector<64x16xf32>
    %82 = arith.mulf %81, %78 : vector<64x16xf32>
    %83 = arith.addf %80, %82 : vector<64x16xf32>
    %84 = vector.shape_cast %83 : vector<64x16xf32> to vector<1x64x16xf32>
    %c0_72 = arith.constant 0 : index
    %c0_73 = arith.constant 0 : index
    %c0_74 = arith.constant 0 : index
    %85 = vector.load %arg6[%c0_72, %c0_73, %c0_74] : memref<1x64x16xf32, #tpu.memory_space<vmem>>, vector<1x64x16xf32>
    tpu.vector_store %arg6[%c0_72, %c0_73, %c0_74], %84 {strides = array<i32>} : memref<1x64x16xf32, #tpu.memory_space<vmem>>, vector<1x64x16xf32>,
    return
  }
  func.func @transform_0(%arg0: i32) -> (i32, i32, i32, i32) {
    %c0_i32 = arith.constant 0 : i32
    %c0_i32_0 = arith.constant 0 : i32
    %c0_i32_1 = arith.constant 0 : i32
    %c0_i32_2 = arith.constant 0 : i32
    return %arg0, %c0_i32, %c0_i32_0, %c0_i32_1 : i32, i32, i32, i32
  }
  func.func @transform_1(%arg0: i32) -> (i32, i32, i32) {
    %c0_i32 = arith.constant 0 : i32
    %c0_i32_0 = arith.constant 0 : i32
    %c0_i32_1 = arith.constant 0 : i32
    %c0_i32_2 = arith.constant 0 : i32
    return %c0_i32, %c0_i32_0, %c0_i32_1 : i32, i32, i32
  }
  func.func @transform_2(%arg0: i32) -> (i32, i32, i32) {
    %c0_i32 = arith.constant 0 : i32
    %c0_i32_0 = arith.constant 0 : i32
    %c0_i32_1 = arith.constant 0 : i32
    %c0_i32_2 = arith.constant 0 : i32
    return %c0_i32, %c0_i32_0, %c0_i32_1 : i32, i32, i32
  }
  func.func @transform_3(%arg0: i32) -> (i32, i32) {
    %c0_i32 = arith.constant 0 : i32
    %c0_i32_0 = arith.constant 0 : i32
    %c0_i32_1 = arith.constant 0 : i32
    return %c0_i32, %c0_i32_0 : i32, i32
  }
  func.func @transform_4(%arg0: i32) -> (i32, i32) {
    %c0_i32 = arith.constant 0 : i32
    %c0_i32_0 = arith.constant 0 : i32
    %c0_i32_1 = arith.constant 0 : i32
    return %c0_i32, %c0_i32_0 : i32, i32
  }
  func.func @transform_5(%arg0: i32) -> (i32, i32, i32) {
    %c0_i32 = arith.constant 0 : i32
    %c0_i32_0 = arith.constant 0 : i32
    %c0_i32_1 = arith.constant 0 : i32
    return %arg0, %c0_i32, %c0_i32_0 : i32, i32, i32
  }
}

</mosaic_0001>

<bundles_post_ra>
// kernel: tpu_custom_call.1
= control target key start
LH: loop header
LB: loop body
LE: loop exit
PB: predicated region body
PF: predicated region fallthrough
CT: control target
= control target key end

     0   :  { %s3087_s18 = smov 0   ;;  %s4051_s0 = inlined_call_operand.vmem [shape: f32[2,8,8,128], index: 0, kind: input, shape index: {}]   ;;  %s4052_s1 = inlined_call_operand.vmem [shape: f32[75,128,80], index: 1, kind: input, shape index: {}]   ;;  %s4053_s2 = inlined_call_operand.vmem [shape: f32[3,1,80], index: 2, kind: input, shape index: {}]   ;;  %s4054_s3 = inlined_call_operand.vmem [shape: f32[128,16], index: 3, kind: input, shape index: {}]   ;;  %s4055_s4 = inlined_call_operand.vmem [shape: f32[1,16], index: 4, kind: input, shape index: {}]   ;;  %s4056_s5 = inlined_call_operand.vmem [shape: f32[2,64,16], index: 5, kind: output, shape index: {}]  }
   0x1 LB: > { %s2136_s19 = sadd.s32 4294967295, %s2945_s18   ;;  %p2140_p0 = scmp.ge.s32.totalorder %s2945_s18, 1  ;;  %s2945_s18 = sphi %s3087_s18, %s15_s18  }
   0x2   : > { %p187_p1 = scmp.lt.s32.totalorder %s2945_s18, 3 }
   0x4   : > { %p188_p2 = pnand %p2140_p0, %p187_p1 }
   0x5   : > { %p215_p3 = scmp.lt.s32.totalorder (!%p188_p2), %s2136_s19, 1  ;;  %s3122_s27 = smov (!%p188_p2), 0  }
   0x6   : > { %191 = sbr.rel (%p188_p2) target bundleno = 1584 (0x630), region = 40 }
   0xb   : > { %v3055_v0 = vmov 0.0   ;;  %s4090_s19 = smov (!%p215_p3, %s2136_s19), 1  ;;  %v3106_v9 = vmov 0.0   ;;  %v3108_v10 = vmov 0.0   ;;  %v3110_v11 = vmov 0.0  }
   0xc   : > { %225 = vst [vmem:[#allocation2] sm:$0xff] %v3055_v0  ;;  %s2433_s20 = sshll.u32 %s4090_s19, 6  ;;  %v3112_v12 = vmov 0.0   ;;  %v3114_v13 = vmov 0.0   ;;  %v3116_v14 = vmov 0.0   ;;  %v3118_v15 = vmov 0.0  }
   0xd   : > { %226 = vst [vmem:[#allocation2 + $0x8] sm:$0xff] %v3055_v0  ;;  %s3101_s23 = scalar_lea.vmem %s4056_s5, %s2433_s20  ;;  %s219_s26 = scalar_lea.vmem %s4051_s0, %s2433_s20  ;;  %v3120_v16 = vmov 0.0  }
   0xe   : > { %227 = vst [vmem:[#allocation2 + $0x10] sm:$0xff] %v3055_v0  ;;  %v259_v1 = vld [vmem:[%s219_s26] sm:$0xff]  ;;  %v260_v2 = vld [vmem:[%s219_s26 + $0x8] sm:$0xff]  ;;  %v261_v3 = vld [vmem:[%s219_s26 + $0x10] sm:$0xff] }
   0xf   : > { %228 = vst [vmem:[#allocation2 + $0x18] sm:$0xff] %v3055_v0  ;;  %v262_v4 = vld [vmem:[%s219_s26 + $0x18] sm:$0xff]  ;;  %v263_v5 = vld [vmem:[%s219_s26 + $0x20] sm:$0xff]  ;;  %v264_v6 = vld [vmem:[%s219_s26 + $0x28] sm:$0xff] }
  0x10   : > { %229 = vst [vmem:[#allocation2 + $0x20] sm:$0xff] %v3055_v0  ;;  %v265_v7 = vld [vmem:[%s219_s26 + $0x30] sm:$0xff]  ;;  %v266_v8 = vld [vmem:[%s219_s26 + $0x38] sm:$0xff] }
  0x11   : > { %230 = vst [vmem:[#allocation2 + $0x28] sm:$0xff] %v3055_v0 }
  0x12   : > { %231 = vst [vmem:[#allocation2 + $0x30] sm:$0xff] %v3055_v0 }
  0x13   : > { %232 = vst [vmem:[#allocation2 + $0x38] sm:$0xff] %v3055_v0 }
  0x14   : > { %234 = vst [vmem:[#allocation2 + $0xc0] sm:$0xff] %v3055_v0 }
  0x15   : > { %235 = vst [vmem:[#allocation2 + $0xc8] sm:$0xff] %v3055_v0 }
  0x16   : > { %236 = vst [vmem:[#allocation2 + $0xd0] sm:$0xff] %v3055_v0 }
  0x17   : > { %237 = vst [vmem:[#allocation2 + $0xd8] sm:$0xff] %v3055_v0 }
  0x18   : > { %238 = vst [vmem:[#allocation2 + $0xe0] sm:$0xff] %v3055_v0 }
  0x19   : > { %239 = vst [vmem:[#allocation2 + $0xe8] sm:$0xff] %v3055_v0 }
  0x1a   : > { %240 = vst [vmem:[#allocation2 + $0xf0] sm:$0xff] %v3055_v0 }
  0x1b   : > { %241 = vst [vmem:[#allocation2 + $0xf8] sm:$0xff] %v3055_v0 }
  0x1c   : > { %243 = vst [vmem:[#allocation2 + $0x40] sm:$0xf] %v3055_v0 }
  0x1d   : > { %244 = vst [vmem:[#allocation2 + $0x50] sm:$0xf] %v3055_v0 }
  0x1e   : > { %245 = vst [vmem:[#allocation2 + $0x60] sm:$0xf] %v3055_v0 }
  0x1f   : > { %246 = vst [vmem:[#allocation2 + $0x70] sm:$0xf] %v3055_v0 }
  0x20   : > { %247 = vst [vmem:[#allocation2 + $0x80] sm:$0xf] %v3055_v0 }
  0x21   : > { %248 = vst [vmem:[#allocation2 + $0x90] sm:$0xf] %v3055_v0 }
  0x22   : > { %249 = vst [vmem:[#allocation2 + $0xa0] sm:$0xf] %v3055_v0 }
  0x23   : > { %250 = vst [vmem:[#allocation2 + $0xb0] sm:$0xf] %v3055_v0 }
  0x24   : > { %251 = vst [vmem:[#allocation2 + $0x4c] sm:$0xf] %v3055_v0 }
  0x25   : > { %252 = vst [vmem:[#allocation2 + $0x5c] sm:$0xf] %v3055_v0 }
  0x26   : > { %253 = vst [vmem:[#allocation2 + $0x6c] sm:$0xf] %v3055_v0 }
  0x27   : > { %254 = vst [vmem:[#allocation2 + $0x7c] sm:$0xf] %v3055_v0 }
  0x28   : > { %255 = vst [vmem:[#allocation2 + $0x8c] sm:$0xf] %v3055_v0 }
  0x29   : > { %256 = vst [vmem:[#allocation2 + $0x9c] sm:$0xf] %v3055_v0 }
  0x2a   : > { %257 = vst [vmem:[#allocation2 + $0xac] sm:$0xf] %v3055_v0 }
  0x2b   : > { %258 = vst [vmem:[#allocation2 + $0xbc] sm:$0xf] %v3055_v0 }
  0x2c   : > { %267 = vst [vmem:[#allocation2 + $0x44] sm:$0xff] %v259_v1 }
  0x2d   : > { %268 = vst [vmem:[#allocation2 + $0x54] sm:$0xff] %v260_v2 }
  0x2e   : > { %269 = vst [vmem:[#allocation2 + $0x64] sm:$0xff] %v261_v3 }
  0x2f   : > { %270 = vst [vmem:[#allocation2 + $0x74] sm:$0xff] %v262_v4 }
  0x30   : > { %271 = vst [vmem:[#allocation2 + $0x84] sm:$0xff] %v263_v5 }
  0x31   : > { %272 = vst [vmem:[#allocation2 + $0x94] sm:$0xff] %v264_v6 }
  0x32   : > { %273 = vst [vmem:[#allocation2 + $0xa4] sm:$0xff] %v265_v7 }
  0x33   : > { %274 = vst [vmem:[#allocation2 + $0xb4] sm:$0xff] %v266_v8 }
  0x34 LB: >> { %s2154_s28 = smul.u32 640, %s2981_s27  ;;  %s2145_s7 = sshll.u32 %s2981_s27, 4  ;;  %s2981_s27 = sphi %s3122_s27, %s280_s27   ;;  %v2977_v16 = vphi %v3120_v16, %v4066_v16   ;;  %v2973_v15 = vphi %v3118_v15, %v4065_v15   ;;  %v2969_v14 = vphi %v3116_v14, %v4064_v14   ;;  %v2965_v13 = vphi %v3114_v13, %v4063_v13   ;;  %v2961_v12 = vphi %v3112_v12, %v4062_v12   ;;  %v2957_v11 = vphi %v3110_v11, %v4061_v11   ;;  %v2953_v10 = vphi %v3108_v10, %v4060_v10   ;;  %v2949_v9 = vphi %v3106_v9, %v4059_v9  }
  0x35   : >> { %s3199_s8 = scalar_lea.vmem [#allocation2], %s2145_s7  ;;  %s280_s27 = sadd.s32 1, %s2981_s27  }
  0x36   : >> { %s3155_s6 = scalar_lea.vmem %s4052_s1, %s2154_s28  ;;  %p277_p4 = scmp.ge.s32.totalorder %s280_s27, 5  }
  0x37   : >> { %v318_v17 = vld [vmem:[%s3155_s6 + $0x78] sm:$0xff]  ;;  %v317_v18 = vld [vmem:[%s3155_s6 + $0x70] sm:$0xff]  ;;  %v316_v19 = vld [vmem:[%s3155_s6 + $0x68] sm:$0xff]  ;;  %s3056_s11 = smov (%p277_p4), 64   ;;  %vm748_vm0 = vcmask (%p277_p4), 523264   ;;  %s3387_s12 = smov (%p277_p4), 0  }
  0x38   : >> { %2437 = vmatpush.msra.mxu1 %v318_v17  ;;  %319 = vmatpush.msra.mxu0 %v318_v17  ;;  %v2204_v20 = vld [vmem:[%s3155_s6 + $0x178] sm:$0xff]  ;;  %v2203_v21 = vld [vmem:[%s3155_s6 + $0x170] sm:$0xff]  ;;  %v315_v22 = vld [vmem:[%s3155_s6 + $0x60] sm:$0xff] }
  0x39   : >> { %471 = vmatpush.msra.mxu2 %v2204_v20  ;;  %v2202_v23 = vld [vmem:[%s3155_s6 + $0x168] sm:$0xff]  ;;  %v314_v24 = vld [vmem:[%s3155_s6 + $0x58] sm:$0xff]  ;;  %v2201_v25 = vld [vmem:[%s3155_s6 + $0x160] sm:$0xff] }
  0x3a   : >> { %2438 = vmatpush.msra.mxu1 %v317_v18  ;;  %320 = vmatpush.msra.mxu0 %v317_v18  ;;  %v313_v26 = vld [vmem:[%s3155_s6 + $0x50] sm:$0xff]  ;;  %v2229_v27 = vld [vmem:[%s3155_s6 + $0x1f8] sm:$0xff]  ;;  %v312_v30 = vld [vmem:[%s3155_s6 + $0x48] sm:$0xff] }
  0x3b   : >> { %472 = vmatpush.msra.mxu2 %v2203_v21  ;;  %v2200_v28 = vld [vmem:[%s3155_s6 + $0x158] sm:$0xff]  ;;  %v2228_v29 = vld [vmem:[%s3155_s6 + $0x1f0] sm:$0xff]  ;;  %547 = vmatpush.msra.mxu3 %v2229_v27  ;;  %v2227_v32 = vld [vmem:[%s3155_s6 + $0x1e8] sm:$0xff] }
  0x3c   : >> { %2439 = vmatpush.msra.mxu1 %v316_v19  ;;  %321 = vmatpush.msra.mxu0 %v316_v19  ;;  %v2199_v31 = vld [vmem:[%s3155_s6 + $0x150] sm:$0xff]  ;;  %v311_v33 = vld [vmem:[%s3155_s6 + $0x40] sm:$0xff]  ;;  %v2198_v34 = vld [vmem:[%s3155_s6 + $0x148] sm:$0xff] }
  0x3d   : >> { %473 = vmatpush.msra.mxu2 %v2202_v23  ;;  %548 = vmatpush.msra.mxu3 %v2228_v29  ;;  %v2226_v35 = vld [vmem:[%s3155_s6 + $0x1e0] sm:$0xff]  ;;  %v310_v36 = vld [vmem:[%s3155_s6 + $0x38] sm:$0xff]  ;;  %v309_v39 = vld [vmem:[%s3155_s6 + $0x30] sm:$0xff] }
  0x3e   : >> { %2440 = vmatpush.msra.mxu1 %v315_v22  ;;  %322 = vmatpush.msra.mxu0 %v315_v22  ;;  %v2197_v37 = vld [vmem:[%s3155_s6 + $0x140] sm:$0xff]  ;;  %v2225_v38 = vld [vmem:[%s3155_s6 + $0x1d8] sm:$0xff]  ;;  %v2224_v41 = vld [vmem:[%s3155_s6 + $0x1d0] sm:$0xff] }
  0x3f   : >> { %474 = vmatpush.msra.mxu2 %v2201_v25  ;;  %549 = vmatpush.msra.mxu3 %v2227_v32  ;;  %v2196_v40 = vld [vmem:[%s3155_s6 + $0x138] sm:$0xff]  ;;  %v308_v42 = vld [vmem:[%s3155_s6 + $0x28] sm:$0xff]  ;;  %v2195_v43 = vld [vmem:[%s3155_s6 + $0x130] sm:$0xff] }
  0x40   : >> { %2441 = vmatpush.msra.mxu1 %v314_v24  ;;  %323 = vmatpush.msra.mxu0 %v314_v24  ;;  %v2223_v44 = vld [vmem:[%s3155_s6 + $0x1c8] sm:$0xff]  ;;  %v307_v45 = vld [vmem:[%s3155_s6 + $0x20] sm:$0xff]  ;;  %v306_v48 = vld [vmem:[%s3155_s6 + $0x18] sm:$0xff] }
  0x41   : >> { %475 = vmatpush.msra.mxu2 %v2200_v28  ;;  %550 = vmatpush.msra.mxu3 %v2226_v35  ;;  %v2194_v46 = vld [vmem:[%s3155_s6 + $0x128] sm:$0xff]  ;;  %v2222_v47 = vld [vmem:[%s3155_s6 + $0x1c0] sm:$0xff]  ;;  %v2221_v50 = vld [vmem:[%s3155_s6 + $0x1b8] sm:$0xff] }
  0x42   : >> { %2442 = vmatpush.msra.mxu1 %v313_v26  ;;  %324 = vmatpush.msra.mxu0 %v313_v26  ;;  %v2193_v49 = vld [vmem:[%s3155_s6 + $0x120] sm:$0xff]  ;;  %v305_v51 = vld [vmem:[%s3155_s6 + $0x10] sm:$0xff]  ;;  %v2192_v52 = vld [vmem:[%s3155_s6 + $0x118] sm:$0xff] }
  0x43   : >> { %476 = vmatpush.msra.mxu2 %v2199_v31  ;;  %551 = vmatpush.msra.mxu3 %v2225_v38  ;;  %v2220_v53 = vld [vmem:[%s3155_s6 + $0x1b0] sm:$0xff]  ;;  %v304_v54 = vld [vmem:[%s3155_s6 + $0x8] sm:$0xff]  ;;  %v303_v57 = vld [vmem:[%s3155_s6] sm:$0xff] }
  0x44   : >> { %2443 = vmatpush.msra.mxu1 %v312_v30  ;;  %325 = vmatpush.msra.mxu0 %v312_v30  ;;  %v2191_v55 = vld [vmem:[%s3155_s6 + $0x110] sm:$0xff]  ;;  %v2219_v56 = vld [vmem:[%s3155_s6 + $0x1a8] sm:$0xff]  ;;  %v2179_v60 = vld [vmem:[%s3155_s6 + $0xf8] sm:$0xff] }
  0x45   : >> { %477 = vmatpush.msra.mxu2 %v2198_v34  ;;  %552 = vmatpush.msra.mxu3 %v2224_v41  ;;  %v2150_v58 = vld [vmem:[%s3199_s8 + $0x62] sm:$0xff]  ;;  %v2254_v61 = vld [vmem:[%s3155_s6 + $0x278] sm:$0xff]  ;;  %v2178_v0 = vld [vmem:[%s3155_s6 + $0xf0] sm:$0xff] }
  0x46   : >> { %2444 = vmatpush.msra.mxu1 %v311_v33  ;;  %326 = vmatpush.msra.mxu0 %v311_v33  ;;  %v2146_v59 = vld [vmem:[%s3199_s8 + $0x22] sm:$0xff]  ;;  %v2253_v1 = vld [vmem:[%s3155_s6 + $0x270] sm:$0xff]  ;;  %v2217_v3 = vld [vmem:[%s3155_s6 + $0x198] sm:$0xff] }
  0x47   : >> { %478 = vmatpush.msra.mxu2 %v2197_v37  ;;  %553 = vmatpush.msra.mxu3 %v2223_v44  ;;  %v2190_v62 = vld [vmem:[%s3155_s6 + $0x108] sm:$0xff]  ;;  %v2218_v63 = vld [vmem:[%s3155_s6 + $0x1a0] sm:$0xff]  ;;  %v2216_v7 = vld [vmem:[%s3155_s6 + $0x190] sm:$0xff] }
  0x48   : >> { %2445 = vmatpush.msra.mxu1 %v310_v36  ;;  %327 = vmatpush.msra.mxu0 %v310_v36  ;;  %v2189_v2 = vld [vmem:[%s3155_s6 + $0x100] sm:$0xff]  ;;  %v2177_v4 = vld [vmem:[%s3155_s6 + $0xe8] sm:$0xff]  ;;  %v2151_v18 = vld [vmem:[%s3199_s8 + $0x72] sm:$0xff] }
  0x49   : >> { %479 = vmatpush.msra.mxu2 %v2196_v40  ;;  %554 = vmatpush.msra.mxu3 %v2222_v47  ;;  %v2252_v5 = vld [vmem:[%s3155_s6 + $0x268] sm:$0xff]  ;;  %v2176_v8 = vld [vmem:[%s3155_s6 + $0xe0] sm:$0xff]  ;;  %v2147_v19 = vld [vmem:[%s3199_s8 + $0x32] sm:$0xff] }
  0x4a   : >> { %2446 = vmatpush.msra.mxu1 %v309_v39  ;;  %328 = vmatpush.msra.mxu0 %v309_v39  ;;  %v2180_v6 = vld [vmem:[%s3199_s8 + $0x24] sm:$0xff]  ;;  %v2175_v20 = vld [vmem:[%s3155_s6 + $0xd8] sm:$0xff]  ;;  %v2174_v23 = vld [vmem:[%s3155_s6 + $0xd0] sm:$0xff] }
  0x4b   : >> { %480 = vmatpush.msra.mxu2 %v2195_v43  ;;  %555 = vmatpush.msra.mxu3 %v2221_v50  ;;  %v2251_v17 = vld [vmem:[%s3155_s6 + $0x260] sm:$0xff]  ;;  %v3221_v21 = vld [vmem:[%s3155_s6 + $0x258] sm:$0xff]  ;;  %v2215_v22 = vld [vmem:[%s3155_s6 + $0x188] sm:$0xff] }
  0x4c   : >> { %2447 = vmatpush.msra.mxu1 %v308_v42  ;;  %329 = vmatpush.msra.mxu0 %v308_v42  ;;  %v3226_v24 = vld [vmem:[%s3155_s6 + $0x250] sm:$0xff]  ;;  %v2214_v25 = vld [vmem:[%s3155_s6 + $0x180] sm:$0xff]  ;;  %v2173_v26 = vld [vmem:[%s3155_s6 + $0xc8] sm:$0xff] }
  0x4d   : >> { %481 = vmatpush.msra.mxu2 %v2194_v46  ;;  %556 = vmatpush.msra.mxu3 %v2220_v53  ;;  %v3232_v27 = vld [vmem:[%s3155_s6 + $0x248] sm:$0xff]  ;;  %v2181_v28 = vld [vmem:[%s3199_s8 + $0x34] sm:$0xff]  ;;  %v2172_v30 = vld [vmem:[%s3155_s6 + $0xc0] sm:$0xff] }
  0x4e   : >> { %2448 = vmatpush.msra.mxu1 %v307_v45  ;;  %330 = vmatpush.msra.mxu0 %v307_v45  ;;  %v2205_v29 = vld [vmem:[%s3199_s8 + $0x25] sm:$0xff]  ;;  %v2171_v34 = vld [vmem:[%s3155_s6 + $0xb8] sm:$0xff]  ;;  %v2170_v36 = vld [vmem:[%s3155_s6 + $0xb0] sm:$0xff] }
  0x4f   : >> { %482 = vmatpush.msra.mxu2 %v2193_v49  ;;  %557 = vmatpush.msra.mxu3 %v2219_v56  ;;  %v3239_v31 = vld [vmem:[%s3155_s6 + $0x240] sm:$0xff]  ;;  %v2246_v35 = vld [vmem:[%s3155_s6 + $0x238] sm:$0xff]  ;;  %v2245_v37 = vld [vmem:[%s3155_s6 + $0x230] sm:$0xff] }
  0x50   : >> { %2449 = vmatpush.msra.mxu1 %v306_v48  ;;  %331 = vmatpush.msra.mxu0 %v306_v48  ;;  %v2152_v32 = vld [vmem:[%s3199_s8 + $0x82] sm:$0xff]  ;;  %v2206_v41 = vld [vmem:[%s3199_s8 + $0x35] sm:$0xff] }
  0x51   : >> { %483 = vmatpush.msra.mxu2 %v2192_v52  ;;  %558 = vmatpush.msra.mxu3 %v2218_v63  ;;  %v2148_v33 = vld [vmem:[%s3199_s8 + $0x42] sm:$0xff]  ;;  %v2153_v44 = vld [vmem:[%s3199_s8 + $0x92] sm:$0xff] }
  0x52   : >> { %2450 = vmatpush.msra.mxu1 %v305_v51  ;;  %332 = vmatpush.msra.mxu0 %v305_v51  ;;  %v2169_v38 = vld [vmem:[%s3155_s6 + $0xa8] sm:$0xff]  ;;  %v2168_v42 = vld [vmem:[%s3155_s6 + $0xa0] sm:$0xff]  ;;  %v2149_v45 = vld [vmem:[%s3199_s8 + $0x52] sm:$0xff] }
  0x53   : >> { %484 = vmatpush.msra.mxu2 %v2191_v55  ;;  %559 = vmatpush.msra.mxu3 %v2217_v3  ;;  %v2244_v39 = vld [vmem:[%s3155_s6 + $0x228] sm:$0xff]  ;;  %v2243_v43 = vld [vmem:[%s3155_s6 + $0x220] sm:$0xff]  ;;  %v2167_v46 = vld [vmem:[%s3155_s6 + $0x98] sm:$0xff] }
  0x54   : >> { %2451 = vmatpush.msra.mxu1 %v304_v54  ;;  %333 = vmatpush.msra.mxu0 %v304_v54  ;;  %v2182_v40 = vld [vmem:[%s3199_s8 + $0x44] sm:$0xff]  ;;  %v2242_v47 = vld [vmem:[%s3155_s6 + $0x218] sm:$0xff]  ;;  %v2166_v48 = vld [vmem:[%s3155_s6 + $0x90] sm:$0xff] }
  0x55   : >> { %485 = vmatpush.msra.mxu2 %v2190_v62  ;;  %560 = vmatpush.msra.mxu3 %v2216_v7  ;;  %v2241_v49 = vld [vmem:[%s3155_s6 + $0x210] sm:$0xff]  ;;  %v2165_v50 = vld [vmem:[%s3155_s6 + $0x88] sm:$0xff]  ;;  %v2164_v54 = vld [vmem:[%s3155_s6 + $0x80] sm:$0xff] }
  0x56   : >> { %2452 = vmatpush.msra.mxu1 %v303_v57  ;;  %334 = vmatpush.msra.mxu0 %v303_v57  ;;  %v2240_v51 = vld [vmem:[%s3155_s6 + $0x208] sm:$0xff]  ;;  %v2183_v52 = vld [vmem:[%s3199_s8 + $0x54] sm:$0xff]  ;;  %v2239_v55 = vld [vmem:[%s3155_s6 + $0x200] sm:$0xff] }
  0x57   : >> { %347 = vmatmul.f32.vlgmr.msra.gmra.mxu1 %v2150_v58  ;;  %335 = vmatmul.f32.vlgmr.msra.gmra.mxu0 %v2146_v59  ;;  %v2207_v53 = vld [vmem:[%s3199_s8 + $0x45] sm:$0xff]  ;;  %v2208_v59 = vld [vmem:[%s3199_s8 + $0x55] sm:$0xff] }
  0x58   : >> { %395 = vmatpush.msrb.mxu1 %v2179_v60  ;;  %623 = vmatpush.msrb.mxu0 %v2254_v61  ;;  %v2155_v56 = vld [vmem:[%s3199_s8 + $0x23] sm:$0xff]  ;;  %v2156_v60 = vld [vmem:[%s3199_s8 + $0x33] sm:$0xff] }
  0x59   : >> { %486 = vmatpush.msra.mxu2 %v2189_v2  ;;  %561 = vmatpush.msra.mxu3 %v2215_v22  ;;  %v2230_v57 = vld [vmem:[%s3199_s8 + $0x26] sm:$0xff]  ;;  %v2185_v62 = vld [vmem:[%s3199_s8 + $0x74] sm:$0xff] }
  0x5a   : >> { %396 = vmatpush.msrb.mxu1 %v2178_v0  ;;  %624 = vmatpush.msrb.mxu0 %v2253_v1  ;;  %v2184_v58 = vld [vmem:[%s3199_s8 + $0x64] sm:$0xff]  ;;  %v2210_v3 = vld [vmem:[%s3199_s8 + $0x75] sm:$0xff] }
  0x5b   : >> { %487 = vmatmul.f32.vlgmr.msra.gmra.mxu2 %v2180_v6  ;;  %562 = vmatpush.msra.mxu3 %v2214_v25  ;;  %v2209_v63 = vld [vmem:[%s3199_s8 + $0x65] sm:$0xff]  ;;  %v2187_v6 = vld [vmem:[%s3199_s8 + $0x94] sm:$0xff] }
  0x5c   : >> { %397 = vmatpush.msrb.mxu1 %v2177_v4  ;;  %625 = vmatpush.msrb.mxu0 %v2252_v5  ;;  %v2157_v0 = vld [vmem:[%s3199_s8 + $0x43] sm:$0xff]  ;;  %v2158_v4 = vld [vmem:[%s3199_s8 + $0x53] sm:$0xff] }
  0x5d   : >> { %2453 = vmatpush.msrb.mxu2 %v2254_v61  ;;  %563 = vmatmul.f32.vlgmr.msra.gmra.mxu3 %v2205_v29  ;;  %v2231_v61 = vld [vmem:[%s3199_s8 + $0x36] sm:$0xff]  ;;  %v2186_v2 = vld [vmem:[%s3199_s8 + $0x84] sm:$0xff] }
  0x5e   : >> { %398 = vmatpush.msrb.mxu1 %v2176_v8  ;;  %626 = vmatpush.msrb.mxu0 %v2251_v17  ;;  %v2211_v7 = vld [vmem:[%s3199_s8 + $0x85] sm:$0xff]  ;;  %v2237_v22 = vld [vmem:[%s3199_s8 + $0x96] sm:$0xff] }
  0x5f   : >> { %350 = vmatmul.f32.gmra.mxu1 %v2151_v18  ;;  %338 = vmatmul.f32.gmra.mxu0 %v2147_v19  ;;  %v2159_v8 = vld [vmem:[%s3199_s8 + $0x63] sm:$0xff]  ;;  %v2212_v19 = vld [vmem:[%s3199_s8 + $0x95] sm:$0xff] }
  0x60   : >> { %399 = vmatpush.msrb.mxu1 %v2175_v20  ;;  %627 = vmatpush.msrb.mxu0 %v3221_v21  ;;  %v2236_v18 = vld [vmem:[%s3199_s8 + $0x86] sm:$0xff]  ;;  %v2160_v20 = vld [vmem:[%s3199_s8 + $0x73] sm:$0xff] }
  0x61   : >> { %2454 = vmatpush.msrb.mxu2 %v2253_v1  ;;  %v2232_v1 = vld [vmem:[%s3199_s8 + $0x46] sm:$0xff] }
  0x62   : >> { %400 = vmatpush.msrb.mxu1 %v2174_v23  ;;  %628 = vmatpush.msrb.mxu0 %v3226_v24  ;;  %v2161_v23 = vld [vmem:[%s3199_s8 + $0x83] sm:$0xff] }
  0x63   : >> { %490 = vmatmul.f32.gmra.mxu2 %v2181_v28 }
  0x64   : >> { %401 = vmatpush.msrb.mxu1 %v2173_v26  ;;  %629 = vmatpush.msrb.mxu0 %v3232_v27 }
  0x65   : >> { %2455 = vmatpush.msrb.mxu2 %v2252_v5  ;;  %566 = vmatmul.f32.gmra.mxu3 %v2206_v41  ;;  %v2233_v5 = vld [vmem:[%s3199_s8 + $0x56] sm:$0xff] }
  0x66   : >> { %402 = vmatpush.msrb.mxu1 %v2172_v30  ;;  %630 = vmatpush.msrb.mxu0 %v3239_v31 }
  0x67   : >> { %353 = vmatmul.f32.gmra.mxu1 %v2152_v32  ;;  %341 = vmatmul.f32.gmra.mxu0 %v2148_v33 }
  0x68   : >> { %403 = vmatpush.msrb.mxu1 %v2171_v34  ;;  %631 = vmatpush.msrb.mxu0 %v2246_v35 }
  0x69   : >> { %2456 = vmatpush.msrb.mxu2 %v2251_v17  ;;  %v2234_v17 = vld [vmem:[%s3199_s8 + $0x66] sm:$0xff] }
  0x6a   : >> { %404 = vmatpush.msrb.mxu1 %v2170_v36  ;;  %632 = vmatpush.msrb.mxu0 %v2245_v37 }
  0x6b   : >> { %493 = vmatmul.f32.gmra.mxu2 %v2182_v40 }
  0x6c   : >> { %405 = vmatpush.msrb.mxu1 %v2169_v38  ;;  %633 = vmatpush.msrb.mxu0 %v2244_v39 }
  0x6d   : >> { %2457 = vmatpush.msrb.mxu2 %v3221_v21  ;;  %569 = vmatmul.f32.gmra.mxu3 %v2207_v53  ;;  %v2235_v21 = vld [vmem:[%s3199_s8 + $0x76] sm:$0xff] }
  0x6e   : >> { %406 = vmatpush.msrb.mxu1 %v2168_v42  ;;  %634 = vmatpush.msrb.mxu0 %v2243_v43 }
  0x6f   : >> { %356 = vmatmul.f32.gmra.mxu1 %v2153_v44  ;;  %344 = vmatmul.f32.gmra.mxu0 %v2149_v45 }
  0x70   : >> { %407 = vmatpush.msrb.mxu1 %v2167_v46  ;;  %635 = vmatpush.msrb.mxu0 %v2242_v47 }
  0x71   : >> { %2458 = vmatpush.msrb.mxu2 %v3226_v24  ;;  %v2162_v24 = vld [vmem:[%s3199_s8 + $0x93] sm:$0xff] }
  0x72   : >> { %408 = vmatpush.msrb.mxu1 %v2166_v48  ;;  %636 = vmatpush.msrb.mxu0 %v2241_v49 }
  0x73   : >> { %496 = vmatmul.f32.gmra.mxu2 %v2183_v52 }
  0x74   : >> { %409 = vmatpush.msrb.mxu1 %v2165_v50  ;;  %637 = vmatpush.msrb.mxu0 %v2240_v51 }
  0x75   : >> { %2459 = vmatpush.msrb.mxu2 %v3232_v27  ;;  %572 = vmatmul.f32.gmra.mxu3 %v2208_v59 }
  0x76   : >> { %410 = vmatpush.msrb.mxu1 %v2164_v54  ;;  %638 = vmatpush.msrb.mxu0 %v2239_v55 }
  0x77   : >> { %411 = vmatmul.f32.vlgmr.msrb.gmra.mxu1 %v2155_v56  ;;  %639 = vmatmul.f32.vlgmr.msrb.gmra.mxu0 %v2230_v57 }
  0x78   : >> { %2460 = vmatpush.msrb.mxu2 %v3239_v31 }
  0x7a   : >> { %2461 = vmatpush.msrb.mxu2 %v2246_v35 }
  0x7b   : >> { %499 = vmatmul.f32.gmra.mxu2 %v2184_v58 }
  0x7c   : >> { %2462 = vmatpush.msrb.mxu2 %v2245_v37 }
  0x7d   : >> { %575 = vmatmul.f32.gmra.mxu3 %v2209_v63 }
  0x7e   : >> { %2463 = vmatpush.msrb.mxu2 %v2244_v39 }
  0x7f   : >> { %414 = vmatmul.f32.gmra.mxu1 %v2156_v60  ;;  %642 = vmatmul.f32.gmra.mxu0 %v2231_v61 }
  0x80   : >> { %2464 = vmatpush.msrb.mxu2 %v2243_v43 }
  0x82   : >> { %2465 = vmatpush.msrb.mxu2 %v2242_v47 }
  0x83   : >> { %502 = vmatmul.f32.gmra.mxu2 %v2185_v62 }
  0x84   : >> { %2466 = vmatpush.msrb.mxu2 %v2241_v49 }
  0x85   : >> { %578 = vmatmul.f32.gmra.mxu3 %v2210_v3 }
  0x86   : >> { %2467 = vmatpush.msrb.mxu2 %v2240_v51 }
  0x87   : >> { %417 = vmatmul.f32.gmra.mxu1 %v2157_v0  ;;  %645 = vmatmul.f32.gmra.mxu0 %v2232_v1 }
  0x88   : >> { %2468 = vmatpush.msrb.mxu2 %v2239_v55 }
  0x8b   : >> { %505 = vmatmul.f32.gmra.mxu2 %v2186_v2 }
  0x8d   : >> { %581 = vmatmul.f32.gmra.mxu3 %v2211_v7 }
  0x8f   : >> { %420 = vmatmul.f32.gmra.mxu1 %v2158_v4  ;;  %648 = vmatmul.f32.gmra.mxu0 %v2233_v5 }
  0x93   : >> { %508 = vmatmul.f32.gmra.mxu2 %v2187_v6 }
  0x95   : >> { %584 = vmatmul.f32.gmra.mxu3 %v2212_v19 }
  0x97   : >> { %423 = vmatmul.f32.gmra.mxu1 %v2159_v8  ;;  %651 = vmatmul.f32.gmra.mxu0 %v2234_v17 }
  0x9b   : >> { %657 = vmatmul.f32.vlgmr.msrb.gmra.mxu2 %v2236_v18 }
  0x9f   : >> { %426 = vmatmul.f32.gmra.mxu1 %v2160_v20  ;;  %654 = vmatmul.f32.gmra.mxu0 %v2235_v21 }
  0xa3   : >> { %660 = vmatmul.f32.gmra.mxu2 %v2237_v22 }
  0xa7   : >> { %429 = vmatmul.f32.gmra.mxu1 %v2161_v23 }
  0xaf   : >> { %432 = vmatmul.f32.gmra.mxu1 %v2162_v24 }
  0xd4   : >> { %v348_v25 = vpop.f32.mrf.mxu1  ;;  %v336_v26 = vpop.f32.mrf.mxu0 }
  0xd5   : >> { %v360_v38 = vadd.f32 %v2977_v16, %v336_v26 }
  0xdc   : >> { %v351_v27 = vpop.f32.mrf.mxu1  ;;  %v339_v28 = vpop.f32.mrf.mxu0 }
  0xdd   : >> { %v361_v45 = vadd.f32 %v2973_v15, %v339_v28  ;;  %v365_v21 = vadd.f32 %v2957_v11, %v351_v27 }
  0xde   : >> { %v488_v29 = vpop.f32.mrf.mxu2 }
  0xe0   : >> { %v564_v33 = vpop.f32.mrf.mxu3 }
  0xe4   : >> { %v354_v30 = vpop.f32.mrf.mxu1  ;;  %v342_v31 = vpop.f32.mrf.mxu0 }
  0xe5   : >> { %v362_v54 = vadd.f32 %v2969_v14, %v342_v31  ;;  %v364_v14 = vadd.f32 %v2961_v12, %v348_v25  ;;  %v366_v31 = vadd.f32 %v2953_v10, %v354_v30  ;;  %v2807_v30 = vld [vmem:[%s4053_s2] ss:$0 sm:$0xff] (%p277_p4) }
  0xe6   : >> { %v491_v32 = vpop.f32.mrf.mxu2 }
  0xe8   : >> { %v567_v37 = vpop.f32.mrf.mxu3 }
  0xec   : >> { %v357_v34 = vpop.f32.mrf.mxu1  ;;  %v345_v35 = vpop.f32.mrf.mxu0 }
  0xee   : >> { %v494_v36 = vpop.f32.mrf.mxu2 }
  0xf0   : >> { %v570_v47 = vpop.f32.mrf.mxu3 }
  0xf4   : >> { %v412_v39 = vpop.f32.mrf.mxu1  ;;  %v640_v40 = vpop.f32.mrf.mxu0 }
  0xf5   : >> { %v436_v41 = vadd.f32 %v412_v39, %v360_v38  ;;  %v367_v38 = vadd.f32 %v2949_v9, %v357_v34 }
  0xf6   : >> { %v497_v43 = vpop.f32.mrf.mxu2 }
  0xf7   : >> { %v512_v42 = vadd.f32 %v488_v29, %v436_v41 }
  0xf8   : >> { %v573_v59 = vpop.f32.mrf.mxu3 }
  0xf9   : >> { %v588_v44 = vadd.f32 %v564_v33, %v512_v42 }
  0xfb   : >> { %v3298_v16 = vadd.f32 %v640_v40, %v588_v44  }
  0xfc   : >> { %v415_v48 = vpop.f32.mrf.mxu1  ;;  %v643_v49 = vpop.f32.mrf.mxu0 }
  0xfd   : >> { %v4057_v46 = vmov %v3298_v16  ;;  %v437_v50 = vadd.f32 %v415_v48, %v361_v45  ;;  %v363_v16 = vadd.f32 %v2965_v13, %v345_v35 }
  0xfe   : >> { %v500_v52 = vpop.f32.mrf.mxu2  ;;  %v676_v45 = vadd.f32 (%p277_p4), %v2807_v30, %v4057_v46 }
  0xff   : >> { %v513_v51 = vadd.f32 %v491_v32, %v437_v50 }
 0x100   : >> { %v576_v4 = vpop.f32.mrf.mxu3 }
 0x101   : >> { %v589_v53 = vadd.f32 %v567_v37, %v513_v51 }
 0x103   : >> { %v3301_v15 = vadd.f32 %v643_v49, %v589_v53   ;;  %v700_v53 = vsub.f32 (%p277_p4), 0.0, %v676_v45 }
 0x104   : >> { %v418_v56 = vpop.f32.mrf.mxu1  ;;  %v646_v57 = vpop.f32.mrf.mxu0 }
 0x105   : >> { %v4058_v55 = vmov %v3301_v15  ;;  %v438_v58 = vadd.f32 %v418_v56, %v362_v54  ;;  %v3338_v54 = vmul.f32 (%p277_p4), 0.5, %v676_v45 }
 0x106   : >> { %v503_v61 = vpop.f32.mrf.mxu2  ;;  %v677_v48 = vadd.f32 (%p277_p4), %v2807_v30, %v4058_v55 }
 0x107   : >> { %v514_v60 = vadd.f32 %v494_v36, %v438_v58  ;;  %v708_v58 = vmax.f32 (%p277_p4), %v700_v53, 0.0 }
 0x108   : >> { %v579_v20 = vpop.f32.mrf.mxu3 }
 0x109   : >> { %v590_v62 = vadd.f32 %v570_v47, %v514_v60  ;;  %724 = vrot.lane.b32.xlu0 (%p277_p4), %v708_v58, %s3056_s11 }
 0x10b   : >> { %v666_v63 = vadd.f32 %v646_v57, %v590_v62  }
 0x10c   : >> { %v421_v0 = vpop.f32.mrf.mxu1  ;;  %v649_v1 = vpop.f32.mrf.mxu0 }
 0x10d   : >> { %v439_v2 = vadd.f32 %v421_v0, %v363_v16  ;;  %v4066_v16 = vmov %v4057_v46  ;;  %v678_v34 = vadd.f32 (%p277_p4), %v2807_v30, %v666_v63 }
 0x10e   : >> { %v506_v6 = vpop.f32.mrf.mxu2 }
 0x10f   : >> { %v515_v3 = vadd.f32 %v497_v43, %v439_v2  ;;  %v702_v51 = vsub.f32 (%p277_p4), 0.0, %v678_v34 }
 0x110   : >> { %v582_v25 = vpop.f32.mrf.mxu3 }
 0x111   : >> { %v591_v5 = vadd.f32 %v573_v59, %v515_v3  ;;  %v710_v57 = vmax.f32 (%p277_p4), %v702_v51, 0.0 }
 0x113   : >> { %v667_v7 = vadd.f32 %v649_v1, %v591_v5   ;;  %728 = vrot.lane.b32.xlu1 (%p277_p4), %v710_v57, %s3056_s11 }
 0x114   : >> { %v424_v15 = vpop.f32.mrf.mxu1  ;;  %v652_v17 = vpop.f32.mrf.mxu0 }
 0x115   : >> { %v440_v8 = vadd.f32 %v424_v15, %v364_v14  ;;  %v4064_v14 = vmov %v666_v63  ;;  %v4065_v15 = vmov %v4058_v55  ;;  %v679_v47 = vadd.f32 (%p277_p4), %v2807_v30, %v667_v7 }
 0x116   : >> { %v509_v23 = vpop.f32.mrf.mxu2 }
 0x117   : >> { %v516_v18 = vadd.f32 %v500_v52, %v440_v8  ;;  %v3336_v52 = vmul.f32 (%p277_p4), 0.5, %v678_v34  ;;  %v3340_v56 = vmul.f32 (%p277_p4), 0.5, %v679_v47  ;;  %v703_v59 = vsub.f32 (%p277_p4), 0.0, %v679_v47 }
 0x118   : >> { %v585_v40 = vpop.f32.mrf.mxu3 }
 0x119   : >> { %v592_v19 = vadd.f32 %v576_v4, %v516_v18  ;;  %v711_v1 = vmax.f32 (%p277_p4), %v703_v59, 0.0 }
 0x11b   : >> { %v668_v22 = vadd.f32 %v652_v17, %v592_v19   ;;  %730 = vrot.lane.b32.xlu1 (%p277_p4), %v711_v1, %s3056_s11 }
 0x11c   : >> { %v427_v13 = vpop.f32.mrf.mxu1  ;;  %v655_v28 = vpop.f32.mrf.mxu0 }
 0x11d   : >> { %v441_v24 = vadd.f32 %v427_v13, %v365_v21  ;;  %v4063_v13 = vmov %v667_v7  ;;  %v680_v50 = vadd.f32 (%p277_p4), %v2807_v30, %v668_v22  ;;  %v694_v21 = vmax.f32 (%p277_p4), %v678_v34, 0.0 }
 0x11e   : >> { %v658_v35 = vpop.f32.mrf.mxu2 }
 0x11f   : >> { %v517_v26 = vadd.f32 %v503_v61, %v441_v24  ;;  %v701_v61 = vsub.f32 (%p277_p4), 0.0, %v677_v48  ;;  %v704_v62 = vsub.f32 (%p277_p4), 0.0, %v680_v50  ;;  %v3351_v16 = vmul.f32 (%p277_p4), 0.5, %v680_v50 }
 0x120   : > { %v696_v15 = vmax.f32 (%p277_p4), %v680_v50, 0.0 }
 0x121   : >> { %v593_v29 = vadd.f32 %v579_v20, %v517_v26  ;;  %v712_v0 = vmax.f32 (%p277_p4), %v704_v62, 0.0  ;;  %v709_v2 = vmax.f32 (%p277_p4), %v701_v61, 0.0 }
 0x123   : >> { %v669_v32 = vadd.f32 %v655_v28, %v593_v29   ;;  %732 = vrot.lane.b32.xlu2 (%p277_p4), %v712_v0, %s3056_s11  ;;  %726 = vrot.lane.b32.xlu0 (%p277_p4), %v709_v2, %s3056_s11  ;;  %v695_v28 = vmax.f32 (%p277_p4), %v679_v47, 0.0  ;;  %v693_v29 = vmax.f32 (%p277_p4), %v677_v48, 0.0 }
 0x124   : >> { %v430_v12 = vpop.f32.mrf.mxu1 }
 0x125   : >> { %v442_v33 = vadd.f32 %v430_v12, %v366_v31  ;;  %v4062_v12 = vmov %v668_v22  ;;  %v681_v55 = vadd.f32 (%p277_p4), %v2807_v30, %v669_v32  ;;  %v692_v22 = vmax.f32 (%p277_p4), %v676_v45, 0.0 }
 0x126   : >> { %v661_v42 = vpop.f32.mrf.mxu2 }
 0x127   : >> { %v518_v36 = vadd.f32 %v506_v6, %v442_v33  ;;  %v3353_v63 = vmul.f32 (%p277_p4), 0.5, %v681_v55  ;;  %v705_v3 = vsub.f32 (%p277_p4), 0.0, %v681_v55  ;;  %v697_v18 = vmax.f32 (%p277_p4), %v681_v55, 0.0 }
 0x129   : >> { %v594_v37 = vadd.f32 %v582_v25, %v518_v36  ;;  %v713_v6 = vmax.f32 (%p277_p4), %v705_v3, 0.0 }
 0x12b   : >> { %v670_v39 = vadd.f32 %v658_v35, %v594_v37   ;;  %734 = vrot.lane.b32.xlu2 (%p277_p4), %v713_v6, %s3056_s11 }
 0x12c   : >> { %v433_v11 = vpop.f32.mrf.mxu1 }
 0x12d   : >> { %v443_v27 = vadd.f32 %v433_v11, %v367_v38  ;;  %v4060_v10 = vmov %v670_v39  ;;  %v4061_v11 = vmov %v669_v32 }
 0x12e   : > { %v682_v10 = vadd.f32 (%p277_p4), %v2807_v30, %v670_v39  ;;  %v3371_v11 = vmov (%p277_p4), 0.0  }
 0x12f   : >> { %v519_v41 = vadd.f32 %v509_v23, %v443_v27  ;;  %v3373_v27 = vmov (%p277_p4), 0.0  }
 0x130   : > { %v3347_v60 = vmul.f32 (%p277_p4), 0.5, %v682_v10  ;;  %v706_v5 = vsub.f32 (%p277_p4), 0.0, %v682_v10  ;;  %v698_v35 = vmax.f32 (%p277_p4), %v682_v10, 0.0 }
 0x131   : >> { %v595_v43 = vadd.f32 %v585_v40, %v519_v41  ;;  %279 = sbr.rel (!%p277_p4) target bundleno = 52 (0x34), region = 113  ;;  %v3375_v40 = vmov (%p277_p4), 0.0   ;;  %v3377_v41 = vmov (%p277_p4), 0.0  }
 0x132   : > { %v714_v7 = vmax.f32 (%p277_p4), %v706_v5, 0.0 }
 0x133   : >> { %v671_v44 = vadd.f32 %v661_v42, %v595_v43   ;;  %v3379_v42 = vmov (%p277_p4), 0.0   ;;  %v3381_v43 = vmov (%p277_p4), 0.0  }
 0x134   : > { %736 = vrot.lane.b32.xlu0 (%p277_p4), %v714_v7, %s3056_s11 }
 0x135   : >> { %v4059_v9 = vmov %v671_v44  ;;  %v3334_v49 = vadd.f32 (%p277_p4), %v2807_v30, %v671_v44  ;;  %v3383_v44 = vmov (%p277_p4), 0.0   ;;  %v3385_v30 = vmov (%p277_p4), 0.0  }
 0x136   : > { %v3342_v9 = vmul.f32 0.5, %v677_v48 }
 0x137   : > { %v3345_v46 = vmul.f32 0.5, %v3334_v49  ;;  %v707_v4 = vsub.f32 0.0, %v3334_v49  ;;  %v699_v33 = vmax.f32 %v3334_v49, 0.0 }
 0x139   : > { %v715_v14 = vmax.f32 %v707_v4, 0.0 }
 0x13b   : > { %738 = vrot.lane.b32.xlu1 %v715_v14, %s3056_s11 }
 0x17b   : > { %v725_v23 = vpop.permute.xlu0 %724 }
 0x17c   : > { %v749_v26 = vsel %vm748_vm0, %v692_v22, %v725_v23 }
 0x17d   : > { %v733_v8 = vpop.permute.xlu2 %732  ;;  %757 = vst [vmem:[#allocation2 + $0x44] sm:$0xff] %v749_v26 }
 0x17e   : > { %v753_v17 = vsel %vm748_vm0, %v696_v15, %v733_v8 }
 0x17f   : > { %761 = vst [vmem:[#allocation2 + $0x84] sm:$0xff] %v753_v17 }
 0x185   : > { %v735_v19 = vpop.permute.xlu2 %734  ;;  %v729_v13 = vpop.permute.xlu1 %728 }
 0x186   : > { %v754_v20 = vsel %vm748_vm0, %v697_v18, %v735_v19  ;;  %v751_v24 = vsel %vm748_vm0, %v694_v21, %v729_v13 }
 0x187   : > { %762 = vst [vmem:[#allocation2 + $0x94] sm:$0xff] %v754_v20 }
 0x188   : > { %759 = vst [vmem:[#allocation2 + $0x64] sm:$0xff] %v751_v24 }
 0x18d   : > { %v731_v31 = vpop.permute.xlu1 %730 }
 0x18e   : > { %v752_v12 = vsel %vm748_vm0, %v695_v28, %v731_v31 }
 0x18f   : > { %760 = vst [vmem:[#allocation2 + $0x74] sm:$0xff] %v752_v12 }
 0x195   : > { %v727_v32 = vpop.permute.xlu0 %726 }
 0x196   : > { %v750_v25 = vsel %vm748_vm0, %v693_v29, %v727_v32 }
 0x197   : > { %758 = vst [vmem:[#allocation2 + $0x54] sm:$0xff] %v750_v25 }
 0x1a6   : > { %v737_v37 = vpop.permute.xlu0 %736 }
 0x1a7   : > { %v755_v39 = vsel %vm748_vm0, %v698_v35, %v737_v37 }
 0x1a8   : > { %763 = vst [vmem:[#allocation2 + $0xa4] sm:$0xff] %v755_v39 }
 0x1ad   : > { %v739_v36 = vpop.permute.xlu1 %738 }
 0x1ae   : > { %v756_v38 = vsel %vm748_vm0, %v699_v33, %v739_v36 }
 0x1af   : > { %764 = vst [vmem:[#allocation2 + $0xb4] sm:$0xff] %v756_v38 }
 0x1b0 LB: >> { %s2257_s13 = smul.u32 640, %s3017_s12  ;;  %s2435_s17 = sshll.u32 %s3017_s12, 5  ;;  %s3017_s12 = sphi %s3387_s12, %s770_s12   ;;  %v3013_v30 = vphi %v3385_v30, %v4077_v30   ;;  %v3009_v44 = vphi %v3383_v44, %v4076_v44   ;;  %v3005_v43 = vphi %v3381_v43, %v4075_v43   ;;  %v3001_v42 = vphi %v3379_v42, %v4074_v42   ;;  %v2997_v41 = vphi %v3377_v41, %v4073_v41   ;;  %v2993_v40 = vphi %v3375_v40, %v4072_v40   ;;  %v2989_v27 = vphi %v3373_v27, %v4071_v27   ;;  %v2985_v11 = vphi %v3371_v11, %v4070_v11  }
 0x1b1   : >> { %s3464_s19 = scalar_lea.vmem [#allocation2], %s2435_s17  ;;  %s770_s12 = sadd.s32 1, %s3017_s12  }
 0x1b2   : >> { %s3420_s16 = scalar_lea.vmem %s4052_s1, %s2257_s13  ;;  %p767_p5 = scmp.ge.s32.totalorder %s770_s12, 5  }
 0x1b3   : >> { %v2273_v34 = vld [vmem:[%s3420_s16 + $0xcf8] sm:$0xff]  ;;  %v2272_v45 = vld [vmem:[%s3420_s16 + $0xcf0] sm:$0xff]  ;;  %v2271_v47 = vld [vmem:[%s3420_s16 + $0xce8] sm:$0xff]  ;;  %s3689_s22 = smov (%p767_p5), 0  }
 0x1b4   : >> { %2469 = vmatpush.msra.mxu1 %v2273_v34  ;;  %810 = vmatpush.msra.mxu0 %v2273_v34  ;;  %v2307_v48 = vld [vmem:[%s3420_s16 + $0xdf8] sm:$0xff]  ;;  %v2306_v49 = vld [vmem:[%s3420_s16 + $0xdf0] sm:$0xff]  ;;  %v2270_v50 = vld [vmem:[%s3420_s16 + $0xce0] sm:$0xff] }
 0x1b5   : >> { %962 = vmatpush.msra.mxu2 %v2307_v48  ;;  %v2305_v51 = vld [vmem:[%s3420_s16 + $0xde8] sm:$0xff]  ;;  %v2269_v53 = vld [vmem:[%s3420_s16 + $0xcd8] sm:$0xff]  ;;  %v2304_v10 = vld [vmem:[%s3420_s16 + $0xde0] sm:$0xff] }
 0x1b6   : >> { %2470 = vmatpush.msra.mxu1 %v2272_v45  ;;  %811 = vmatpush.msra.mxu0 %v2272_v45  ;;  %v2268_v57 = vld [vmem:[%s3420_s16 + $0xcd0] sm:$0xff]  ;;  %v2324_v58 = vld [vmem:[%s3420_s16 + $0xe78] sm:$0xff]  ;;  %v2267_v61 = vld [vmem:[%s3420_s16 + $0xcc8] sm:$0xff] }
 0x1b7   : >> { %963 = vmatpush.msra.mxu2 %v2306_v49  ;;  %v2303_v55 = vld [vmem:[%s3420_s16 + $0xdd8] sm:$0xff]  ;;  %v2323_v59 = vld [vmem:[%s3420_s16 + $0xe70] sm:$0xff]  ;;  %1038 = vmatpush.msra.mxu3 %v2324_v58  ;;  %v2322_v0 = vld [vmem:[%s3420_s16 + $0xe68] sm:$0xff] }
 0x1b8   : >> { %2471 = vmatpush.msra.mxu1 %v2271_v47  ;;  %812 = vmatpush.msra.mxu0 %v2271_v47  ;;  %v2302_v62 = vld [vmem:[%s3420_s16 + $0xdd0] sm:$0xff]  ;;  %v2266_v1 = vld [vmem:[%s3420_s16 + $0xcc0] sm:$0xff]  ;;  %v2301_v2 = vld [vmem:[%s3420_s16 + $0xdc8] sm:$0xff] }
 0x1b9   : >> { %964 = vmatpush.msra.mxu2 %v2305_v51  ;;  %1039 = vmatpush.msra.mxu3 %v2323_v59  ;;  %v2321_v3 = vld [vmem:[%s3420_s16 + $0xe60] sm:$0xff]  ;;  %v2265_v4 = vld [vmem:[%s3420_s16 + $0xcb8] sm:$0xff]  ;;  %v2264_v14 = vld [vmem:[%s3420_s16 + $0xcb0] sm:$0xff] }
 0x1ba   : >> { %2472 = vmatpush.msra.mxu1 %v2270_v50  ;;  %813 = vmatpush.msra.mxu0 %v2270_v50  ;;  %v2300_v5 = vld [vmem:[%s3420_s16 + $0xdc0] sm:$0xff]  ;;  %v2320_v6 = vld [vmem:[%s3420_s16 + $0xe58] sm:$0xff]  ;;  %v2319_v15 = vld [vmem:[%s3420_s16 + $0xe50] sm:$0xff] }
 0x1bb   : >> { %965 = vmatpush.msra.mxu2 %v2304_v10  ;;  %1040 = vmatpush.msra.mxu3 %v2322_v0  ;;  %v2299_v7 = vld [vmem:[%s3420_s16 + $0xdb8] sm:$0xff]  ;;  %v2263_v8 = vld [vmem:[%s3420_s16 + $0xca8] sm:$0xff]  ;;  %v2298_v17 = vld [vmem:[%s3420_s16 + $0xdb0] sm:$0xff] }
 0x1bc   : >> { %2473 = vmatpush.msra.mxu1 %v2269_v53  ;;  %814 = vmatpush.msra.mxu0 %v2269_v53  ;;  %v2318_v18 = vld [vmem:[%s3420_s16 + $0xe48] sm:$0xff]  ;;  %v2262_v19 = vld [vmem:[%s3420_s16 + $0xca0] sm:$0xff]  ;;  %v2261_v22 = vld [vmem:[%s3420_s16 + $0xc98] sm:$0xff] }
 0x1bd   : >> { %966 = vmatpush.msra.mxu2 %v2303_v55  ;;  %1041 = vmatpush.msra.mxu3 %v2321_v3  ;;  %v2297_v20 = vld [vmem:[%s3420_s16 + $0xda8] sm:$0xff]  ;;  %v2317_v21 = vld [vmem:[%s3420_s16 + $0xe40] sm:$0xff]  ;;  %v2316_v23 = vld [vmem:[%s3420_s16 + $0xe38] sm:$0xff] }
 0x1be   : >> { %2474 = vmatpush.msra.mxu1 %v2268_v57  ;;  %815 = vmatpush.msra.mxu0 %v2268_v57  ;;  %v2296_v13 = vld [vmem:[%s3420_s16 + $0xda0] sm:$0xff]  ;;  %v2260_v24 = vld [vmem:[%s3420_s16 + $0xc90] sm:$0xff]  ;;  %v2295_v26 = vld [vmem:[%s3420_s16 + $0xd98] sm:$0xff] }
 0x1bf   : >> { %967 = vmatpush.msra.mxu2 %v2302_v62  ;;  %1042 = vmatpush.msra.mxu3 %v2320_v6  ;;  %v2315_v28 = vld [vmem:[%s3420_s16 + $0xe30] sm:$0xff]  ;;  %v2259_v29 = vld [vmem:[%s3420_s16 + $0xc88] sm:$0xff]  ;;  %v2258_v12 = vld [vmem:[%s3420_s16 + $0xc80] sm:$0xff] }
 0x1c0   : >> { %2475 = vmatpush.msra.mxu1 %v2267_v61  ;;  %816 = vmatpush.msra.mxu0 %v2267_v61  ;;  %v2294_v31 = vld [vmem:[%s3420_s16 + $0xd90] sm:$0xff]  ;;  %v2314_v32 = vld [vmem:[%s3420_s16 + $0xe28] sm:$0xff]  ;;  %v786_v25 = vld [vmem:[%s3464_s19 + $0x40] sm:$0xff] }
 0x1c1   : >> { %968 = vmatpush.msra.mxu2 %v2301_v2  ;;  %1043 = vmatpush.msra.mxu3 %v2319_v15  ;;  %v782_v33 = vld [vmem:[%s3464_s19] sm:$0xff]  ;;  %v2290_v35 = vld [vmem:[%s3420_s16 + $0xd78] sm:$0xff]  ;;  %v2293_v37 = vld [vmem:[%s3420_s16 + $0xd88] sm:$0xff] }
 0x1c2   : >> { %2476 = vmatpush.msra.mxu1 %v2266_v1  ;;  %817 = vmatpush.msra.mxu0 %v2266_v1  ;;  %v2341_v36 = vld [vmem:[%s3420_s16 + $0xef8] sm:$0xff]  ;;  %v2313_v38 = vld [vmem:[%s3420_s16 + $0xe20] sm:$0xff]  ;;  %v2289_v39 = vld [vmem:[%s3420_s16 + $0xd70] sm:$0xff] }
 0x1c3   : >> { %969 = vmatpush.msra.mxu2 %v2300_v5  ;;  %1044 = vmatpush.msra.mxu3 %v2318_v18  ;;  %v2340_v34 = vld [vmem:[%s3420_s16 + $0xef0] sm:$0xff]  ;;  %v2292_v45 = vld [vmem:[%s3420_s16 + $0xd80] sm:$0xff]  ;;  %v2312_v47 = vld [vmem:[%s3420_s16 + $0xe18] sm:$0xff] }
 0x1c4   : >> { %2477 = vmatpush.msra.mxu1 %v2265_v4  ;;  %818 = vmatpush.msra.mxu0 %v2265_v4  ;;  %v2288_v48 = vld [vmem:[%s3420_s16 + $0xd68] sm:$0xff]  ;;  %v2311_v51 = vld [vmem:[%s3420_s16 + $0xe10] sm:$0xff]  ;;  %v2287_v53 = vld [vmem:[%s3420_s16 + $0xd60] sm:$0xff] }
 0x1c5   : >> { %970 = vmatpush.msra.mxu2 %v2299_v7  ;;  %1045 = vmatpush.msra.mxu3 %v2317_v21  ;;  %v2339_v49 = vld [vmem:[%s3420_s16 + $0xee8] sm:$0xff]  ;;  %v2338_v10 = vld [vmem:[%s3420_s16 + $0xee0] sm:$0xff]  ;;  %v787_v57 = vld [vmem:[%s3464_s19 + $0x50] sm:$0xff] }
 0x1c6   : >> { %2478 = vmatpush.msra.mxu1 %v2264_v14  ;;  %819 = vmatpush.msra.mxu0 %v2264_v14  ;;  %v935_v50 = vld [vmem:[%s3464_s19 + $0x4] sm:$0xff]  ;;  %v783_v58 = vld [vmem:[%s3464_s19 + $0x10] sm:$0xff]  ;;  %v2286_v55 = vld [vmem:[%s3420_s16 + $0xd58] sm:$0xff] }
 0x1c7   : >> { %971 = vmatpush.msra.mxu2 %v2298_v17  ;;  %1046 = vmatpush.msra.mxu3 %v2316_v23  ;;  %v3486_v59 = vld [vmem:[%s3420_s16 + $0xed8] sm:$0xff]  ;;  %v2310_v61 = vld [vmem:[%s3420_s16 + $0xe08] sm:$0xff]  ;;  %v2285_v62 = vld [vmem:[%s3420_s16 + $0xd50] sm:$0xff] }
 0x1c8   : >> { %2479 = vmatpush.msra.mxu1 %v2263_v8  ;;  %820 = vmatpush.msra.mxu0 %v2263_v8  ;;  %v3491_v0 = vld [vmem:[%s3420_s16 + $0xed0] sm:$0xff]  ;;  %v2309_v1 = vld [vmem:[%s3420_s16 + $0xe00] sm:$0xff]  ;;  %v2284_v2 = vld [vmem:[%s3420_s16 + $0xd48] sm:$0xff] }
 0x1c9   : >> { %972 = vmatpush.msra.mxu2 %v2297_v20  ;;  %1047 = vmatpush.msra.mxu3 %v2315_v28  ;;  %v3497_v3 = vld [vmem:[%s3420_s16 + $0xec8] sm:$0xff]  ;;  %v936_v4 = vld [vmem:[%s3464_s19 + $0x14] sm:$0xff]  ;;  %v2283_v6 = vld [vmem:[%s3420_s16 + $0xd40] sm:$0xff] }
 0x1ca   : >> { %2480 = vmatpush.msra.mxu1 %v2262_v19  ;;  %821 = vmatpush.msra.mxu0 %v2262_v19  ;;  %v1011_v5 = vld [vmem:[%s3464_s19 + $0x6] sm:$0xff]  ;;  %v2282_v8 = vld [vmem:[%s3420_s16 + $0xd38] sm:$0xff]  ;;  %v2281_v18 = vld [vmem:[%s3420_s16 + $0xd30] sm:$0xff] }
 0x1cb   : >> { %973 = vmatpush.msra.mxu2 %v2296_v13  ;;  %1048 = vmatpush.msra.mxu3 %v2314_v32  ;;  %v3504_v14 = vld [vmem:[%s3420_s16 + $0xec0] sm:$0xff]  ;;  %v2333_v17 = vld [vmem:[%s3420_s16 + $0xeb8] sm:$0xff]  ;;  %v2332_v19 = vld [vmem:[%s3420_s16 + $0xeb0] sm:$0xff] }
 0x1cc   : >> { %2481 = vmatpush.msra.mxu1 %v2261_v22  ;;  %822 = vmatpush.msra.mxu0 %v2261_v22  ;;  %v788_v7 = vld [vmem:[%s3464_s19 + $0x60] sm:$0xff]  ;;  %v2280_v20 = vld [vmem:[%s3420_s16 + $0xd28] sm:$0xff]  ;;  %v1012_v13 = vld [vmem:[%s3464_s19 + $0x16] sm:$0xff] }
 0x1cd   : >> { %974 = vmatpush.msra.mxu2 %v2295_v26  ;;  %1049 = vmatpush.msra.mxu3 %v2313_v38  ;;  %v784_v15 = vld [vmem:[%s3464_s19 + $0x20] sm:$0xff]  ;;  %v2331_v21 = vld [vmem:[%s3420_s16 + $0xea8] sm:$0xff]  ;;  %v789_v26 = vld [vmem:[%s3464_s19 + $0x70] sm:$0xff] }
 0x1ce   : >> { %2482 = vmatpush.msra.mxu1 %v2260_v24  ;;  %823 = vmatpush.msra.mxu0 %v2260_v24  ;;  %v937_v22 = vld [vmem:[%s3464_s19 + $0x24] sm:$0xff]  ;;  %v785_v28 = vld [vmem:[%s3464_s19 + $0x30] sm:$0xff] }
 0x1cf   : >> { %975 = vmatpush.msra.mxu2 %v2294_v31  ;;  %1050 = vmatpush.msra.mxu3 %v2312_v47  ;;  %v2279_v23 = vld [vmem:[%s3420_s16 + $0xd20] sm:$0xff]  ;;  %v2329_v31 = vld [vmem:[%s3420_s16 + $0xe98] sm:$0xff]  ;;  %v2277_v32 = vld [vmem:[%s3420_s16 + $0xd10] sm:$0xff] }
 0x1d0   : >> { %2483 = vmatpush.msra.mxu1 %v2259_v29  ;;  %824 = vmatpush.msra.mxu0 %v2259_v29  ;;  %v2330_v24 = vld [vmem:[%s3420_s16 + $0xea0] sm:$0xff]  ;;  %v2278_v29 = vld [vmem:[%s3420_s16 + $0xd18] sm:$0xff] }
 0x1d1   : >> { %976 = vmatpush.msra.mxu2 %v2293_v37  ;;  %1051 = vmatpush.msra.mxu3 %v2311_v51  ;;  %v2275_v37 = vld [vmem:[%s3420_s16 + $0xd00] sm:$0xff]  ;;  %v1014_v47 = vld [vmem:[%s3464_s19 + $0x36] sm:$0xff] }
 0x1d2   : >> { %2484 = vmatpush.msra.mxu1 %v2258_v12  ;;  %825 = vmatpush.msra.mxu0 %v2258_v12  ;;  %v2328_v12 = vld [vmem:[%s3420_s16 + $0xe90] sm:$0xff]  ;;  %v2326_v38 = vld [vmem:[%s3420_s16 + $0xe80] sm:$0xff] }
 0x1d3   : >> { %838 = vmatmul.f32.vlgmr.msra.gmra.mxu1 %v786_v25  ;;  %826 = vmatmul.f32.vlgmr.msra.gmra.mxu0 %v782_v33  ;;  %v2276_v25 = vld [vmem:[%s3420_s16 + $0xd08] sm:$0xff] }
 0x1d4   : >> { %886 = vmatpush.msrb.mxu1 %v2290_v35  ;;  %1114 = vmatpush.msrb.mxu0 %v2341_v36  ;;  %v2327_v33 = vld [vmem:[%s3420_s16 + $0xe88] sm:$0xff]  ;;  %v938_v35 = vld [vmem:[%s3464_s19 + $0x34] sm:$0xff] }
 0x1d5   : >> { %977 = vmatpush.msra.mxu2 %v2292_v45  ;;  %1052 = vmatpush.msra.mxu3 %v2310_v61  ;;  %v939_v45 = vld [vmem:[%s3464_s19 + $0x44] sm:$0xff]  ;;  %v942_v61 = vld [vmem:[%s3464_s19 + $0x74] sm:$0xff] }
 0x1d6   : >> { %887 = vmatpush.msrb.mxu1 %v2289_v39  ;;  %1115 = vmatpush.msrb.mxu0 %v2340_v34  ;;  %v859_v39 = vld [vmem:[%s3464_s19 + $0x2] sm:$0xff] }
 0x1d7   : >> { %978 = vmatmul.f32.vlgmr.msra.gmra.mxu2 %v935_v50  ;;  %1053 = vmatpush.msra.mxu3 %v2309_v1  ;;  %v940_v50 = vld [vmem:[%s3464_s19 + $0x54] sm:$0xff]  ;;  %v1015_v51 = vld [vmem:[%s3464_s19 + $0x46] sm:$0xff] }
 0x1d8   : >> { %888 = vmatpush.msrb.mxu1 %v2288_v48  ;;  %1116 = vmatpush.msrb.mxu0 %v2339_v49  ;;  %v860_v48 = vld [vmem:[%s3464_s19 + $0x12] sm:$0xff]  ;;  %v1091_v1 = vld [vmem:[%s3464_s19 + $0x48] sm:$0xff] }
 0x1d9   : >> { %2485 = vmatpush.msrb.mxu2 %v2341_v36  ;;  %1054 = vmatmul.f32.vlgmr.msra.gmra.mxu3 %v1011_v5  ;;  %v1013_v36 = vld [vmem:[%s3464_s19 + $0x26] sm:$0xff]  ;;  %v1092_v5 = vld [vmem:[%s3464_s19 + $0x58] sm:$0xff] }
 0x1da   : >> { %889 = vmatpush.msrb.mxu1 %v2287_v53  ;;  %1117 = vmatpush.msrb.mxu0 %v2338_v10  ;;  %v861_v53 = vld [vmem:[%s3464_s19 + $0x22] sm:$0xff] }
 0x1db   : >> { %841 = vmatmul.f32.gmra.mxu1 %v787_v57  ;;  %829 = vmatmul.f32.gmra.mxu0 %v783_v58  ;;  %v941_v57 = vld [vmem:[%s3464_s19 + $0x64] sm:$0xff]  ;;  %v1016_v58 = vld [vmem:[%s3464_s19 + $0x56] sm:$0xff] }
 0x1dc   : >> { %890 = vmatpush.msrb.mxu1 %v2286_v55  ;;  %1118 = vmatpush.msrb.mxu0 %v3486_v59  ;;  %v862_v55 = vld [vmem:[%s3464_s19 + $0x32] sm:$0xff] }
 0x1dd   : >> { %2486 = vmatpush.msrb.mxu2 %v2340_v34  ;;  %v1087_v34 = vld [vmem:[%s3464_s19 + $0x8] sm:$0xff] }
 0x1de   : >> { %891 = vmatpush.msrb.mxu1 %v2285_v62  ;;  %1119 = vmatpush.msrb.mxu0 %v3491_v0  ;;  %v1017_v62 = vld [vmem:[%s3464_s19 + $0x66] sm:$0xff] }
 0x1df   : >> { %981 = vmatmul.f32.gmra.mxu2 %v936_v4  ;;  %v864_v4 = vld [vmem:[%s3464_s19 + $0x52] sm:$0xff] }
 0x1e0   : >> { %892 = vmatpush.msrb.mxu1 %v2284_v2  ;;  %1120 = vmatpush.msrb.mxu0 %v3497_v3  ;;  %v1093_v2 = vld [vmem:[%s3464_s19 + $0x68] sm:$0xff] }
 0x1e1   : >> { %2487 = vmatpush.msrb.mxu2 %v2339_v49  ;;  %1057 = vmatmul.f32.gmra.mxu3 %v1012_v13  ;;  %v1088_v49 = vld [vmem:[%s3464_s19 + $0x18] sm:$0xff] }
 0x1e2   : >> { %893 = vmatpush.msrb.mxu1 %v2283_v6  ;;  %1121 = vmatpush.msrb.mxu0 %v3504_v14  ;;  %v1094_v6 = vld [vmem:[%s3464_s19 + $0x78] sm:$0xff] }
 0x1e3   : >> { %844 = vmatmul.f32.gmra.mxu1 %v788_v7  ;;  %832 = vmatmul.f32.gmra.mxu0 %v784_v15  ;;  %v866_v7 = vld [vmem:[%s3464_s19 + $0x72] sm:$0xff] }
 0x1e4   : >> { %894 = vmatpush.msrb.mxu1 %v2282_v8  ;;  %1122 = vmatpush.msrb.mxu0 %v2333_v17 }
 0x1e5   : >> { %2488 = vmatpush.msrb.mxu2 %v2338_v10  ;;  %v1089_v10 = vld [vmem:[%s3464_s19 + $0x28] sm:$0xff] }
 0x1e6   : >> { %895 = vmatpush.msrb.mxu1 %v2281_v18  ;;  %1123 = vmatpush.msrb.mxu0 %v2332_v19 }
 0x1e7   : >> { %984 = vmatmul.f32.gmra.mxu2 %v937_v22 }
 0x1e8   : >> { %896 = vmatpush.msrb.mxu1 %v2280_v20  ;;  %1124 = vmatpush.msrb.mxu0 %v2331_v21 }
 0x1e9   : >> { %2489 = vmatpush.msrb.mxu2 %v3486_v59  ;;  %1060 = vmatmul.f32.gmra.mxu3 %v1013_v36  ;;  %v1090_v59 = vld [vmem:[%s3464_s19 + $0x38] sm:$0xff] }
 0x1ea   : >> { %897 = vmatpush.msrb.mxu1 %v2279_v23  ;;  %1125 = vmatpush.msrb.mxu0 %v2330_v24 }
 0x1eb   : >> { %847 = vmatmul.f32.gmra.mxu1 %v789_v26  ;;  %835 = vmatmul.f32.gmra.mxu0 %v785_v28 }
 0x1ec   : >> { %898 = vmatpush.msrb.mxu1 %v2278_v29  ;;  %1126 = vmatpush.msrb.mxu0 %v2329_v31 }
 0x1ed   : >> { %2490 = vmatpush.msrb.mxu2 %v3491_v0  ;;  %v863_v0 = vld [vmem:[%s3464_s19 + $0x42] sm:$0xff] }
 0x1ee   : >> { %899 = vmatpush.msrb.mxu1 %v2277_v32  ;;  %1127 = vmatpush.msrb.mxu0 %v2328_v12 }
 0x1ef   : >> { %987 = vmatmul.f32.gmra.mxu2 %v938_v35 }
 0x1f0   : >> { %900 = vmatpush.msrb.mxu1 %v2276_v25  ;;  %1128 = vmatpush.msrb.mxu0 %v2327_v33 }
 0x1f1   : >> { %2491 = vmatpush.msrb.mxu2 %v3497_v3  ;;  %1063 = vmatmul.f32.gmra.mxu3 %v1014_v47  ;;  %v1018_v3 = vld [vmem:[%s3464_s19 + $0x76] sm:$0xff] }
 0x1f2   : >> { %901 = vmatpush.msrb.mxu1 %v2275_v37  ;;  %1129 = vmatpush.msrb.mxu0 %v2326_v38 }
 0x1f3   : >> { %902 = vmatmul.f32.vlgmr.msrb.gmra.mxu1 %v859_v39  ;;  %1130 = vmatmul.f32.vlgmr.msrb.gmra.mxu0 %v1087_v34 }
 0x1f4   : >> { %2492 = vmatpush.msrb.mxu2 %v3504_v14  ;;  %v865_v14 = vld [vmem:[%s3464_s19 + $0x62] sm:$0xff] }
 0x1f6   : >> { %2493 = vmatpush.msrb.mxu2 %v2333_v17 }
 0x1f7   : >> { %990 = vmatmul.f32.gmra.mxu2 %v939_v45 }
 0x1f8   : >> { %2494 = vmatpush.msrb.mxu2 %v2332_v19 }
 0x1f9   : >> { %1066 = vmatmul.f32.gmra.mxu3 %v1015_v51 }
 0x1fa   : >> { %2495 = vmatpush.msrb.mxu2 %v2331_v21 }
 0x1fb   : >> { %905 = vmatmul.f32.gmra.mxu1 %v860_v48  ;;  %1133 = vmatmul.f32.gmra.mxu0 %v1088_v49 }
 0x1fc   : >> { %2496 = vmatpush.msrb.mxu2 %v2330_v24 }
 0x1fe   : >> { %2497 = vmatpush.msrb.mxu2 %v2329_v31 }
 0x1ff   : >> { %993 = vmatmul.f32.gmra.mxu2 %v940_v50 }
 0x200   : >> { %2498 = vmatpush.msrb.mxu2 %v2328_v12 }
 0x201   : >> { %1069 = vmatmul.f32.gmra.mxu3 %v1016_v58 }
 0x202   : >> { %2499 = vmatpush.msrb.mxu2 %v2327_v33 }
 0x203   : >> { %908 = vmatmul.f32.gmra.mxu1 %v861_v53  ;;  %1136 = vmatmul.f32.gmra.mxu0 %v1089_v10 }
 0x204   : >> { %2500 = vmatpush.msrb.mxu2 %v2326_v38 }
 0x207   : >> { %996 = vmatmul.f32.gmra.mxu2 %v941_v57 }
 0x209   : >> { %1072 = vmatmul.f32.gmra.mxu3 %v1017_v62 }
 0x20b   : >> { %911 = vmatmul.f32.gmra.mxu1 %v862_v55  ;;  %1139 = vmatmul.f32.gmra.mxu0 %v1090_v59 }
 0x20f   : >> { %999 = vmatmul.f32.gmra.mxu2 %v942_v61 }
 0x211   : >> { %1075 = vmatmul.f32.gmra.mxu3 %v1018_v3 }
 0x213   : >> { %914 = vmatmul.f32.gmra.mxu1 %v863_v0  ;;  %1142 = vmatmul.f32.gmra.mxu0 %v1091_v1 }
 0x217   : >> { %1148 = vmatmul.f32.vlgmr.msrb.gmra.mxu2 %v1093_v2 }
 0x21b   : >> { %917 = vmatmul.f32.gmra.mxu1 %v864_v4  ;;  %1145 = vmatmul.f32.gmra.mxu0 %v1092_v5 }
 0x21f   : >> { %1151 = vmatmul.f32.gmra.mxu2 %v1094_v6 }
 0x223   : >> { %920 = vmatmul.f32.gmra.mxu1 %v865_v14 }
 0x22b   : >> { %923 = vmatmul.f32.gmra.mxu1 %v866_v7 }
 0x250   : >> { %v839_v15 = vpop.f32.mrf.mxu1  ;;  %v827_v8 = vpop.f32.mrf.mxu0 }
 0x251   : >> { %v851_v29 = vadd.f32 %v3013_v30, %v827_v8 }
 0x258   : >> { %v842_v17 = vpop.f32.mrf.mxu1  ;;  %v830_v18 = vpop.f32.mrf.mxu0 }
 0x259   : >> { %v852_v36 = vadd.f32 %v3009_v44, %v830_v18 }
 0x25a   : >> { %v979_v19 = vpop.f32.mrf.mxu2 }
 0x25c   : >> { %v1055_v13 = vpop.f32.mrf.mxu3 }
 0x260   : >> { %v845_v20 = vpop.f32.mrf.mxu1  ;;  %v833_v21 = vpop.f32.mrf.mxu0 }
 0x261   : >> { %v853_v50 = vadd.f32 %v3005_v43, %v833_v21  ;;  %v855_v43 = vadd.f32 %v2997_v41, %v839_v15 }
 0x262   : >> { %v982_v22 = vpop.f32.mrf.mxu2 }
 0x264   : >> { %v1058_v28 = vpop.f32.mrf.mxu3 }
 0x268   : >> { %v848_v23 = vpop.f32.mrf.mxu1  ;;  %v836_v24 = vpop.f32.mrf.mxu0 }
 0x26a   : >> { %v985_v26 = vpop.f32.mrf.mxu2 }
 0x26c   : >> { %v1061_v38 = vpop.f32.mrf.mxu3 }
 0x270   : >> { %v903_v31 = vpop.f32.mrf.mxu1  ;;  %v1131_v32 = vpop.f32.mrf.mxu0 }
 0x271   : >> { %v927_v12 = vadd.f32 %v903_v31, %v851_v29 }
 0x272   : >> { %v988_v33 = vpop.f32.mrf.mxu2 }
 0x273   : >> { %v1003_v25 = vadd.f32 %v979_v19, %v927_v12 }
 0x274   : >> { %v1064_v58 = vpop.f32.mrf.mxu3 }
 0x275   : >> { %v1079_v35 = vadd.f32 %v1055_v13, %v1003_v25 }
 0x277   : >> { %v3563_v30 = vadd.f32 %v1131_v32, %v1079_v35   ;;  %v857_v32 = vadd.f32 %v2989_v27, %v845_v20  ;;  %v2808_v20 = vld [vmem:[%s4053_s2 + $0x1] ss:$0 sm:$0xff] (%p767_p5) }
 0x278   : >> { %v906_v39 = vpop.f32.mrf.mxu1  ;;  %v1134_v34 = vpop.f32.mrf.mxu0 }
 0x279   : >> { %v4067_v37 = vmov %v3563_v30  ;;  %v928_v45 = vadd.f32 %v906_v39, %v852_v36  ;;  %v854_v30 = vadd.f32 %v3001_v42, %v836_v24 }
 0x27a   : >> { %v991_v48 = vpop.f32.mrf.mxu2 }
 0x27b   : >> { %v1004_v47 = vadd.f32 %v982_v22, %v928_v45  ;;  %v856_v22 = vadd.f32 %v2993_v40, %v842_v17 }
 0x27c   : >> { %v1067_v4 = vpop.f32.mrf.mxu3 }
 0x27d   : >> { %v1080_v49 = vadd.f32 %v1058_v28, %v1004_v47 }
 0x27f   : >> { %v3566_v44 = vadd.f32 %v1134_v34, %v1080_v49  }
 0x280   : >> { %v909_v53 = vpop.f32.mrf.mxu1  ;;  %v1137_v10 = vpop.f32.mrf.mxu0 }
 0x281   : >> { %v4068_v51 = vmov %v3566_v44  ;;  %v929_v57 = vadd.f32 %v909_v53, %v853_v50  ;;  %v1176_v53 = vmul.f32 (%p767_p5), 0.5, %v3338_v54 }
 0x282   : >> { %v994_v59 = vpop.f32.mrf.mxu2 }
 0x283   : >> { %v1005_v55 = vadd.f32 %v985_v26, %v929_v57 }
 0x284   : >> { %v1070_v21 = vpop.f32.mrf.mxu3 }
 0x285   : >> { %v1081_v61 = vadd.f32 %v1061_v38, %v1005_v55  ;;  %v858_v38 = vadd.f32 %v2985_v11, %v848_v23  ;;  %v1178_v23 = vmul.f32 (%p767_p5), 0.5, %v3336_v52  ;;  %v1177_v55 = vmul.f32 (%p767_p5), 0.5, %v3342_v9 }
 0x286   : > { %v1182_v52 = vmul.f32 (%p767_p5), 0.5, %v3347_v60 }
 0x287   : >> { %v1157_v62 = vadd.f32 %v1137_v10, %v1081_v61   ;;  %v1179_v10 = vmul.f32 (%p767_p5), 0.5, %v3340_v56 }
 0x288   : >> { %v912_v0 = vpop.f32.mrf.mxu1  ;;  %v1140_v1 = vpop.f32.mrf.mxu0 }
 0x289   : >> { %v930_v2 = vadd.f32 %v912_v0, %v854_v30  ;;  %v4077_v30 = vmov %v4067_v37  ;;  %v3603_v57 = vadd.f32 (%p767_p5), %v2808_v20, %v1157_v62 }
 0x28a   : >> { %v997_v6 = vpop.f32.mrf.mxu2 }
 0x28b   : >> { %v1006_v3 = vadd.f32 %v988_v33, %v930_v2  ;;  %v1210_v54 = vsub.f32 (%p767_p5), 0.0, %v3603_v57  ;;  %v1186_v56 = vmul.f32 (%p767_p5), 0.5, %v3603_v57 }
 0x28c   : >> { %v1073_v12 = vpop.f32.mrf.mxu3 }
 0x28d   : >> { %v1082_v5 = vadd.f32 %v1064_v58, %v1006_v3  ;;  %v3606_v58 = vadd.f32 (%p767_p5), %v2808_v20, %v4067_v37  ;;  %v3626_v0 = vadd.f32 (%p767_p5), %v1186_v56, %v1178_v23  ;;  %v3679_v56 = vmov (%p767_p5), 0.0  }
 0x28f   : >> { %v1158_v14 = vadd.f32 %v1140_v1, %v1082_v5   ;;  %v1184_v37 = vmul.f32 (%p767_p5), 0.5, %v3606_v58 }
 0x290   : >> { %v915_v44 = vpop.f32.mrf.mxu1  ;;  %v1143_v8 = vpop.f32.mrf.mxu0 }
 0x291   : >> { %v931_v7 = vadd.f32 %v915_v44, %v855_v43  ;;  %v4075_v43 = vmov %v1157_v62  ;;  %v4076_v44 = vmov %v4068_v51  ;;  %v3610_v61 = vadd.f32 (%p767_p5), %v2808_v20, %v1158_v14 }
 0x292   : >> { %v1000_v24 = vpop.f32.mrf.mxu2  ;;  %v1218_v62 = vmax.f32 (%p767_p5), %v1210_v54, 0.0  ;;  %v3628_v60 = vadd.f32 (%p767_p5), %v1184_v37, %v1176_v53  ;;  %v3677_v54 = vmov (%p767_p5), 0.0   ;;  %v3685_v37 = vmov (%p767_p5), 0.0  }
 0x293   : >> { %v1007_v18 = vadd.f32 %v991_v48, %v931_v7  ;;  %v1187_v9 = vmul.f32 (%p767_p5), 0.5, %v3610_v61  ;;  %v1211_v5 = vsub.f32 (%p767_p5), 0.0, %v3610_v61 }
 0x294   : >> { %v1076_v45 = vpop.f32.mrf.mxu3  ;;  %1236 = vrot.lane.b32.xlu1 (%p767_p5), %v1218_v62, %s3056_s11 }
 0x295   : >> { %v1083_v19 = vadd.f32 %v1067_v4, %v1007_v18  ;;  %v3630_v2 = vadd.f32 (%p767_p5), %v1187_v9, %v1179_v10  ;;  %v1180_v4 = vmul.f32 (%p767_p5), 0.5, %v3351_v16  ;;  %v1181_v18 = vmul.f32 (%p767_p5), 0.5, %v3353_v63 }
 0x296   : > { %v3687_v9 = vmov (%p767_p5), 0.0  }
 0x297   : >> { %v1159_v13 = vadd.f32 %v1143_v8, %v1083_v19  }
 0x298   : >> { %v918_v42 = vpop.f32.mrf.mxu1  ;;  %v1146_v29 = vpop.f32.mrf.mxu0 }
 0x299   : >> { %v932_v26 = vadd.f32 %v918_v42, %v856_v22  ;;  %v4074_v42 = vmov %v1158_v14 }
 0x29a   : >> { %v1149_v33 = vpop.f32.mrf.mxu2  ;;  %v1219_v42 = vmax.f32 (%p767_p5), %v1211_v5, 0.0 }
 0x29b   : >> { %v1008_v28 = vadd.f32 %v994_v59, %v932_v26  ;;  %v1183_v59 = vmul.f32 (%p767_p5), 0.5, %v3345_v46 }
 0x29c   : > { %1238 = vrot.lane.b32.xlu1 (%p767_p5), %v1219_v42, %s3056_s11 }
 0x29d   : >> { %v1084_v31 = vadd.f32 %v1070_v21, %v1008_v28 }
 0x29f   : >> { %v3572_v40 = vadd.f32 %v1146_v29, %v1084_v31  }
 0x2a0   : >> { %v921_v41 = vpop.f32.mrf.mxu1 }
 0x2a1   : >> { %v4069_v15 = vmov %v3572_v40  ;;  %v933_v25 = vadd.f32 %v921_v41, %v857_v32  ;;  %v4073_v41 = vmov %v1159_v13 }
 0x2a2   : >> { %v1152_v48 = vpop.f32.mrf.mxu2  ;;  %v4072_v40 = vmov %v4069_v15  ;;  %v1173_v8 = vadd.f32 (%p767_p5), %v2808_v20, %v4069_v15 }
 0x2a3   : >> { %v1009_v35 = vadd.f32 %v997_v6, %v933_v25  ;;  %v1208_v40 = vsub.f32 (%p767_p5), 0.0, %v3606_v58 }
 0x2a4   : > { %v1213_v28 = vsub.f32 (%p767_p5), 0.0, %v1173_v8 }
 0x2a5   : >> { %v1085_v36 = vadd.f32 %v1073_v12, %v1009_v35  ;;  %v1216_v1 = vmax.f32 (%p767_p5), %v1208_v40, 0.0  ;;  %v3681_v40 = vmov (%p767_p5), 0.0  }
 0x2a6   : > { %v1221_v31 = vmax.f32 (%p767_p5), %v1213_v28, 0.0 }
 0x2a7   : >> { %v1161_v17 = vadd.f32 %v1149_v33, %v1085_v36   ;;  %1232 = vrot.lane.b32.xlu0 (%p767_p5), %v1216_v1, %s3056_s11  ;;  %v1205_v33 = vmax.f32 (%p767_p5), %v1173_v8, 0.0 }
 0x2a8   : >> { %v924_v39 = vpop.f32.mrf.mxu1 }
 0x2a9   : >> { %v934_v34 = vadd.f32 %v924_v39, %v858_v38  ;;  %v4071_v27 = vmov %v1161_v17  ;;  %v3624_v30 = vadd.f32 (%p767_p5), %v2808_v20, %v1161_v17  ;;  %v1202_v38 = vmax.f32 (%p767_p5), %v3603_v57, 0.0 }
 0x2aa   : > { %v1200_v17 = vmax.f32 (%p767_p5), %v3606_v58, 0.0 }
 0x2ab   : >> { %v1010_v47 = vadd.f32 %v1000_v24, %v934_v34  ;;  %v1190_v14 = vmul.f32 (%p767_p5), 0.5, %v3624_v30  ;;  %v1214_v29 = vsub.f32 (%p767_p5), 0.0, %v3624_v30  ;;  %v1206_v57 = vmax.f32 (%p767_p5), %v3624_v30, 0.0 }
 0x2ad   : >> { %v1086_v49 = vadd.f32 %v1076_v45, %v1010_v47  ;;  %769 = sbr.rel (!%p767_p5) target bundleno = 432 (0x1b0), region = 124  ;;  %v3645_v16 = vadd.f32 (%p767_p5), %v1190_v14, %v1182_v52  ;;  %v1222_v15 = vmax.f32 (%p767_p5), %v1214_v29, 0.0  ;;  %v3675_v52 = vmov (%p767_p5), 0.0  }
 0x2af   : >> { %v1162_v50 = vadd.f32 %v1152_v48, %v1086_v49   ;;  %v1203_v48 = vmax.f32 (%p767_p5), %v3610_v61, 0.0 }
 0x2b1   : >> { %v4070_v11 = vmov %v1162_v50  ;;  %v3615_v27 = vadd.f32 (%p767_p5), %v2808_v20, %v1162_v50 }
 0x2b2   : > { %v3613_v11 = vadd.f32 %v2808_v20, %v4068_v51  ;;  %v1172_v51 = vadd.f32 %v2808_v20, %v1159_v13  ;;  %v1189_v13 = vmul.f32 0.5, %v1173_v8 }
 0x2b3   : > { %v1191_v43 = vmul.f32 0.5, %v3615_v27  ;;  %v1215_v63 = vsub.f32 0.0, %v3615_v27  ;;  %v1207_v10 = vmax.f32 %v3615_v27, 0.0  ;;  %v3683_v27 = vmov 0.0  }
 0x2b4   : > { %v1185_v46 = vmul.f32 0.5, %v3613_v11  ;;  %v1209_v6 = vsub.f32 0.0, %v3613_v11  ;;  %v1212_v44 = vsub.f32 0.0, %v1172_v51  ;;  %v1188_v7 = vmul.f32 0.5, %v1172_v51 }
 0x2b5   : > { %v3643_v19 = vadd.f32 %v1191_v43, %v1183_v59  ;;  %v3650_v26 = vadd.f32 %v1189_v13, %v1181_v18  ;;  %v1223_v32 = vmax.f32 %v1215_v63, 0.0  ;;  %v1204_v41 = vmax.f32 %v1172_v51, 0.0 }
 0x2b6   : > { %v3632_v3 = vadd.f32 %v1185_v46, %v1177_v55  ;;  %v1220_v21 = vmax.f32 %v1212_v44, 0.0  ;;  %v3647_v22 = vadd.f32 %v1188_v7, %v1180_v4  ;;  %v1217_v24 = vmax.f32 %v1209_v6, 0.0 }
 0x2b7   : > { %1246 = vrot.lane.b32.xlu1 %v1223_v32, %s3056_s11  ;;  %v1201_v49 = vmax.f32 %v3613_v11, 0.0  ;;  %v3673_v11 = vmov 0.0  }
 0x2b8   : > { %1240 = vrot.lane.b32.xlu2 %v1220_v21, %s3056_s11  ;;  %1234 = vrot.lane.b32.xlu0 %v1217_v24, %s3056_s11 }
 0x2c0   : > { %1242 = vrot.lane.b32.xlu2 %v1221_v31, %s3056_s11  ;;  %1244 = vrot.lane.b32.xlu0 %v1222_v15, %s3056_s11 }
 0x306   : > { %v1237_v39 = vpop.permute.xlu1 %1236 }
 0x307   : > { %v1258_v45 = vsel %vm748_vm0, %v1202_v38, %v1237_v39 }
 0x308   : > { %1266 = vst [vmem:[#allocation2 + $0x64] sm:$0xff] %v1258_v45 }
 0x30e   : > { %v1239_v50 = vpop.permute.xlu1 %1238 }
 0x30f   : > { %v1259_v23 = vsel %vm748_vm0, %v1203_v48, %v1239_v50 }
 0x310   : > { %1267 = vst [vmem:[#allocation2 + $0x74] sm:$0xff] %v1259_v23 }
 0x312   : > { %v1241_v12 = vpop.permute.xlu2 %1240 }
 0x313   : > { %v1260_v25 = vsel %vm748_vm0, %v1204_v41, %v1241_v12 }
 0x314   : > { %1268 = vst [vmem:[#allocation2 + $0x84] sm:$0xff] %v1260_v25 }
 0x319   : > { %v1233_v34 = vpop.permute.xlu0 %1232 }
 0x31a   : > { %v1243_v35 = vpop.permute.xlu2 %1242  ;;  %v1256_v47 = vsel %vm748_vm0, %v1200_v17, %v1233_v34 }
 0x31b   : > { %v1261_v36 = vsel %vm748_vm0, %v1205_v33, %v1243_v35  ;;  %1264 = vst [vmem:[#allocation2 + $0x44] sm:$0xff] %v1256_v47 }
 0x31c   : > { %1269 = vst [vmem:[#allocation2 + $0x94] sm:$0xff] %v1261_v36 }
 0x329   : > { %v1247_v58 = vpop.permute.xlu1 %1246 }
 0x32a   : > { %v1235_v20 = vpop.permute.xlu0 %1234  ;;  %v1263_v59 = vsel %vm748_vm0, %v1207_v10, %v1247_v58 }
 0x32b   : > { %v1257_v53 = vsel %vm748_vm0, %v1201_v49, %v1235_v20  ;;  %1271 = vst [vmem:[#allocation2 + $0xb4] sm:$0xff] %v1263_v59 }
 0x32c   : > { %1265 = vst [vmem:[#allocation2 + $0x54] sm:$0xff] %v1257_v53 }
 0x332   : > { %v1245_v55 = vpop.permute.xlu0 %1244 }
 0x333   : > { %v1262_v61 = vsel %vm748_vm0, %v1206_v57, %v1245_v55 }
 0x334   : > { %1270 = vst [vmem:[#allocation2 + $0xa4] sm:$0xff] %v1262_v61 }
 0x335 LB: >> { %s2345_s24 = smul.u32 640, %s3053_s22  ;;  %s2436_s28 = sshll.u32 %s3053_s22, 5  ;;  %s3053_s22 = sphi %s3689_s22, %s1277_s22   ;;  %v3049_v9 = vphi %v3687_v9, %v4088_v9   ;;  %v3045_v37 = vphi %v3685_v37, %v4087_v37   ;;  %v3041_v27 = vphi %v3683_v27, %v4086_v27   ;;  %v3037_v40 = vphi %v3681_v40, %v4085_v40   ;;  %v3033_v56 = vphi %v3679_v56, %v4084_v56   ;;  %v3029_v54 = vphi %v3677_v54, %v4083_v54   ;;  %v3025_v52 = vphi %v3675_v52, %v4082_v52   ;;  %v3021_v11 = vphi %v3673_v11, %v4081_v11  }
 0x336   : >> { %s3766_s29 = scalar_lea.vmem [#allocation2], %s2436_s28  ;;  %s1277_s22 = sadd.s32 1, %s3053_s22  }
 0x337   : >> { %s3722_s27 = scalar_lea.vmem %s4052_s1, %s2345_s24  ;;  %p1274_p6 = scmp.ge.s32.totalorder %s1277_s22, 5  }
 0x338   : >> { %v2361_v46 = vld [vmem:[%s3722_s27 + $0x1978] sm:$0xff]  ;;  %v2360_v30 = vld [vmem:[%s3722_s27 + $0x1970] sm:$0xff]  ;;  %v2359_v51 = vld [vmem:[%s3722_s27 + $0x1968] sm:$0xff]  ;;  %vm1920_vm1 = vcmask (%p1274_p6), 130048  }
 0x339   : >> { %2501 = vmatpush.msra.mxu1 %v2361_v46  ;;  %1317 = vmatpush.msra.mxu0 %v2361_v46  ;;  %v2395_v62 = vld [vmem:[%s3722_s27 + $0x1a78] sm:$0xff]  ;;  %v2394_v1 = vld [vmem:[%s3722_s27 + $0x1a70] sm:$0xff]  ;;  %v2358_v4 = vld [vmem:[%s3722_s27 + $0x1960] sm:$0xff] }
 0x33a   : >> { %1469 = vmatpush.msra.mxu2 %v2395_v62  ;;  %v2393_v5 = vld [vmem:[%s3722_s27 + $0x1a68] sm:$0xff]  ;;  %v2357_v6 = vld [vmem:[%s3722_s27 + $0x1958] sm:$0xff]  ;;  %v2392_v43 = vld [vmem:[%s3722_s27 + $0x1a60] sm:$0xff] }
 0x33b   : >> { %2502 = vmatpush.msra.mxu1 %v2360_v30  ;;  %1318 = vmatpush.msra.mxu0 %v2360_v30  ;;  %v2356_v14 = vld [vmem:[%s3722_s27 + $0x1950] sm:$0xff]  ;;  %v2412_v44 = vld [vmem:[%s3722_s27 + $0x1af8] sm:$0xff]  ;;  %v2355_v18 = vld [vmem:[%s3722_s27 + $0x1948] sm:$0xff] }
 0x33c   : >> { %1470 = vmatpush.msra.mxu2 %v2394_v1  ;;  %v2391_v7 = vld [vmem:[%s3722_s27 + $0x1a58] sm:$0xff]  ;;  %v2411_v8 = vld [vmem:[%s3722_s27 + $0x1af0] sm:$0xff]  ;;  %1545 = vmatpush.msra.mxu3 %v2412_v44  ;;  %v2410_v13 = vld [vmem:[%s3722_s27 + $0x1ae8] sm:$0xff] }
 0x33d   : >> { %2503 = vmatpush.msra.mxu1 %v2359_v51  ;;  %1319 = vmatpush.msra.mxu0 %v2359_v51  ;;  %v2390_v21 = vld [vmem:[%s3722_s27 + $0x1a50] sm:$0xff]  ;;  %v2354_v42 = vld [vmem:[%s3722_s27 + $0x1940] sm:$0xff]  ;;  %v2389_v24 = vld [vmem:[%s3722_s27 + $0x1a48] sm:$0xff] }
 0x33e   : >> { %1471 = vmatpush.msra.mxu2 %v2393_v5  ;;  %1546 = vmatpush.msra.mxu3 %v2411_v8  ;;  %v2409_v28 = vld [vmem:[%s3722_s27 + $0x1ae0] sm:$0xff]  ;;  %v2353_v63 = vld [vmem:[%s3722_s27 + $0x1938] sm:$0xff]  ;;  %v2352_v32 = vld [vmem:[%s3722_s27 + $0x1930] sm:$0xff] }
 0x33f   : >> { %2504 = vmatpush.msra.mxu1 %v2358_v4  ;;  %1320 = vmatpush.msra.mxu0 %v2358_v4  ;;  %v2388_v29 = vld [vmem:[%s3722_s27 + $0x1a40] sm:$0xff]  ;;  %v2408_v31 = vld [vmem:[%s3722_s27 + $0x1ad8] sm:$0xff]  ;;  %v2407_v41 = vld [vmem:[%s3722_s27 + $0x1ad0] sm:$0xff] }
 0x340   : >> { %1472 = vmatpush.msra.mxu2 %v2392_v43  ;;  %1547 = vmatpush.msra.mxu3 %v2410_v13  ;;  %v2387_v15 = vld [vmem:[%s3722_s27 + $0x1a38] sm:$0xff]  ;;  %v2351_v12 = vld [vmem:[%s3722_s27 + $0x1928] sm:$0xff]  ;;  %v2386_v25 = vld [vmem:[%s3722_s27 + $0x1a30] sm:$0xff] }
 0x341   : >> { %2505 = vmatpush.msra.mxu1 %v2357_v6  ;;  %1321 = vmatpush.msra.mxu0 %v2357_v6  ;;  %v2406_v33 = vld [vmem:[%s3722_s27 + $0x1ac8] sm:$0xff]  ;;  %v2350_v35 = vld [vmem:[%s3722_s27 + $0x1920] sm:$0xff]  ;;  %v2349_v17 = vld [vmem:[%s3722_s27 + $0x1918] sm:$0xff] }
 0x342   : >> { %1473 = vmatpush.msra.mxu2 %v2391_v7  ;;  %1548 = vmatpush.msra.mxu3 %v2409_v28  ;;  %v2385_v36 = vld [vmem:[%s3722_s27 + $0x1a28] sm:$0xff]  ;;  %v2405_v38 = vld [vmem:[%s3722_s27 + $0x1ac0] sm:$0xff]  ;;  %v2404_v34 = vld [vmem:[%s3722_s27 + $0x1ab8] sm:$0xff] }
 0x343   : >> { %2506 = vmatpush.msra.mxu1 %v2356_v14  ;;  %1322 = vmatpush.msra.mxu0 %v2356_v14  ;;  %v2384_v39 = vld [vmem:[%s3722_s27 + $0x1a20] sm:$0xff]  ;;  %v2348_v45 = vld [vmem:[%s3722_s27 + $0x1910] sm:$0xff]  ;;  %v2383_v47 = vld [vmem:[%s3722_s27 + $0x1a18] sm:$0xff] }
 0x344   : >> { %1474 = vmatpush.msra.mxu2 %v2390_v21  ;;  %1549 = vmatpush.msra.mxu3 %v2408_v31  ;;  %v2403_v48 = vld [vmem:[%s3722_s27 + $0x1ab0] sm:$0xff]  ;;  %v2347_v49 = vld [vmem:[%s3722_s27 + $0x1908] sm:$0xff]  ;;  %v2346_v23 = vld [vmem:[%s3722_s27 + $0x1900] sm:$0xff] }
 0x345   : >> { %2507 = vmatpush.msra.mxu1 %v2355_v18  ;;  %1323 = vmatpush.msra.mxu0 %v2355_v18  ;;  %v2382_v50 = vld [vmem:[%s3722_s27 + $0x1a10] sm:$0xff]  ;;  %v2402_v20 = vld [vmem:[%s3722_s27 + $0x1aa8] sm:$0xff]  ;;  %v1293_v53 = vld [vmem:[%s3766_s29 + $0x40] sm:$0xff] }
 0x346   : >> { %1475 = vmatpush.msra.mxu2 %v2389_v24  ;;  %1550 = vmatpush.msra.mxu3 %v2407_v41  ;;  %v1289_v10 = vld [vmem:[%s3766_s29] sm:$0xff]  ;;  %v2378_v57 = vld [vmem:[%s3722_s27 + $0x19f8] sm:$0xff]  ;;  %v2381_v55 = vld [vmem:[%s3722_s27 + $0x1a08] sm:$0xff] }
 0x347   : >> { %2508 = vmatpush.msra.mxu1 %v2354_v42  ;;  %1324 = vmatpush.msra.mxu0 %v2354_v42  ;;  %v2429_v58 = vld [vmem:[%s3722_s27 + $0x1b78] sm:$0xff]  ;;  %v2401_v59 = vld [vmem:[%s3722_s27 + $0x1aa0] sm:$0xff]  ;;  %v2377_v61 = vld [vmem:[%s3722_s27 + $0x19f0] sm:$0xff] }
 0x348   : >> { %1476 = vmatpush.msra.mxu2 %v2388_v29  ;;  %1551 = vmatpush.msra.mxu3 %v2406_v33  ;;  %v2428_v46 = vld [vmem:[%s3722_s27 + $0x1b70] sm:$0xff]  ;;  %v2380_v30 = vld [vmem:[%s3722_s27 + $0x1a00] sm:$0xff]  ;;  %v2400_v51 = vld [vmem:[%s3722_s27 + $0x1a98] sm:$0xff] }
 0x349   : >> { %2509 = vmatpush.msra.mxu1 %v2353_v63  ;;  %1325 = vmatpush.msra.mxu0 %v2353_v63  ;;  %v2376_v62 = vld [vmem:[%s3722_s27 + $0x19e8] sm:$0xff]  ;;  %v2399_v5 = vld [vmem:[%s3722_s27 + $0x1a90] sm:$0xff]  ;;  %v2375_v6 = vld [vmem:[%s3722_s27 + $0x19e0] sm:$0xff] }
 0x34a   : >> { %1477 = vmatpush.msra.mxu2 %v2387_v15  ;;  %1552 = vmatpush.msra.mxu3 %v2405_v38  ;;  %v2427_v1 = vld [vmem:[%s3722_s27 + $0x1b68] sm:$0xff]  ;;  %v2426_v43 = vld [vmem:[%s3722_s27 + $0x1b60] sm:$0xff]  ;;  %v1294_v14 = vld [vmem:[%s3766_s29 + $0x50] sm:$0xff] }
 0x34b   : >> { %2510 = vmatpush.msra.mxu1 %v2352_v32  ;;  %1326 = vmatpush.msra.mxu0 %v2352_v32  ;;  %v1442_v4 = vld [vmem:[%s3766_s29 + $0x4] sm:$0xff]  ;;  %v1290_v44 = vld [vmem:[%s3766_s29 + $0x10] sm:$0xff]  ;;  %v2374_v7 = vld [vmem:[%s3722_s27 + $0x19d8] sm:$0xff] }
 0x34c   : >> { %1478 = vmatpush.msra.mxu2 %v2386_v25  ;;  %1553 = vmatpush.msra.mxu3 %v2404_v34  ;;  %v3788_v8 = vld [vmem:[%s3722_s27 + $0x1b58] sm:$0xff]  ;;  %v2398_v18 = vld [vmem:[%s3722_s27 + $0x1a88] sm:$0xff]  ;;  %v2373_v21 = vld [vmem:[%s3722_s27 + $0x19d0] sm:$0xff] }
 0x34d   : >> { %2511 = vmatpush.msra.mxu1 %v2351_v12  ;;  %1327 = vmatpush.msra.mxu0 %v2351_v12  ;;  %v3793_v13 = vld [vmem:[%s3722_s27 + $0x1b50] sm:$0xff]  ;;  %v2397_v42 = vld [vmem:[%s3722_s27 + $0x1a80] sm:$0xff]  ;;  %v2372_v24 = vld [vmem:[%s3722_s27 + $0x19c8] sm:$0xff] }
 0x34e   : >> { %1479 = vmatpush.msra.mxu2 %v2385_v36  ;;  %1554 = vmatpush.msra.mxu3 %v2403_v48  ;;  %v3799_v28 = vld [vmem:[%s3722_s27 + $0x1b48] sm:$0xff]  ;;  %v1443_v63 = vld [vmem:[%s3766_s29 + $0x14] sm:$0xff]  ;;  %v2371_v31 = vld [vmem:[%s3722_s27 + $0x19c0] sm:$0xff] }
 0x34f   : >> { %2512 = vmatpush.msra.mxu1 %v2350_v35  ;;  %1328 = vmatpush.msra.mxu0 %v2350_v35  ;;  %v1518_v29 = vld [vmem:[%s3766_s29 + $0x6] sm:$0xff]  ;;  %v2370_v12 = vld [vmem:[%s3722_s27 + $0x19b8] sm:$0xff]  ;;  %v2369_v33 = vld [vmem:[%s3722_s27 + $0x19b0] sm:$0xff] }
 0x350   : >> { %1480 = vmatpush.msra.mxu2 %v2384_v39  ;;  %1555 = vmatpush.msra.mxu3 %v2402_v20  ;;  %v3806_v32 = vld [vmem:[%s3722_s27 + $0x1b40] sm:$0xff]  ;;  %v2421_v25 = vld [vmem:[%s3722_s27 + $0x1b38] sm:$0xff]  ;;  %v2420_v35 = vld [vmem:[%s3722_s27 + $0x1b30] sm:$0xff] }
 0x351   : >> { %2513 = vmatpush.msra.mxu1 %v2349_v17  ;;  %1329 = vmatpush.msra.mxu0 %v2349_v17  ;;  %v1295_v15 = vld [vmem:[%s3766_s29 + $0x60] sm:$0xff]  ;;  %v2368_v36 = vld [vmem:[%s3722_s27 + $0x19a8] sm:$0xff]  ;;  %v1519_v39 = vld [vmem:[%s3766_s29 + $0x16] sm:$0xff] }
 0x352   : >> { %1481 = vmatpush.msra.mxu2 %v2383_v47  ;;  %1556 = vmatpush.msra.mxu3 %v2401_v59  ;;  %v1291_v41 = vld [vmem:[%s3766_s29 + $0x20] sm:$0xff]  ;;  %v2419_v38 = vld [vmem:[%s3722_s27 + $0x1b28] sm:$0xff]  ;;  %v1296_v47 = vld [vmem:[%s3766_s29 + $0x70] sm:$0xff] }
 0x353   : >> { %2514 = vmatpush.msra.mxu1 %v2348_v45  ;;  %1330 = vmatpush.msra.mxu0 %v2348_v45  ;;  %v1444_v17 = vld [vmem:[%s3766_s29 + $0x24] sm:$0xff]  ;;  %v1292_v48 = vld [vmem:[%s3766_s29 + $0x30] sm:$0xff] }
 0x354   : >> { %1482 = vmatpush.msra.mxu2 %v2382_v50  ;;  %1557 = vmatpush.msra.mxu3 %v2400_v51  ;;  %v2367_v34 = vld [vmem:[%s3722_s27 + $0x19a0] sm:$0xff]  ;;  %v2417_v50 = vld [vmem:[%s3722_s27 + $0x1b18] sm:$0xff]  ;;  %v2365_v20 = vld [vmem:[%s3722_s27 + $0x1990] sm:$0xff] }
 0x355   : >> { %2515 = vmatpush.msra.mxu1 %v2347_v49  ;;  %1331 = vmatpush.msra.mxu0 %v2347_v49  ;;  %v2418_v45 = vld [vmem:[%s3722_s27 + $0x1b20] sm:$0xff]  ;;  %v2366_v49 = vld [vmem:[%s3722_s27 + $0x1998] sm:$0xff] }
 0x356   : >> { %1483 = vmatpush.msra.mxu2 %v2381_v55  ;;  %1558 = vmatpush.msra.mxu3 %v2399_v5  ;;  %v2363_v55 = vld [vmem:[%s3722_s27 + $0x1980] sm:$0xff]  ;;  %v1521_v51 = vld [vmem:[%s3766_s29 + $0x36] sm:$0xff] }
 0x357   : >> { %2516 = vmatpush.msra.mxu1 %v2346_v23  ;;  %1332 = vmatpush.msra.mxu0 %v2346_v23  ;;  %v2416_v23 = vld [vmem:[%s3722_s27 + $0x1b10] sm:$0xff]  ;;  %v2414_v59 = vld [vmem:[%s3722_s27 + $0x1b00] sm:$0xff] }
 0x358   : >> { %1345 = vmatmul.f32.vlgmr.msra.gmra.mxu1 %v1293_v53  ;;  %1333 = vmatmul.f32.vlgmr.msra.gmra.mxu0 %v1289_v10  ;;  %v2364_v53 = vld [vmem:[%s3722_s27 + $0x1988] sm:$0xff] }
 0x359   : >> { %1393 = vmatpush.msrb.mxu1 %v2378_v57  ;;  %1621 = vmatpush.msrb.mxu0 %v2429_v58  ;;  %v2415_v10 = vld [vmem:[%s3722_s27 + $0x1b08] sm:$0xff]  ;;  %v1445_v57 = vld [vmem:[%s3766_s29 + $0x34] sm:$0xff] }
 0x35a   : >> { %1484 = vmatpush.msra.mxu2 %v2380_v30  ;;  %1559 = vmatpush.msra.mxu3 %v2398_v18  ;;  %v1446_v30 = vld [vmem:[%s3766_s29 + $0x44] sm:$0xff]  ;;  %v1449_v18 = vld [vmem:[%s3766_s29 + $0x74] sm:$0xff] }
 0x35b   : >> { %1394 = vmatpush.msrb.mxu1 %v2377_v61  ;;  %1622 = vmatpush.msrb.mxu0 %v2428_v46  ;;  %v1366_v61 = vld [vmem:[%s3766_s29 + $0x2] sm:$0xff] }
 0x35c   : >> { %1485 = vmatmul.f32.vlgmr.msra.gmra.mxu2 %v1442_v4  ;;  %1560 = vmatpush.msra.mxu3 %v2397_v42  ;;  %v1447_v4 = vld [vmem:[%s3766_s29 + $0x54] sm:$0xff]  ;;  %v1522_v5 = vld [vmem:[%s3766_s29 + $0x46] sm:$0xff] }
 0x35d   : >> { %1395 = vmatpush.msrb.mxu1 %v2376_v62  ;;  %1623 = vmatpush.msrb.mxu0 %v2427_v1  ;;  %v1367_v62 = vld [vmem:[%s3766_s29 + $0x12] sm:$0xff]  ;;  %v1598_v42 = vld [vmem:[%s3766_s29 + $0x48] sm:$0xff] }
 0x35e   : >> { %2517 = vmatpush.msrb.mxu2 %v2429_v58  ;;  %1561 = vmatmul.f32.vlgmr.msra.gmra.mxu3 %v1518_v29  ;;  %v1520_v58 = vld [vmem:[%s3766_s29 + $0x26] sm:$0xff]  ;;  %v1599_v29 = vld [vmem:[%s3766_s29 + $0x58] sm:$0xff] }
 0x35f   : >> { %1396 = vmatpush.msrb.mxu1 %v2375_v6  ;;  %1624 = vmatpush.msrb.mxu0 %v2426_v43  ;;  %v1368_v6 = vld [vmem:[%s3766_s29 + $0x22] sm:$0xff] }
 0x360   : >> { %1348 = vmatmul.f32.gmra.mxu1 %v1294_v14  ;;  %1336 = vmatmul.f32.gmra.mxu0 %v1290_v44  ;;  %v1448_v14 = vld [vmem:[%s3766_s29 + $0x64] sm:$0xff]  ;;  %v1523_v44 = vld [vmem:[%s3766_s29 + $0x56] sm:$0xff] }
 0x361   : >> { %1397 = vmatpush.msrb.mxu1 %v2374_v7  ;;  %1625 = vmatpush.msrb.mxu0 %v3788_v8  ;;  %v1369_v7 = vld [vmem:[%s3766_s29 + $0x32] sm:$0xff] }
 0x362   : >> { %2518 = vmatpush.msrb.mxu2 %v2428_v46  ;;  %v1594_v46 = vld [vmem:[%s3766_s29 + $0x8] sm:$0xff] }
 0x363   : >> { %1398 = vmatpush.msrb.mxu1 %v2373_v21  ;;  %1626 = vmatpush.msrb.mxu0 %v3793_v13  ;;  %v1524_v21 = vld [vmem:[%s3766_s29 + $0x66] sm:$0xff] }
 0x364   : >> { %1488 = vmatmul.f32.gmra.mxu2 %v1443_v63  ;;  %v1371_v63 = vld [vmem:[%s3766_s29 + $0x52] sm:$0xff] }
 0x365   : >> { %1399 = vmatpush.msrb.mxu1 %v2372_v24  ;;  %1627 = vmatpush.msrb.mxu0 %v3799_v28  ;;  %v1600_v24 = vld [vmem:[%s3766_s29 + $0x68] sm:$0xff] }
 0x366   : >> { %2519 = vmatpush.msrb.mxu2 %v2427_v1  ;;  %1564 = vmatmul.f32.gmra.mxu3 %v1519_v39  ;;  %v1595_v1 = vld [vmem:[%s3766_s29 + $0x18] sm:$0xff] }
 0x367   : >> { %1400 = vmatpush.msrb.mxu1 %v2371_v31  ;;  %1628 = vmatpush.msrb.mxu0 %v3806_v32  ;;  %v1601_v31 = vld [vmem:[%s3766_s29 + $0x78] sm:$0xff] }
 0x368   : >> { %1351 = vmatmul.f32.gmra.mxu1 %v1295_v15  ;;  %1339 = vmatmul.f32.gmra.mxu0 %v1291_v41  ;;  %v1373_v15 = vld [vmem:[%s3766_s29 + $0x72] sm:$0xff] }
 0x369   : >> { %1401 = vmatpush.msrb.mxu1 %v2370_v12  ;;  %1629 = vmatpush.msrb.mxu0 %v2421_v25 }
 0x36a   : >> { %2520 = vmatpush.msrb.mxu2 %v2426_v43  ;;  %v1596_v43 = vld [vmem:[%s3766_s29 + $0x28] sm:$0xff] }
 0x36b   : >> { %1402 = vmatpush.msrb.mxu1 %v2369_v33  ;;  %1630 = vmatpush.msrb.mxu0 %v2420_v35 }
 0x36c   : >> { %1491 = vmatmul.f32.gmra.mxu2 %v1444_v17 }
 0x36d   : >> { %1403 = vmatpush.msrb.mxu1 %v2368_v36  ;;  %1631 = vmatpush.msrb.mxu0 %v2419_v38 }
 0x36e   : >> { %2521 = vmatpush.msrb.mxu2 %v3788_v8  ;;  %1567 = vmatmul.f32.gmra.mxu3 %v1520_v58  ;;  %v1597_v8 = vld [vmem:[%s3766_s29 + $0x38] sm:$0xff] }
 0x36f   : >> { %1404 = vmatpush.msrb.mxu1 %v2367_v34  ;;  %1632 = vmatpush.msrb.mxu0 %v2418_v45 }
 0x370   : >> { %1354 = vmatmul.f32.gmra.mxu1 %v1296_v47  ;;  %1342 = vmatmul.f32.gmra.mxu0 %v1292_v48 }
 0x371   : >> { %1405 = vmatpush.msrb.mxu1 %v2366_v49  ;;  %1633 = vmatpush.msrb.mxu0 %v2417_v50 }
 0x372   : >> { %2522 = vmatpush.msrb.mxu2 %v3793_v13  ;;  %v1370_v13 = vld [vmem:[%s3766_s29 + $0x42] sm:$0xff] }
 0x373   : >> { %1406 = vmatpush.msrb.mxu1 %v2365_v20  ;;  %1634 = vmatpush.msrb.mxu0 %v2416_v23 }
 0x374   : >> { %1494 = vmatmul.f32.gmra.mxu2 %v1445_v57 }
 0x375   : >> { %1407 = vmatpush.msrb.mxu1 %v2364_v53  ;;  %1635 = vmatpush.msrb.mxu0 %v2415_v10 }
 0x376   : >> { %2523 = vmatpush.msrb.mxu2 %v3799_v28  ;;  %1570 = vmatmul.f32.gmra.mxu3 %v1521_v51  ;;  %v1525_v28 = vld [vmem:[%s3766_s29 + $0x76] sm:$0xff] }
 0x377   : >> { %1408 = vmatpush.msrb.mxu1 %v2363_v55  ;;  %1636 = vmatpush.msrb.mxu0 %v2414_v59 }
 0x378   : >> { %1409 = vmatmul.f32.vlgmr.msrb.gmra.mxu1 %v1366_v61  ;;  %1637 = vmatmul.f32.vlgmr.msrb.gmra.mxu0 %v1594_v46 }
 0x379   : >> { %2524 = vmatpush.msrb.mxu2 %v3806_v32  ;;  %v1372_v32 = vld [vmem:[%s3766_s29 + $0x62] sm:$0xff] }
 0x37b   : >> { %2525 = vmatpush.msrb.mxu2 %v2421_v25 }
 0x37c   : >> { %1497 = vmatmul.f32.gmra.mxu2 %v1446_v30 }
 0x37d   : >> { %2526 = vmatpush.msrb.mxu2 %v2420_v35 }
 0x37e   : >> { %1573 = vmatmul.f32.gmra.mxu3 %v1522_v5 }
 0x37f   : >> { %2527 = vmatpush.msrb.mxu2 %v2419_v38 }
 0x380   : >> { %1412 = vmatmul.f32.gmra.mxu1 %v1367_v62  ;;  %1640 = vmatmul.f32.gmra.mxu0 %v1595_v1 }
 0x381   : >> { %2528 = vmatpush.msrb.mxu2 %v2418_v45 }
 0x383   : >> { %2529 = vmatpush.msrb.mxu2 %v2417_v50 }
 0x384   : >> { %1500 = vmatmul.f32.gmra.mxu2 %v1447_v4 }
 0x385   : >> { %2530 = vmatpush.msrb.mxu2 %v2416_v23 }
 0x386   : >> { %1576 = vmatmul.f32.gmra.mxu3 %v1523_v44 }
 0x387   : >> { %2531 = vmatpush.msrb.mxu2 %v2415_v10 }
 0x388   : >> { %1415 = vmatmul.f32.gmra.mxu1 %v1368_v6  ;;  %1643 = vmatmul.f32.gmra.mxu0 %v1596_v43 }
 0x389   : >> { %2532 = vmatpush.msrb.mxu2 %v2414_v59 }
 0x38c   : >> { %1503 = vmatmul.f32.gmra.mxu2 %v1448_v14 }
 0x38e   : >> { %1579 = vmatmul.f32.gmra.mxu3 %v1524_v21 }
 0x390   : >> { %1418 = vmatmul.f32.gmra.mxu1 %v1369_v7  ;;  %1646 = vmatmul.f32.gmra.mxu0 %v1597_v8 }
 0x394   : >> { %1506 = vmatmul.f32.gmra.mxu2 %v1449_v18 }
 0x396   : >> { %1582 = vmatmul.f32.gmra.mxu3 %v1525_v28 }
 0x398   : >> { %1421 = vmatmul.f32.gmra.mxu1 %v1370_v13  ;;  %1649 = vmatmul.f32.gmra.mxu0 %v1598_v42 }
 0x39c   : >> { %1655 = vmatmul.f32.vlgmr.msrb.gmra.mxu2 %v1600_v24 }
 0x3a0   : >> { %1424 = vmatmul.f32.gmra.mxu1 %v1371_v63  ;;  %1652 = vmatmul.f32.gmra.mxu0 %v1599_v29 }
 0x3a4   : >> { %1658 = vmatmul.f32.gmra.mxu2 %v1601_v31 }
 0x3a8   : >> { %1427 = vmatmul.f32.gmra.mxu1 %v1372_v32 }
 0x3b0   : >> { %1430 = vmatmul.f32.gmra.mxu1 %v1373_v15 }
 0x3d5   : >> { %v1346_v41 = vpop.f32.mrf.mxu1  ;;  %v1334_v12 = vpop.f32.mrf.mxu0 }
 0x3d6   : >> { %v1358_v49 = vadd.f32 %v3049_v9, %v1334_v12 }
 0x3dd   : >> { %v1349_v25 = vpop.f32.mrf.mxu1  ;;  %v1337_v33 = vpop.f32.mrf.mxu0 }
 0x3de   : >> { %v1359_v58 = vadd.f32 %v3045_v37, %v1337_v33 }
 0x3df   : >> { %v1486_v35 = vpop.f32.mrf.mxu2 }
 0x3e1   : >> { %v1562_v39 = vpop.f32.mrf.mxu3 }
 0x3e5   : >> { %v1352_v36 = vpop.f32.mrf.mxu1  ;;  %v1340_v38 = vpop.f32.mrf.mxu0 }
 0x3e6   : >> { %v1360_v4 = vadd.f32 %v3041_v27, %v1340_v38 }
 0x3e7   : >> { %v1489_v17 = vpop.f32.mrf.mxu2 }
 0x3e9   : >> { %v1565_v48 = vpop.f32.mrf.mxu3 }
 0x3ed   : >> { %v1355_v34 = vpop.f32.mrf.mxu1  ;;  %v1343_v45 = vpop.f32.mrf.mxu0 }
 0x3ef   : >> { %v1492_v47 = vpop.f32.mrf.mxu2 }
 0x3f1   : >> { %v1568_v59 = vpop.f32.mrf.mxu3 }
 0x3f5   : >> { %v1410_v50 = vpop.f32.mrf.mxu1  ;;  %v1638_v20 = vpop.f32.mrf.mxu0 }
 0x3f6   : >> { %v1434_v23 = vadd.f32 %v1410_v50, %v1358_v49 }
 0x3f7   : >> { %v1495_v10 = vpop.f32.mrf.mxu2 }
 0x3f8   : >> { %v1510_v53 = vadd.f32 %v1486_v35, %v1434_v23 }
 0x3f9   : >> { %v1571_v44 = vpop.f32.mrf.mxu3 }
 0x3fa   : >> { %v1586_v57 = vadd.f32 %v1562_v39, %v1510_v53 }
 0x3fc   : >> { %v3865_v9 = vadd.f32 %v1638_v20, %v1586_v57   ;;  %v1364_v20 = vadd.f32 %v3025_v52, %v1352_v36  ;;  %v2829_v36 = vld [vmem:[%s4053_s2 + $0x2] ss:$0 sm:$0xff] (%p1274_p6) }
 0x3fd   : >> { %v1413_v61 = vpop.f32.mrf.mxu1  ;;  %v1641_v46 = vpop.f32.mrf.mxu0 }
 0x3fe   : >> { %v4078_v55 = vmov %v3865_v9  ;;  %v1435_v30 = vadd.f32 %v1413_v61, %v1359_v58  ;;  %v1361_v9 = vadd.f32 %v3037_v40, %v1343_v45  ;;  %v1363_v40 = vadd.f32 %v3029_v54, %v1349_v25 }
 0x3ff   : >> { %v1498_v62 = vpop.f32.mrf.mxu2 }
 0x400   : >> { %v1511_v51 = vadd.f32 %v1489_v17, %v1435_v30 }
 0x401   : >> { %v1574_v63 = vpop.f32.mrf.mxu3 }
 0x402   : >> { %v1587_v1 = vadd.f32 %v1565_v48, %v1511_v51 }
 0x404   : >> { %v3868_v37 = vadd.f32 %v1641_v46, %v1587_v1  }
 0x405   : >> { %v1416_v6 = vpop.f32.mrf.mxu1  ;;  %v1644_v43 = vpop.f32.mrf.mxu0 }
 0x406   : >> { %v4079_v5 = vmov %v3868_v37  ;;  %v1436_v14 = vadd.f32 %v1416_v6, %v1360_v4  ;;  %v1362_v37 = vadd.f32 %v3033_v56, %v1346_v41  ;;  %v1785_v4 = vld [vmem:[%s4054_s3 + $0x70] sm:$0xff] (%p1274_p6) }
 0x407   : >> { %v1501_v8 = vpop.f32.mrf.mxu2 }
 0x408   : >> { %v1512_v7 = vadd.f32 %v1492_v47, %v1436_v14 }
 0x409   : >> { %v1577_v17 = vpop.f32.mrf.mxu3 }
 0x40a   : >> { %v1588_v18 = vadd.f32 %v1568_v59, %v1512_v7  ;;  %v1365_v59 = vadd.f32 %v3021_v11, %v1355_v34  ;;  %v1786_v34 = vld [vmem:[%s4054_s3 + $0x78] sm:$0xff] (%p1274_p6) }
 0x40b   : > { %2534 = vmatpush.msra.mxu2 (%p1274_p6), %v1786_v34  ;;  %2535 = vmatpush.msra.mxu3 (%p1274_p6), %v1786_v34 }
 0x40c   : >> { %v3871_v27 = vadd.f32 %v1644_v43, %v1588_v18   ;;  %1791 = vmatpush.msra.mxu0 (%p1274_p6), %v1786_v34  ;;  %2533 = vmatpush.msra.mxu1 (%p1274_p6), %v1786_v34 }
 0x40d   : >> { %v1419_v13 = vpop.f32.mrf.mxu1  ;;  %v1647_v42 = vpop.f32.mrf.mxu0  ;;  %2537 = vmatpush.msra.mxu2 (%p1274_p6), %v1785_v4  ;;  %2538 = vmatpush.msra.mxu3 (%p1274_p6), %v1785_v4 }
 0x40e   : >> { %v4080_v21 = vmov %v3871_v27  ;;  %v1437_v24 = vadd.f32 %v1419_v13, %v1361_v9  ;;  %v4088_v9 = vmov %v4078_v55  ;;  %1792 = vmatpush.msra.mxu0 (%p1274_p6), %v1785_v4  ;;  %2536 = vmatpush.msra.mxu1 (%p1274_p6), %v1785_v4 }
 0x40f   : >> { %v1504_v31 = vpop.f32.mrf.mxu2  ;;  %v3923_v7 = vadd.f32 (%p1274_p6), %v2829_v36, %v4080_v21 }
 0x410   : >> { %v1513_v28 = vadd.f32 %v1495_v10, %v1437_v24 }
 0x411   : >> { %v1580_v41 = vpop.f32.mrf.mxu3  ;;  %v1709_v4 = vmax.f32 (%p1274_p6), %v3923_v7, 0.0 }
 0x412   : >> { %v1589_v29 = vadd.f32 %v1571_v44, %v1513_v28  ;;  %v3920_v44 = vadd.f32 (%p1274_p6), %v2829_v36, %v4078_v55  ;;  %v1783_v55 = vld [vmem:[%s4054_s3 + $0x60] sm:$0xff] (%p1274_p6) }
 0x414   : >> { %v1665_v32 = vadd.f32 %v1647_v42, %v1589_v29   ;;  %v1782_v29 = vld [vmem:[%s4054_s3 + $0x58] sm:$0xff] (%p1274_p6)  ;;  %v1707_v34 = vmax.f32 (%p1274_p6), %v3920_v44, 0.0 }
 0x415   : >> { %v1422_v15 = vpop.f32.mrf.mxu1  ;;  %v1650_v33 = vpop.f32.mrf.mxu0 }
 0x416   : >> { %v1438_v12 = vadd.f32 %v1422_v15, %v1362_v37  ;;  %v4087_v37 = vmov %v4079_v5  ;;  %v3928_v18 = vadd.f32 (%p1274_p6), %v2829_v36, %v1665_v32 }
 0x417   : >> { %v1507_v45 = vpop.f32.mrf.mxu2 }
 0x418   : >> { %v1514_v35 = vadd.f32 %v1498_v62, %v1438_v12 }
 0x419   : >> { %v1583_v46 = vpop.f32.mrf.mxu3 }
 0x41a   : >> { %v1590_v38 = vadd.f32 %v1574_v63, %v1514_v35  ;;  %v1718_v63 = vsub.f32 (%p1274_p6), 0.0, %v3928_v18  ;;  %v1781_v35 = vld [vmem:[%s4054_s3 + $0x50] sm:$0xff] (%p1274_p6) }
 0x41c   : >> { %v1666_v39 = vadd.f32 %v1650_v33, %v1590_v38  }
 0x41d   : >> { %v1425_v27 = vpop.f32.mrf.mxu1  ;;  %v1653_v49 = vpop.f32.mrf.mxu0 }
 0x41e   : >> { %v1439_v47 = vadd.f32 %v1425_v27, %v1363_v40  ;;  %v4085_v40 = vmov %v1665_v32  ;;  %v4086_v27 = vmov %v4080_v21  ;;  %v3908_v6 = vadd.f32 (%p1274_p6), %v2829_v36, %v1666_v39 }
 0x41f   : >> { %v1656_v10 = vpop.f32.mrf.mxu2  ;;  %v1717_v21 = vsub.f32 (%p1274_p6), 0.0, %v3923_v7  ;;  %v1780_v27 = vld [vmem:[%s4054_s3 + $0x48] sm:$0xff] (%p1274_p6) }
 0x420   : >> { %v1515_v48 = vadd.f32 %v1501_v8, %v1439_v47  ;;  %v3926_v8 = vadd.f32 (%p1274_p6), %v2829_v36, %v4079_v5  ;;  %v1719_v9 = vsub.f32 (%p1274_p6), 0.0, %v3908_v6  ;;  %v1715_v5 = vsub.f32 (%p1274_p6), 0.0, %v3920_v44 }
 0x422   : >> { %v1591_v50 = vadd.f32 %v1577_v17, %v1515_v48  ;;  %v1716_v28 = vsub.f32 (%p1274_p6), 0.0, %v3926_v8  ;;  %v1723_v38 = vmax.f32 (%p1274_p6), %v1715_v5, 0.0  ;;  %v1725_v17 = vmax.f32 (%p1274_p6), %v1717_v21, 0.0 }
 0x424   : >> { %v1667_v23 = vadd.f32 %v1653_v49, %v1591_v50   ;;  %v1724_v40 = vmax.f32 (%p1274_p6), %v1716_v28, 0.0  ;;  %v2814_v47 = vpack.i.bf16 (%p1274_p6), %v1725_v17, %v1723_v38  ;;  %v1778_v49 = vld [vmem:[%s4054_s3 + $0x38] sm:$0xff] (%p1274_p6)  ;;  %v1777_v50 = vld [vmem:[%s4054_s3 + $0x30] sm:$0xff] (%p1274_p6) }
 0x425   : >> { %v1428_v56 = vpop.f32.mrf.mxu1 }
 0x426   : >> { %v1440_v53 = vadd.f32 %v1428_v56, %v1364_v20  ;;  %v4084_v56 = vmov %v1666_v39  ;;  %v3912_v14 = vadd.f32 (%p1274_p6), %v2829_v36, %v1667_v23  ;;  %v1726_v39 = vmax.f32 (%p1274_p6), %v1718_v63, 0.0  ;;  %v1776_v20 = vld [vmem:[%s4054_s3 + $0x28] sm:$0xff] (%p1274_p6) }
 0x427   : >> { %v1659_v51 = vpop.f32.mrf.mxu2  ;;  %v1774_v56 = vld [vmem:[%s4054_s3 + $0x18] sm:$0xff] (%p1274_p6) }
 0x428   : >> { %v1516_v57 = vadd.f32 %v1504_v31, %v1440_v53  ;;  %v1720_v42 = vsub.f32 (%p1274_p6), 0.0, %v3912_v14  ;;  %v1727_v31 = vmax.f32 (%p1274_p6), %v1719_v9, 0.0  ;;  %v2824_v48 = vpack.i.bf16 (%p1274_p6), %v1726_v39, %v1724_v40  ;;  %v1772_v53 = vld [vmem:[%s4054_s3 + $0x8] sm:$0xff] (%p1274_p6) }
 0x42a   : >> { %v1592_v58 = vadd.f32 %v1580_v41, %v1516_v57  ;;  %v1728_v32 = vmax.f32 (%p1274_p6), %v1720_v42, 0.0  ;;  %v1773_v41 = vld [vmem:[%s4054_s3 + $0x10] sm:$0xff] (%p1274_p6)  ;;  %v1711_v57 = vmax.f32 (%p1274_p6), %v3908_v6, 0.0 }
 0x42c   : >> { %v1668_v61 = vadd.f32 %v1656_v10, %v1592_v58   ;;  %v1771_v10 = vld [vmem:[%s4054_s3] sm:$0xff] (%p1274_p6) }
 0x42d   : >> { %v1431_v54 = vpop.f32.mrf.mxu1 }
 0x42e   : >> { %v1441_v25 = vadd.f32 %v1431_v54, %v1365_v59  ;;  %v4082_v52 = vmov %v1668_v61  ;;  %v4083_v54 = vmov %v1667_v23  ;;  %v3910_v43 = vadd.f32 (%p1274_p6), %v2829_v36, %v1668_v61  ;;  %v1775_v23 = vld [vmem:[%s4054_s3 + $0x20] sm:$0xff] (%p1274_p6) }
 0x42f   : > { %v1784_v52 = vld [vmem:[%s4054_s3 + $0x68] sm:$0xff] (%p1274_p6) }
 0x430   : >> { %v1517_v30 = vadd.f32 %v1507_v45, %v1441_v25  ;;  %v1721_v13 = vsub.f32 (%p1274_p6), 0.0, %v3910_v43  ;;  %2540 = vmatpush.msra.mxu2 (%p1274_p6), %v1784_v52  ;;  %2541 = vmatpush.msra.mxu3 (%p1274_p6), %v1784_v52  ;;  %v1779_v45 = vld [vmem:[%s4054_s3 + $0x40] sm:$0xff] (%p1274_p6)  ;;  %v1713_v58 = vmax.f32 (%p1274_p6), %v3910_v43, 0.0 }
 0x431   : > { %1793 = vmatpush.msra.mxu0 (%p1274_p6), %v1784_v52  ;;  %2539 = vmatpush.msra.mxu1 (%p1274_p6), %v1784_v52 }
 0x432   : >> { %v1593_v62 = vadd.f32 %v1583_v46, %v1517_v30  ;;  %1276 = sbr.rel (!%p1274_p6) target bundleno = 821 (0x335), region = 135  ;;  %v1729_v37 = vmax.f32 (%p1274_p6), %v1721_v13, 0.0  ;;  %2543 = vmatpush.msra.mxu2 (%p1274_p6), %v1783_v55  ;;  %2544 = vmatpush.msra.mxu3 (%p1274_p6), %v1783_v55 }
 0x433   : > { %1794 = vmatpush.msra.mxu0 (%p1274_p6), %v1783_v55  ;;  %2542 = vmatpush.msra.mxu1 (%p1274_p6), %v1783_v55 }
 0x434   : >> { %v1669_v1 = vadd.f32 %v1659_v51, %v1593_v62   ;;  %v2809_v12 = vpack.i.bf16 (%p1274_p6), %v1729_v37, %v1727_v31  ;;  %2546 = vmatpush.msra.mxu2 (%p1274_p6), %v1782_v29  ;;  %2547 = vmatpush.msra.mxu3 (%p1274_p6), %v1782_v29  ;;  %v1710_v31 = vmax.f32 (%p1274_p6), %v3928_v18, 0.0 }
 0x435   : > { %1795 = vmatpush.msra.mxu0 (%p1274_p6), %v1782_v29  ;;  %2545 = vmatpush.msra.mxu1 (%p1274_p6), %v1782_v29  ;;  %v1708_v29 = vmax.f32 (%p1274_p6), %v3926_v8, 0.0 }
 0x436   : >> { %v4081_v11 = vmov %v1669_v1  ;;  %2810 = vrot.lane.b32.xlu0 (%p1274_p6), %v2809_v12, %s3056_s11  ;;  %2549 = vmatpush.msra.mxu2 (%p1274_p6), %v1781_v35  ;;  %v2830_v12 = vld [vmem:[%s4055_s4] ss:$0 sm:$0xff] (%p1274_p6) }
 0x437   : > { %v3914_v11 = vadd.f32 %v2829_v36, %v1669_v1  ;;  %2550 = vmatpush.msra.mxu3 %v1781_v35  ;;  %1796 = vmatpush.msra.mxu0 %v1781_v35  ;;  %v1712_v1 = vmax.f32 %v3912_v14, 0.0 }
 0x438   : > { %2552 = vmatpush.msra.mxu2 %v1780_v27  ;;  %2548 = vmatpush.msra.mxu1 %v1781_v35 }
 0x439   : > { %v1722_v24 = vsub.f32 0.0, %v3914_v11  ;;  %2553 = vmatpush.msra.mxu3 %v1780_v27  ;;  %1797 = vmatpush.msra.mxu0 %v1780_v27  ;;  %v1714_v36 = vmax.f32 %v3914_v11, 0.0 }
 0x43a   : > { %2555 = vmatpush.msra.mxu2 %v1779_v45  ;;  %2551 = vmatpush.msra.mxu1 %v1780_v27 }
 0x43b   : > { %v1730_v15 = vmax.f32 %v1722_v24, 0.0  ;;  %2556 = vmatpush.msra.mxu3 %v1779_v45  ;;  %1798 = vmatpush.msra.mxu0 %v1779_v45 }
 0x43c   : > { %2558 = vmatpush.msra.mxu2 %v1778_v49  ;;  %2554 = vmatpush.msra.mxu1 %v1779_v45 }
 0x43d   : > { %v2819_v33 = vpack.i.bf16 %v1730_v15, %v1728_v32  ;;  %2559 = vmatpush.msra.mxu3 %v1778_v49  ;;  %1799 = vmatpush.msra.mxu0 %v1778_v49 }
 0x43e   : > { %2815 = vrot.lane.b32.xlu0 %v2814_v47, %s3056_s11  ;;  %2561 = vmatpush.msra.mxu2 %v1777_v50 }
 0x43f   : > { %2820 = vrot.lane.b32.xlu1 %v2819_v33, %s3056_s11  ;;  %2562 = vmatpush.msra.mxu3 %v1777_v50 }
 0x440   : > { %2564 = vmatpush.msra.mxu2 %v1776_v20  ;;  %2557 = vmatpush.msra.mxu1 %v1778_v49 }
 0x441   : > { %2565 = vmatpush.msra.mxu3 %v1776_v20  ;;  %1800 = vmatpush.msra.mxu0 %v1777_v50 }
 0x442   : > { %2567 = vmatpush.msra.mxu2 %v1775_v23  ;;  %2560 = vmatpush.msra.mxu1 %v1777_v50 }
 0x443   : > { %2568 = vmatpush.msra.mxu3 %v1775_v23  ;;  %1801 = vmatpush.msra.mxu0 %v1776_v20 }
 0x444   : > { %2570 = vmatpush.msra.mxu2 %v1774_v56  ;;  %2563 = vmatpush.msra.mxu1 %v1776_v20 }
 0x445   : > { %2571 = vmatpush.msra.mxu3 %v1774_v56  ;;  %1802 = vmatpush.msra.mxu0 %v1775_v23 }
 0x446   : > { %2573 = vmatpush.msra.mxu2 %v1773_v41  ;;  %2566 = vmatpush.msra.mxu1 %v1775_v23 }
 0x447   : > { %2825 = vrot.lane.b32.xlu1 %v2824_v48, %s3056_s11  ;;  %2574 = vmatpush.msra.mxu3 %v1773_v41 }
 0x448   : > { %1803 = vmatpush.msra.mxu0 %v1774_v56  ;;  %2569 = vmatpush.msra.mxu1 %v1774_v56 }
 0x449   : > { %2576 = vmatpush.msra.mxu2 %v1772_v53  ;;  %2577 = vmatpush.msra.mxu3 %v1772_v53 }
 0x44a   : > { %1804 = vmatpush.msra.mxu0 %v1773_v41  ;;  %2572 = vmatpush.msra.mxu1 %v1773_v41 }
 0x44b   : > { %2579 = vmatpush.msra.mxu2 %v1771_v10  ;;  %2580 = vmatpush.msra.mxu3 %v1771_v10 }
 0x44c   : > { %1805 = vmatpush.msra.mxu0 %v1772_v53  ;;  %2575 = vmatpush.msra.mxu1 %v1772_v53 }
 0x44e   : > { %1806 = vmatpush.msra.mxu0 %v1771_v10  ;;  %2578 = vmatpush.msra.mxu1 %v1771_v10 }
 0x4a8   : > { %v2811_v59 = vpop.permute.xlu0 %2810 }
 0x4a9   : > { %v2813_v54 = vunpack.i.h.bf16 %v2811_v59  ;;  %v2812_v25 = vunpack.i.l.bf16 %v2811_v59 }
 0x4ab   : > { %v1767_v46 = vsel %vm748_vm0, %v1711_v57, %v2812_v25  ;;  %v1769_v30 = vsel %vm748_vm0, %v1713_v58, %v2813_v54  ;;  %v1683_v25 = vmul.f32 0.5, %v3628_v60 }
 0x4ac   : > { %1819 = vmatmul.f32.vlgmr.msra.gmra.mxu2 %v1767_v46  ;;  %1825 = vmatmul.f32.vlgmr.msra.gmra.mxu3 %v1769_v30  ;;  %v1691_v46 = vmul.f32 0.5, %v3920_v44  ;;  %v1685_v44 = vmul.f32 0.5, %v3626_v0  ;;  %v1688_v0 = vmul.f32 0.5, %v3650_v26  ;;  %v1697_v26 = vmul.f32 0.5, %v3910_v43 }
 0x4ae   : > { %v1699_v30 = vadd.f32 %v1691_v46, %v1683_v25 }
 0x4b0   : > { %v2816_v52 = vpop.permute.xlu0 %2815 }
 0x4b1   : > { %v2821_v61 = vpop.permute.xlu1 %2820  ;;  %v2818_v9 = vunpack.i.h.bf16 %v2816_v52  ;;  %v2817_v13 = vunpack.i.l.bf16 %v2816_v52 }
 0x4b2   : > { %v2823_v51 = vunpack.i.h.bf16 %v2821_v61  ;;  %v2822_v62 = vunpack.i.l.bf16 %v2821_v61 }
 0x4b3   : > { %v1763_v5 = vsel %vm748_vm0, %v1707_v34, %v2817_v13  ;;  %v1765_v21 = vsel %vm748_vm0, %v1709_v4, %v2818_v9  ;;  %v1684_v9 = vmul.f32 0.5, %v3632_v3  ;;  %v1692_v13 = vmul.f32 0.5, %v3926_v8 }
 0x4b4   : > { %v1768_v42 = vsel %vm748_vm0, %v1712_v1, %v2822_v62  ;;  %v1770_v24 = vsel %vm748_vm0, %v1714_v36, %v2823_v51  ;;  %1807 = vmatmul.f32.vlgmr.msra.gmra.mxu0 %v1763_v5  ;;  %1813 = vmatmul.f32.vlgmr.msra.gmra.mxu1 %v1765_v21  ;;  %v1832_v51 = vmul.f32 0.5, %v1699_v30  ;;  %v1687_v62 = vmul.f32 0.5, %v3647_v22 }
 0x4b5   : > { %1822 = vmatmul.f32.gmra.mxu2 %v1768_v42  ;;  %1828 = vmatmul.f32.gmra.mxu3 %v1770_v24  ;;  %v1695_v1 = vmul.f32 0.5, %v3908_v6  ;;  %v1700_v24 = vadd.f32 %v1692_v13, %v1684_v9  ;;  %v1693_v22 = vmul.f32 0.5, %v3923_v7  ;;  %v1698_v5 = vmul.f32 0.5, %v3914_v11 }
 0x4b6   : > { %v1696_v7 = vmul.f32 0.5, %v3912_v14 }
 0x4b7   : > { %v1703_v4 = vadd.f32 %v1695_v1, %v1687_v62  ;;  %v1833_v6 = vmul.f32 0.5, %v1700_v24  ;;  %v1701_v21 = vadd.f32 %v1693_v22, %v1685_v44 }
 0x4b9   : > { %v2826_v55 = vpop.permute.xlu1 %2825  ;;  %v1836_v52 = vmul.f32 0.5, %v1703_v4  ;;  %v1834_v8 = vmul.f32 0.5, %v1701_v21 }
 0x4ba   : > { %v2828_v28 = vunpack.i.h.bf16 %v2826_v55  ;;  %v2827_v63 = vunpack.i.l.bf16 %v2826_v55  ;;  %v1690_v55 = vmul.f32 0.5, %v3643_v19 }
 0x4bc   : > { %v1764_v37 = vsel %vm748_vm0, %v1708_v29, %v2827_v63  ;;  %v1766_v32 = vsel %vm748_vm0, %v1710_v31, %v2828_v28  ;;  %v1706_v3 = vadd.f32 %v1698_v5, %v1690_v55  ;;  %v1686_v29 = vmul.f32 0.5, %v3630_v2 }
 0x4bd   : > { %1810 = vmatmul.f32.gmra.mxu0 %v1764_v37  ;;  %1816 = vmatmul.f32.gmra.mxu1 %v1766_v32  ;;  %v1694_v31 = vmul.f32 0.5, %v3928_v18  ;;  %v1689_v2 = vmul.f32 0.5, %v3645_v16 }
 0x4be   : > { %v1839_v37 = vmul.f32 0.5, %v1706_v3 }
 0x4bf   : > { %v1702_v11 = vadd.f32 %v1694_v31, %v1686_v29 }
 0x52f   : > { %v1820_v15 = vpop.f32.mrf.mxu2  ;;  %v1826_v50 = vpop.f32.mrf.mxu3 }
 0x530   : > { %v1821_v45 = vadd.f32 %v2830_v12, %v1820_v15  ;;  %v1827_v53 = vadd.f32 %v2830_v12, %v1826_v50 }
 0x531   : > { %v1808_v33 = vpop.f32.mrf.mxu0  ;;  %v1814_v35 = vpop.f32.mrf.mxu1 }
 0x532   : > { %v1815_v38 = vadd.f32 %v2830_v12, %v1814_v35  ;;  %v1809_v17 = vadd.f32 %v2830_v12, %v1808_v33  ;;  %v1844_v56 = vmul.f32 0.5, %v1821_v45  ;;  %v1846_v57 = vmul.f32 0.5, %v1827_v53 }
 0x533   : > { %v1835_v35 = vmul.f32 0.5, %v1702_v11 }
 0x534   : > { %v1842_v40 = vmul.f32 0.5, %v1815_v38  ;;  %v1840_v39 = vmul.f32 0.5, %v1809_v17 }
 0x536   : > { %1860 = vrot.lane.b32.xlu0 %v1842_v40, %s3056_s11  ;;  %1856 = vrot.lane.b32.xlu2 %v1840_v39, %s3056_s11  ;;  %v1705_v39 = vadd.f32 %v1697_v26, %v1689_v2 }
 0x538   : > { %v1823_v27 = vpop.f32.mrf.mxu2  ;;  %v1829_v59 = vpop.f32.mrf.mxu3 }
 0x539   : > { %v1824_v47 = vadd.f32 %v2830_v12, %v1823_v27  ;;  %v1830_v61 = vadd.f32 %v2830_v12, %v1829_v59  ;;  %v1838_v27 = vmul.f32 0.5, %v1705_v39 }
 0x53a   : > { %v1817_v48 = vpop.f32.mrf.mxu1  ;;  %v1811_v41 = vpop.f32.mrf.mxu0 }
 0x53b   : > { %v1818_v49 = vadd.f32 %v2830_v12, %v1817_v48  ;;  %v1845_v20 = vmul.f32 0.5, %v1824_v47  ;;  %v1812_v10 = vadd.f32 %v2830_v12, %v1811_v41  ;;  %v1847_v54 = vmul.f32 0.5, %v1830_v61 }
 0x53c   : > { %v1704_v12 = vadd.f32 %v1696_v7, %v1688_v0 }
 0x53d   : > { %v1843_v23 = vmul.f32 0.5, %v1818_v49  ;;  %v1841_v58 = vmul.f32 0.5, %v1812_v10 }
 0x53e   : > { %1866 = vrot.lane.b32.xlu0 %v1845_v20, %s3056_s11  ;;  %1864 = vrot.lane.b32.xlu2 %v1844_v56, %s3056_s11  ;;  %v1837_v38 = vmul.f32 0.5, %v1704_v12 }
 0x53f   : > { %1862 = vrot.lane.b32.xlu1 %v1843_v23, %s3056_s11 }
 0x546   : > { %1858 = vrot.lane.b32.xlu2 %v1841_v58, %s3056_s11 }
 0x547   : > { %1868 = vrot.lane.b32.xlu1 %v1846_v57, %s3056_s11 }
 0x54e   : > { %1870 = vrot.lane.b32.xlu2 %v1847_v54, %s3056_s11 }
 0x590   : > { %v1857_v36 = vpop.permute.xlu2 %1856 }
 0x591   : > { %v1880_v34 = vadd.f32 %v1857_v36, %v1832_v51 }
 0x593   : > { %1896 = vrot.lane.b32.xlu0 %v1880_v34, %s3056_s11 }
 0x598   : > { %v1865_v42 = vpop.permute.xlu2 %1864 }
 0x599   : > { %v1884_v60 = vadd.f32 %v1865_v42, %v1836_v52 }
 0x59b   : > { %1904 = vrot.lane.b32.xlu1 %v1884_v60, %s3056_s11 }
 0x5a0   : > { %v1859_v28 = vpop.permute.xlu2 %1858 }
 0x5a1   : > { %v1881_v63 = vadd.f32 %v1859_v28, %v1833_v6 }
 0x5a3   : > { %1898 = vrot.lane.b32.xlu1 %v1881_v63, %s3056_s11 }
 0x5a8   : > { %v1861_v32 = vpop.permute.xlu0 %1860  ;;  %v1871_v15 = vpop.permute.xlu2 %1870 }
 0x5a9   : > { %v1882_v19 = vadd.f32 %v1861_v32, %v1834_v8  ;;  %v1887_v33 = vadd.f32 %v1871_v15, %v1839_v37 }
 0x5ab   : > { %1900 = vrot.lane.b32.xlu2 %v1882_v19, %s3056_s11  ;;  %1910 = vrot.lane.b32.xlu1 %v1887_v33, %s3056_s11 }
 0x5b0   : > { %v1867_v18 = vpop.permute.xlu0 %1866 }
 0x5b1   : > { %v1863_v14 = vpop.permute.xlu1 %1862  ;;  %v1885_v40 = vadd.f32 %v1867_v18, %v1837_v38 }
 0x5b2   : > { %v1883_v17 = vadd.f32 %v1863_v14, %v1835_v35 }
 0x5b3   : > { %1906 = vrot.lane.b32.xlu2 %v1885_v40, %s3056_s11 }
 0x5b4   : > { %1902 = vrot.lane.b32.xlu0 %v1883_v17, %s3056_s11 }
 0x5b9   : > { %v1869_v45 = vpop.permute.xlu1 %1868 }
 0x5ba   : > { %v1886_v16 = vadd.f32 %v1869_v45, %v1838_v27 }
 0x5bc   : > { %1908 = vrot.lane.b32.xlu0 %v1886_v16, %s3056_s11 }
 0x605   : > { %v1901_v43 = vpop.permute.xlu2 %1900  ;;  %v1897_v47 = vpop.permute.xlu0 %1896 }
 0x606   : > { %1923 = vst.msk [vmem:[%s3101_s23 + $0x10] sm:$0xff] %vm1920_vm1, %v1901_v43 }
 0x607   : > { %1921 = vst.msk [vmem:[%s3101_s23] sm:$0xff] %vm1920_vm1, %v1897_v47 }
 0x60d   : > { %v1907_v48 = vpop.permute.xlu2 %1906  ;;  %v1905_v49 = vpop.permute.xlu1 %1904 }
 0x60e   : > { %1926 = vst.msk [vmem:[%s3101_s23 + $0x28] sm:$0xff] %vm1920_vm1, %v1907_v48 }
 0x60f   : > { %1925 = vst.msk [vmem:[%s3101_s23 + $0x20] sm:$0xff] %vm1920_vm1, %v1905_v49 }
 0x615   : > { %v1899_v50 = vpop.permute.xlu1 %1898 }
 0x616   : > { %1922 = vst.msk [vmem:[%s3101_s23 + $0x8] sm:$0xff] %vm1920_vm1, %v1899_v50 }
 0x61d   : > { %v1911_v20 = vpop.permute.xlu1 %1910 }
 0x61e   : > { %1928 = vst.msk [vmem:[%s3101_s23 + $0x38] sm:$0xff] %vm1920_vm1, %v1911_v20 }
 0x626   : > { %v1903_v23 = vpop.permute.xlu0 %1902 }
 0x627   : > { %1924 = vst.msk [vmem:[%s3101_s23 + $0x18] sm:$0xff] %vm1920_vm1, %v1903_v23 }
 0x62e   : > { %v1909_v56 = vpop.permute.xlu0 %1908 }
 0x62f   : > { %1927 = vst.msk [vmem:[%s3101_s23 + $0x30] sm:$0xff] %vm1920_vm1, %v1909_v56 }
 0x630 PF: > { %s15_s18 = sadd.s32 1, %s2945_s18  }
 0x631   : > { %p12_p7 = scmp.ge.s32.totalorder %s15_s18, 4  }
 0x633   :  { %14 = sbr.rel (!%p12_p7) target bundleno = 1 (0x1), region = 146 }

</bundles_post_ra>
